<compile_context>
chip_gen: v5e
topology: v5e:2x2
jax: 0.10.0
libtpu: 0.0.40
codegen_flags: <defaults>
</compile_context>

<pallas_src>
import math
import numpy as np

import jax
import jax.numpy as jnp
from jax import lax
from jax.experimental import pallas as pl
from jax.experimental.pallas import tpu as pltpu


LANE = 128          # feature-axis padding (lane-dense stores)
TILE = 256          # node/cluster row tile and matmul tile (v6e sweet spot)


def _round_up(v, m):
    return ((v + m - 1) // m) * m


# ----------------------------------------------------------------------------
# Kernel 1: masked per-dst segment softmax over precomputed node scores.
#   raw[d, s] = s_dst[d] + s_src[s]          (bias already folded into s_dst)
#   att[d, s] = softmax_s(raw[d, s]) restricted to existing edges s -> d
# ----------------------------------------------------------------------------
def _edge_att_kernel(ssrc_ref, sdst_ref, m_ref, att_ref):
    raw = sdst_ref[...] + ssrc_ref[...]                 # [TD,1]+[1,Np] -> [TD,Np]
    valid = m_ref[...] > 0                              # bf16 structure mask
    masked = jnp.where(valid, raw, -1e30)
    rowmax = jnp.max(masked, axis=1, keepdims=True)
    ex = jnp.where(valid, jnp.exp(masked - rowmax), 0.0)
    denom = jnp.sum(ex, axis=1, keepdims=True)
    # rows with no incoming edge stay all-zero; exact division (no approx rcp)
    att_ref[...] = ex / jnp.maximum(denom, 1e-20)


def _att_row_tile(n_pad):
    # keep double-buffered (mask bf16 in + att f32 out) under ~24 MiB scoped VMEM
    td = TILE
    while td > 8 and td * n_pad * (2 + 4) * 2 > 24 * (1 << 20):
        td //= 2
    return max(td, 8)


def edge_attention(s_src_row, s_dst_col, m_ds_bf16):
    n_pad = m_ds_bf16.shape[0]
    td = _att_row_tile(n_pad)
    grid = (n_pad // td,)
    return pl.pallas_call(
        _edge_att_kernel,
        out_shape=jax.ShapeDtypeStruct((n_pad, n_pad), jnp.float32),
        grid_spec=pltpu.PrefetchScalarGridSpec(
            num_scalar_prefetch=0,
            grid=grid,
            in_specs=[
                pl.BlockSpec((1, n_pad), lambda i: (0, 0)),   # s_src (invariant, tiny)
                pl.BlockSpec((td, 1), lambda i: (i, 0)),      # s_dst rows of this tile
                pl.BlockSpec((td, n_pad), lambda i: (i, 0)),  # mask tile [dst, src], bf16
            ],
            out_specs=pl.BlockSpec((td, n_pad), lambda i: (i, 0)),
        ),
        compiler_params=pltpu.CompilerParams(
            dimension_semantics=("parallel",)),
    )(s_src_row, s_dst_col, m_ds_bf16)


# ----------------------------------------------------------------------------
# Generic contraction-tiled matmuls (no full-resident operands; f32 accumulate)
# ----------------------------------------------------------------------------
def _mm_nn_kernel(a_ref, b_ref, o_ref, acc_ref):
    @pl.when(pl.program_id(2) == 0)
    def _():
        acc_ref[...] = jnp.zeros_like(acc_ref)
    acc_ref[...] += jnp.dot(a_ref[...], b_ref[...],
                            preferred_element_type=jnp.float32)

    @pl.when(pl.program_id(2) == pl.num_programs(2) - 1)
    def _():
        o_ref[...] = acc_ref[...].astype(o_ref.dtype)


def _mm_nt_kernel(a_ref, b_ref, o_ref, acc_ref):
    @pl.when(pl.program_id(2) == 0)
    def _():
        acc_ref[...] = jnp.zeros_like(acc_ref)
    acc_ref[...] += lax.dot_general(a_ref[...], b_ref[...],
                                    (((1,), (1,)), ((), ())),
                                    preferred_element_type=jnp.float32)

    @pl.when(pl.program_id(2) == pl.num_programs(2) - 1)
    def _():
        o_ref[...] = acc_ref[...].astype(o_ref.dtype)


def _pick(dim, pref):
    return pref if dim % pref == 0 else 128


def matmul(a, b, out_dtype):
    """C = A @ B, tiled over (M, N, K)."""
    m, k = a.shape
    k2, n = b.shape
    assert k == k2
    tm, tn, tk = _pick(m, TILE), _pick(n, TILE), _pick(k, TILE)
    return pl.pallas_call(
        _mm_nn_kernel,
        out_shape=jax.ShapeDtypeStruct((m, n), out_dtype),
        grid_spec=pltpu.PrefetchScalarGridSpec(
            num_scalar_prefetch=0,
            grid=(m // tm, n // tn, k // tk),
            in_specs=[pl.BlockSpec((tm, tk), lambda i, j, l: (i, l)),
                      pl.BlockSpec((tk, tn), lambda i, j, l: (l, j))],
            out_specs=pl.BlockSpec((tm, tn), lambda i, j, l: (i, j)),
            scratch_shapes=[pltpu.VMEM((tm, tn), jnp.float32)]),
        compiler_params=pltpu.CompilerParams(
            dimension_semantics=("parallel", "parallel", "arbitrary")),
    )(a, b)


def matmul_nt(a, b, out_dtype):
    """C = A @ B^T, tiled over (M, N, K) with B given as [N, K]."""
    m, k = a.shape
    n, k2 = b.shape
    assert k == k2
    tm, tn, tk = _pick(m, TILE), _pick(n, TILE), _pick(k, TILE)
    return pl.pallas_call(
        _mm_nt_kernel,
        out_shape=jax.ShapeDtypeStruct((m, n), out_dtype),
        grid_spec=pltpu.PrefetchScalarGridSpec(
            num_scalar_prefetch=0,
            grid=(m // tm, n // tn, k // tk),
            in_specs=[pl.BlockSpec((tm, tk), lambda i, j, l: (i, l)),
                      pl.BlockSpec((tn, tk), lambda i, j, l: (j, l))],
            out_specs=pl.BlockSpec((tm, tn), lambda i, j, l: (i, j)),
            scratch_shapes=[pltpu.VMEM((tm, tn), jnp.float32)]),
        compiler_params=pltpu.CompilerParams(
            dimension_semantics=("parallel", "parallel", "arbitrary")),
    )(a, b)


# ----------------------------------------------------------------------------
# Parameter init: self.lin = Linear(2*C, 1), PyTorch-style uniform bounds.
# First C weights act on x[src], last C on x[dst].
# ----------------------------------------------------------------------------
def init_edgepool_params(key, c):
    kw, kb = jax.random.split(key)
    bound = 1.0 / math.sqrt(2 * c)
    w = jax.random.uniform(kw, (1, 2 * c), jnp.float32, -bound, bound)
    b = jax.random.uniform(kb, (1,), jnp.float32, -bound, bound)
    return w[:, :c], w[:, c:], b.reshape(1, 1)


def _node_scores(x_pad, w_src, w_dst, b, c):
    """One tiny [Np,C]@[C,2] matmul hoisted out of kernel 1 (plain jnp)."""
    c_pad = x_pad.shape[1]
    w2 = jnp.zeros((c_pad, 2), jnp.float32)
    w2 = w2.at[:c, 0].set(w_src.reshape(-1))
    w2 = w2.at[:c, 1].set(w_dst.reshape(-1))
    ns = x_pad @ w2                                       # [Np, 2]
    s_src_row = ns[:, 0].reshape(1, -1)                   # [1, Np]  (lane-oriented)
    s_dst_col = ns[:, 1:2] + b.reshape(1, 1)              # [Np, 1]  (bias folded)
    return s_src_row, s_dst_col


# ----------------------------------------------------------------------------
# Full forward (host glue: greedy matching; everything dense stays on device)
# ----------------------------------------------------------------------------
def edge_pooling_forward(params, x, x_score, edge_index, edge_attr, batch,
                         add_to_edge_score=0.5):
    del x_score, edge_attr   # unused by the reference forward (dropout = 0)
    w_src, w_dst, b = params

    x = jnp.asarray(x, jnp.float32)
    n, c = x.shape
    src = np.asarray(edge_index[0], np.int64)
    dst = np.asarray(edge_index[1], np.int64)
    batch_np = np.asarray(batch, np.int64)

    # Padding: node axis to multiples of TILE with an EVEN tile count (v7x
    # megacore splits the parallel grid across 2 TensorCores), features to 128.
    n_pad = _round_up(max(n, 2 * TILE), TILE)
    if (n_pad // TILE) % 2 == 1:
        n_pad += TILE
    c_pad = _round_up(c, LANE)

    src_d = jnp.asarray(src, jnp.int32)
    dst_d = jnp.asarray(dst, jnp.int32)

    # Device-side structure build: H2D traffic is only O(E) indices + O(N*C) x.
    x_pad = jnp.zeros((n_pad, c_pad), jnp.float32).at[:n, :c].set(x)
    m_ds = jnp.zeros((n_pad, n_pad), jnp.bfloat16).at[dst_d, src_d].set(1.0)

    # Kernel 1: per-edge raw score + per-dst segment softmax.
    s_src_row, s_dst_col = _node_scores(x_pad, w_src, w_dst, b, c)
    att = edge_attention(s_src_row, s_dst_col, m_ds)

    # Gather only the E per-edge softmaxed scores to host (O(E) D2H, not O(N^2)).
    e_dev = att[dst_d, src_d] + add_to_edge_score
    e = np.asarray(jax.block_until_ready(e_dev), np.float32)

    # --- greedy __merge_edges__ (host; sequential just like the reference) ---
    order = np.argsort(-e, kind="stable")
    remaining = np.ones(n, bool)
    cluster = np.zeros(n, np.int64)
    new_scores = []
    cid = 0
    for eix in order:
        s0 = int(src[eix]); d0 = int(dst[eix])
        if not remaining[s0] or not remaining[d0]:
            continue
        cluster[s0] = cid
        remaining[s0] = False
        if s0 != d0:
            cluster[d0] = cid
            remaining[d0] = False
        new_scores.append(float(e[eix]))
        cid += 1
    for node in np.nonzero(remaining)[0]:
        cluster[node] = cid
        cid += 1
    k = cid

    # Pooled-side padding restricted to the k real clusters (~N/2): cuts the
    # adj FLOPs / writeback ~4x vs pooling over the full node axis.
    k_pad = _round_up(max(k, TILE), TILE)

    cl_d = jnp.asarray(cluster, jnp.int32)
    # S[cid, node] and A[src, dst] as bf16 (0/1 exact, full-rate MXU inputs).
    s_mat = jnp.zeros((k_pad, n_pad), jnp.bfloat16).at[
        cl_d, jnp.arange(n, dtype=jnp.int32)].set(1.0)
    a_mat = jnp.zeros((n_pad, n_pad), jnp.bfloat16).at[src_d, dst_d].set(1.0)

    # new_x = scatter_add(x, cluster) * new_edge_score  ==  (S @ x) * score
    new_x_raw = matmul(s_mat, x_pad, jnp.float32)              # f32-exact (S is 0/1)
    score_col = jnp.ones((k_pad, 1), jnp.float32)
    if new_scores:
        score_col = score_col.at[:len(new_scores), 0].set(
            jnp.asarray(np.array(new_scores, np.float32)))
    new_x = (new_x_raw * score_col)[:k, :c]                    # device array

    # coalesce(cluster[edge_index]): nonzeros of S @ A @ S^T, computed as two
    # contraction-tiled passes (no full-resident S/A -> fits v7x 64 MiB VMEM),
    # returned to host sliced to [k,k] in bf16 (counts >=1 never round < 0.5).
    t_mat = matmul(s_mat, a_mat, jnp.bfloat16)                 # [k_pad, Np]
    adj = matmul_nt(t_mat, s_mat, jnp.bfloat16)                # [k_pad, k_pad]
    adj_np = np.asarray(jax.block_until_ready(adj[:k, :k].astype(jnp.float32)))
    rr, cc = np.nonzero(adj_np > 0.5)
    new_edge_index = np.stack([rr, cc]).astype(np.int64) if rr.size else \
        np.zeros((2, 0), np.int64)

    new_batch = np.zeros(k, np.int64)
    new_batch[cluster] = batch_np                              # scatter_(0, cluster, batch)

    return new_x, new_edge_index, None, new_batch


if __name__ == "__main__":
    N, C = 16, 32
    key = jax.random.PRNGKey(0)
    k_p, k_x = jax.random.split(key)

    # deterministic graph: bidirectional ring + a few chords (no self loops)
    src_l, dst_l = [], []
    for i in range(N):
        src_l += [i, (i + 1) % N]
        dst_l += [(i + 1) % N, i]
    for s, d in [(0, 8), (8, 0), (3, 11), (11, 3), (5, 13)]:
        src_l.append(s)
        dst_l.append(d)
    edge_index = np.stack([np.array(src_l, np.int64),
                           np.array(dst_l, np.int64)], axis=0)      # [2, 37]

    x = jax.random.normal(k_x, (N, C), dtype=jnp.float32)
    x_score = None                                                  # unused by forward
    edge_attr = None                                                # unused by forward
    batch = np.zeros(N, np.int64)

    params = init_edgepool_params(k_p, C)

    new_x, new_ei, new_ea, new_batch = edge_pooling_forward(
        params, x, x_score, edge_index, edge_attr, batch)

    new_x = jax.block_until_ready(new_x)
    k = int(new_batch.shape[0])
    assert new_x.shape == (k, C)
    assert (N + 1) // 2 <= k <= N
    assert new_ea is None
    assert new_ei.shape[0] == 2
    if new_ei.size:
        assert int(new_ei.max()) < k
    assert bool(jnp.all(jnp.isfinite(new_x)))
    print("KERNEL_OK")
</pallas_src>

<mosaic_0001>
module attributes {stable_mosaic.version = 11 : i64} {
  func.func @_edge_att_kernel(%arg0: i32, %arg1: memref<1x512xf32, #tpu.memory_space<vmem>>, %arg2: memref<256x1xf32, #tpu.memory_space<vmem>>, %arg3: memref<256x512xbf16, #tpu.memory_space<vmem>>, %arg4: memref<256x512xf32, #tpu.memory_space<vmem>>) attributes {dimension_semantics = [#tpu.dimension_semantics<parallel>], iteration_bounds = array<i64: 2>, scalar_prefetch = 0 : i64, scratch_operands = 0 : i64, tpu.core_type = #tpu.core_type<tc>, window_params = [{pipeline_mode = #tpu.pipeline_mode<synchronous>, transform_indices = @transform_0, window_bounds = array<i64: 1, 512>}, {transform_indices = @transform_1, window_bounds = array<i64: 256, 1>}, {transform_indices = @transform_2, window_bounds = array<i64: 256, 512>}, {transform_indices = @transform_3, window_bounds = array<i64: 256, 512>}]} {
    %c0 = arith.constant 0 : index
    %c0_0 = arith.constant 0 : index
    %0 = vector.load %arg2[%c0, %c0_0] : memref<256x1xf32, #tpu.memory_space<vmem>>, vector<256x1xf32>
    %c0_1 = arith.constant 0 : index
    %c0_2 = arith.constant 0 : index
    %1 = vector.load %arg1[%c0_1, %c0_2] : memref<1x512xf32, #tpu.memory_space<vmem>>, vector<1x512xf32>
    %2 = vector.broadcast %0 : vector<256x1xf32> to vector<256x512xf32>
    %3 = vector.broadcast %1 : vector<1x512xf32> to vector<256x512xf32>
    %4 = arith.addf %2, %3 : vector<256x512xf32>
    %c0_3 = arith.constant 0 : index
    %c0_4 = arith.constant 0 : index
    %5 = vector.load %arg3[%c0_3, %c0_4] : memref<256x512xbf16, #tpu.memory_space<vmem>>, vector<256x512xbf16>
    %cst = arith.constant 0.000000e+00 : bf16
    %6 = vector.broadcast %cst : bf16 to vector<256x512xbf16>
    %7 = arith.cmpf ogt, %5, %6 : vector<256x512xbf16>
    %cst_5 = arith.constant -1.000000e+30 : f32
    %8 = vector.broadcast %cst_5 : f32 to vector<256x512xf32>
    %9 = arith.select %7, %4, %8 : vector<256x512xi1>, vector<256x512xf32>
    %cst_6 = arith.constant dense<0xFF800000> : vector<256xf32>
    %10 = vector.multi_reduction <maximumf>, %9, %cst_6 [1] : vector<256x512xf32> to vector<256xf32>
    %11 = vector.shape_cast %10 : vector<256xf32> to vector<256x1xf32>
    %12 = vector.broadcast %11 : vector<256x1xf32> to vector<256x512xf32>
    %13 = arith.subf %9, %12 : vector<256x512xf32>
    %14 = math.exp %13 : vector<256x512xf32>
    %cst_7 = arith.constant 0.000000e+00 : f32
    %15 = vector.broadcast %cst_7 : f32 to vector<256x512xf32>
    %16 = arith.select %7, %14, %15 : vector<256x512xi1>, vector<256x512xf32>
    %cst_8 = arith.constant dense<0.000000e+00> : vector<256xf32>
    %17 = vector.multi_reduction <add>, %16, %cst_8 [1] : vector<256x512xf32> to vector<256xf32>
    %18 = vector.shape_cast %17 : vector<256xf32> to vector<256x1xf32>
    %cst_9 = arith.constant 9.99999968E-21 : f32
    %19 = vector.broadcast %cst_9 : f32 to vector<256x1xf32>
    %20 = arith.maximumf %18, %19 : vector<256x1xf32>
    %21 = vector.broadcast %20 : vector<256x1xf32> to vector<256x512xf32>
    %22 = arith.divf %16, %21 : vector<256x512xf32>
    %c0_10 = arith.constant 0 : index
    %c0_11 = arith.constant 0 : index
    %23 = vector.load %arg4[%c0_10, %c0_11] : memref<256x512xf32, #tpu.memory_space<vmem>>, vector<256x512xf32>
    tpu.vector_store %arg4[%c0_10, %c0_11], %22 {strides = array<i32>} : memref<256x512xf32, #tpu.memory_space<vmem>>, vector<256x512xf32>,
    return
  }
  func.func @transform_0(%arg0: i32) -> (i32, i32) {
    %c0_i32 = arith.constant 0 : i32
    %c0_i32_0 = arith.constant 0 : i32
    %c0_i32_1 = arith.constant 0 : i32
    return %c0_i32, %c0_i32_0 : i32, i32
  }
  func.func @transform_1(%arg0: i32) -> (i32, i32) {
    %c0_i32 = arith.constant 0 : i32
    %c0_i32_0 = arith.constant 0 : i32
    return %arg0, %c0_i32 : i32, i32
  }
  func.func @transform_2(%arg0: i32) -> (i32, i32) {
    %c0_i32 = arith.constant 0 : i32
    %c0_i32_0 = arith.constant 0 : i32
    return %arg0, %c0_i32 : i32, i32
  }
  func.func @transform_3(%arg0: i32) -> (i32, i32) {
    %c0_i32 = arith.constant 0 : i32
    %c0_i32_0 = arith.constant 0 : i32
    return %arg0, %c0_i32 : i32, i32
  }
}

</mosaic_0001>

<bundles_post_ra>
// kernel: tpu_custom_call.1
= control target key start
LH: loop header
LB: loop body
LE: loop exit
PB: predicated region body
PF: predicated region fallthrough
CT: control target
= control target key end

     0   :  { %8 = vsyncpa [#allocation3], 0  ;;  %s6920_s0 = inlined_call_operand.vmem [shape: f32[1,512], index: 0, kind: input, shape index: {}]   ;;  %s6921_s1 = inlined_call_operand.vmem [shape: f32[512,1], index: 1, kind: input, shape index: {}]   ;;  %s6922_s2 = inlined_call_operand.hbm [shape: bf16[512,512], index: 2, kind: input, shape index: {}]   ;;  %s6923_s3 = inlined_call_operand.hbm [shape: f32[512,512], index: 3, kind: output, shape index: {}]  }
   0x1   :  { %10 = vsyncpa [#allocation3 + $0x1], 0 }
   0x2   :  { %11 = vsyncpa [#allocation4], 0 }
   0x3   :  { %13 = vsyncpa [#allocation4 + $0x1], 0  ;;  %s3183_s12 = smov 0   ;;  %s3185_s13 = smov 0  }
   0x4   :  { %s3187_s14 = smov 0   ;;  %s3189_s15 = smov 0  }
   0x5 LB: > { %s3204_s16 = sadd.s32 4294967295, %s3156_s15   ;;  %s2664_s17 = sadd.s32 4294967294, %s3156_s15   ;;  %s3156_s15 = sphi %s3189_s15, %s8450_s15   ;;  %s3152_s14 = sphi %s3187_s14, %s8449_s14   ;;  %s3148_s13 = sphi %s3185_s13, %s8448_s13   ;;  %s3144_s12 = sphi %s3183_s12, %s8447_s12  }
   0x6   : > { %s3208_s18 = sadd.s32 1, %s3156_s15   ;;  %s73_s19 = sadd.s32 1, %s3152_s14 }
   0x7   : > { %s70_s20 = ssub.s32 %s3156_s15, %s3208_s18  ;;  %p80_p0 = scmp.ne.s32.totalorder %s3152_s14, %s3148_s13 }
   0x8   : > { %p71_p1 = scmp.eq.s32.totalorder %s70_s20, 0  ;;  %p81_p2 = scmp.eq.s32.totalorder %s3156_s15, 0 }
   0x9   : > { %p86_p3 = scmp.ne.s32.totalorder %s3148_s13, %s3144_s12  ;;  %p87_p4 = scmp.eq.s32.totalorder %s3204_s16, 0 }
   0xa   : > { %s3220_s21 = scalar_select %p71_p1, %s3152_s14, %s73_s19  }
   0xb   : > { %p3222_p5 = por %p81_p2, %p80_p0  ;;  %p3226_p6 = por %p87_p4, %p86_p3 }
   0xc   : > { %p110_p7 = scmp.eq.s32.totalorder %s3204_s16, 1  ;;  %p116_p8 = scmp.eq.s32.totalorder %s2664_s17, 1 }
   0xd   : > { %p2698_p10 = scmp.lt.s32.totalorder %s3156_s15, 2  ;;  %s148_s26 = sand.u32 1, %s3152_s14  }
   0xe   : > { %p3233_p11 = por %p110_p7, %p80_p0  ;;  %p3237_p12 = por %p116_p8, %p86_p3 }
   0xf   : > { %s2683_s27 = sshll.u32 %s3156_s15, 9  ;;  %s2667_s28 = sshll.u32 %s148_s26, 9 }
  0x10   : > { %s158_s4 = scalar_lea.hbm %s6922_s2, %s2683_s27  ;;  %s152_s6 = scalar_lea.vmem [#allocation2], %s2667_s28 }
  0x11   : > { %s159_s5 = sshll.u32 %s158_s4, 4  ;;  %s161_s7 = sshll.u32 %s152_s6, 4  ;;  %s160_s5 = int_to_ptr.hbm [resolvable:$true] %s159_s5  ;;  %s162_s7 = int_to_ptr.vmem [resolvable:$true] %s161_s7 }
  0x12   : > { %p3248_p13 = pnand %p2698_p10, %p3222_p5  ;;  %p2671_p0 = scmp.ge.s32.totalorder %s3156_s15, 1 }
  0x13   : > { %p169_p1 = scmp.lt.s32.totalorder %s3156_s15, 3  ;;  %s149_s9 = scalar_lea.sflag [#allocation3], %s148_s26 }
  0x14   : > { %s3060_s10 = sshra.s32 %s160_s5, 4  ;;  %p3064_p3 = pneg %p3248_p13  ;;  %s3061_s10 = int_to_ptr.hbm [resolvable:$true] %s3060_s10 }
  0x15   : > { %s3062_s11 = scalar_lea.hbm %s3061_s10, 512  ;;  %s3067_s20 = scalar_lea.hbm %s6922_s2, 1024 }
  0x16   : > { %p3063_p2 = scmp.ne.s32.totalorder %s3061_s10, %s3062_s11  ;;  %p3068_p5 = scmp.lt.s32.totalorder %s3061_s10, %s6922_s2 }
  0x17   : > { %p3069_p8 = scmp.lt.s32.totalorder %s3067_s20, %s3062_s11 }
  0x18   : > { %p3065_p4 = pnand %p3064_p3, %p3063_p2 }
  0x19   : > { %p3070_p10 = por %p3069_p8, %p3068_p5 }
  0x1a   : > { %p3066_p7 = pneg %p3065_p4 }
  0x1c   : > { %p3071_p9 = pnand %p3070_p10, %p3066_p7 }
  0x1e   : > { %3074 = shalt.err (!%p3071_p9)
}
  0x1f   : > { %s3158_s26 = smov 256   ;;  %s3159_s28 = smov 16  }
  0x20   : > { %2693 = dma.hbm_to_vmem [thread:$0]  (!%p3248_p13), %s160_s5, 8192, %s162_s7, %s149_s9, %s3158_s26, %s3158_s26, %s3159_s28  }
  0x21   : > { %p170_p2 = pnand %p2671_p0, %p169_p1 }
  0x23   : > { %173 = sbr.rel (%p170_p2) target bundleno = 701 (0x2bd), region = 32 }
  0x28   : > { %s3269_s29 = sand.u32 1, %s3148_s13  }
  0x29   : > { %s2672_s30 = sshll.u32 %s3269_s29, 9  ;;  %s176_s4 = scalar_lea.sflag [#allocation3], %s3269_s29 }
  0x2a   : > { %s3273_s6 = scalar_lea.vmem [#allocation2], %s2672_s30 }
  0x2b   : > { %3135 = dma.done.wait (%p3226_p6), %s176_s4, 8192  }
  0x2c   : > { %3137 = vsyncadd (%p3226_p6), %s176_s4, 4294959104  ;;  %s2674_s5 = sshll.u32 %s3204_s16, 5  ;;  %v3160_v0 = vmov 0   ;;  %v248_v33 = vld [vmem:[%s6920_s0] sm:$0xf]  ;;  %v555_v36 = vld [vmem:[%s3273_s6 + $0x48] sm:$0xff] }
  0x2d   : > { %2739 = vset.pattern.permute.xlu2 %v3160_v0  ;;  %2738 = vset.pattern.permute.xlu1 %v3160_v0  ;;  %p209_p9 = scmp.lt.s32.totalorder %s2674_s5, 63  ;;  %v554_v35 = vld [vmem:[%s3273_s6 + $0x40] sm:$0xff]  ;;  %v556_v37 = vld [vmem:[%s3273_s6 + $0x50] sm:$0xff]  ;;  %v3325_v38 = vperm.slane %v248_v33, 0  ;;  %v3327_v39 = vperm.slane %v248_v33, 1  ;;  %v557_v41 = vld [vmem:[%s3273_s6 + $0x58] sm:$0xff]  ;;  %v628_v44 = vunpack.c.l.bf16 %v555_v36  ;;  %v629_v49 = vunpack.c.h.bf16 %v555_v36 }
  0x2e   : > { %2737 = vset.pattern.permute.xlu0 %v3160_v0  ;;  %v626_v40 = vunpack.c.l.bf16 %v554_v35  ;;  %v562_v42 = vld [vmem:[%s3273_s6 + $0x80] sm:$0xff]  ;;  %v627_v43 = vunpack.c.h.bf16 %v554_v35  ;;  %v630_v45 = vunpack.c.l.bf16 %v556_v37  ;;  %v631_v46 = vunpack.c.h.bf16 %v556_v37  ;;  %v563_v52 = vld [vmem:[%s3273_s6 + $0x88] sm:$0xff]  ;;  %s2673_s17 = sshll.u32 %s3269_s29, 10  ;;  %s2685_s20 = sshll.u32 %s3204_s16, 10 }
  0x2f   : > { %s8452_s5 = smov (!%p209_p9, %s2674_s5), 63  ;;  %v3331_v47 = vperm.slane %v248_v33, 2  ;;  %v3333_v48 = vperm.slane %v248_v33, 3  ;;  %v632_v50 = vunpack.c.l.bf16 %v557_v41  ;;  %v633_v51 = vunpack.c.h.bf16 %v557_v41  ;;  %s6166_s19 = scalar_lea.vmem [#allocation5], %s2673_s17 }
  0x30   : > { %s2675_s7 = sshll.u32 %s8452_s5, 3  ;;  %v642_v53 = vunpack.c.l.bf16 %v562_v42  ;;  %vm3340_vm0 = vcmp.gt.f32.partialorder %v626_v40, 0.0  ;;  %v7368_v56 = vmov 0  ;;  %v643_v57 = vunpack.c.h.bf16 %v562_v42  ;;  %v3449_v42 = vld [vmem:[%s3273_s6 + $0x10] sm:$0xff]  ;;  %s2575_s27 = scalar_lea.hbm %s6923_s3, %s2685_s20 }
  0x31   : > { %s3283_s10 = scalar_lea.vmem %s6921_s1, %s2675_s7  ;;  %v7369_v56 = vsel %vm3340_vm0, 4294967295, %v7368_v56  ;;  %vm3344_vm1 = vcmp.gt.f32.partialorder %v627_v43, 0.0  ;;  %v7371_v59 = vmov 0  ;;  %vm3348_vm2 = vcmp.gt.f32.partialorder %v628_v44, 0.0  ;;  %s2576_s26 = sshll.u32 %s6166_s19, 4  ;;  %s2577_s26 = int_to_ptr.vmem [resolvable:$true] %s2576_s26 }
  0x32   : > { %v220_v1 = vld [vmem:[%s3283_s10 + $0x20] sm:$0xff]  ;;  %v218_v2 = vld [vmem:[%s3283_s10 + $0x10] sm:$0xff]  ;;  %v221_v4 = vld [vmem:[%s3283_s10 + $0x28] sm:$0xff]  ;;  %7370 = vst [vmem:[#allocation8_spill] sm:$0xff] %v7369_v56  ;;  %v7372_v59 = vsel %vm3344_vm1, 4294967295, %v7371_v59  ;;  %v7374_v60 = vmov 0 }
  0x33   : > { %v216_v3 = vld [vmem:[%s3283_s10] sm:$0xff]  ;;  %271 = vperm.xlu2 %2739, %v220_v1   ;;  %261 = vperm.xlu1 %2738, %v218_v2   ;;  %v219_v5 = vld [vmem:[%s3283_s10 + $0x18] sm:$0xff]  ;;  %v217_v6 = vld [vmem:[%s3283_s10 + $0x8] sm:$0xff]  ;;  %7373 = vst [vmem:[#allocation9_spill] sm:$0xff] %v7372_v59  ;;  %v7375_v60 = vsel %vm3348_vm2, 4294967295, %v7374_v60  ;;  %vm3352_vm3 = vcmp.gt.f32.partialorder %v630_v45, 0.0  ;;  %v644_v2 = vunpack.c.l.bf16 %v563_v52 }
  0x34   : > { %251 = vperm.xlu0 %2737, %v216_v3   ;;  %v224_v7 = vld [vmem:[%s3283_s10 + $0x40] sm:$0xff]  ;;  %v223_v8 = vld [vmem:[%s3283_s10 + $0x38] sm:$0xff]  ;;  %v222_v9 = vld [vmem:[%s3283_s10 + $0x30] sm:$0xff]  ;;  %7376 = vst [vmem:[#allocation10_spill] sm:$0xff] %v7375_v60  ;;  %v7377_v61 = vmov 0  ;;  %vm3356_vm4 = vcmp.gt.f32.partialorder %v631_v46, 0.0  ;;  %v645_v3 = vunpack.c.h.bf16 %v563_v52 }
  0x35   : > { %v227_v10 = vld [vmem:[%s3283_s10 + $0x58] sm:$0xff]  ;;  %v226_v11 = vld [vmem:[%s3283_s10 + $0x50] sm:$0xff]  ;;  %v225_v12 = vld [vmem:[%s3283_s10 + $0x48] sm:$0xff]  ;;  %v7378_v61 = vsel %vm3352_vm3, 4294967295, %v7377_v61  ;;  %v7380_v62 = vmov 0  ;;  %vm3367_vm5 = vcmp.gt.f32.partialorder %v629_v49, 0.0 }
  0x36   : > { %v230_v13 = vld [vmem:[%s3283_s10 + $0x70] sm:$0xff]  ;;  %v229_v14 = vld [vmem:[%s3283_s10 + $0x68] sm:$0xff]  ;;  %v228_v15 = vld [vmem:[%s3283_s10 + $0x60] sm:$0xff]  ;;  %7379 = vst [vmem:[#allocation11_spill] sm:$0xff] %v7378_v61  ;;  %v7381_v62 = vsel %vm3356_vm4, 4294967295, %v7380_v62  ;;  %vm3371_vm6 = vcmp.gt.f32.partialorder %v632_v50, 0.0 }
  0x37   : > { %v233_v16 = vld [vmem:[%s3283_s10 + $0x88] sm:$0xff]  ;;  %v232_v17 = vld [vmem:[%s3283_s10 + $0x80] sm:$0xff]  ;;  %v231_v18 = vld [vmem:[%s3283_s10 + $0x78] sm:$0xff]  ;;  %7382 = vst [vmem:[#allocation12_spill] sm:$0xff] %v7381_v62  ;;  %vm3375_vm7 = vcmp.gt.f32.partialorder %v633_v51, 0.0  ;;  %vm3379_vm8 = vcmp.gt.f32.partialorder %v642_v53, 0.0 }
  0x38   : > { %v236_v19 = vld [vmem:[%s3283_s10 + $0xa0] sm:$0xff]  ;;  %v235_v20 = vld [vmem:[%s3283_s10 + $0x98] sm:$0xff]  ;;  %v234_v21 = vld [vmem:[%s3283_s10 + $0x90] sm:$0xff]  ;;  %vm3396_vm9 = vcmp.gt.f32.partialorder %v643_v57, 0.0  ;;  %vm3414_vm10 = vcmp.gt.f32.partialorder %v644_v2, 0.0  ;;  %vm3418_vm11 = vcmp.gt.f32.partialorder %v645_v3, 0.0  ;;  %v614_v3 = vunpack.c.l.bf16 %v3449_v42 }
  0x39   : > { %v239_v22 = vld [vmem:[%s3283_s10 + $0xb8] sm:$0xff]  ;;  %v238_v23 = vld [vmem:[%s3283_s10 + $0xb0] sm:$0xff]  ;;  %v237_v24 = vld [vmem:[%s3283_s10 + $0xa8] sm:$0xff]  ;;  %v7409_v41 = vmov 0  ;;  %v7413_v50 = vmov 0  ;;  %v7416_v51 = vmov 0 }
  0x3a   : > { %v242_v25 = vld [vmem:[%s3283_s10 + $0xd0] sm:$0xff]  ;;  %v241_v26 = vld [vmem:[%s3283_s10 + $0xc8] sm:$0xff]  ;;  %v240_v27 = vld [vmem:[%s3283_s10 + $0xc0] sm:$0xff]  ;;  %v7456_v62 = vmov 0  ;;  %v7463_v60 = vmov 0  ;;  %s2578_s28 = sshll.u32 %s2575_s27, 4  ;;  %s2579_s28 = int_to_ptr.hbm [resolvable:$true] %s2578_s28 }
  0x3b   : > { %276 = vperm.xlu2 %2739, %v221_v4   ;;  %266 = vperm.xlu1 %2738, %v219_v5   ;;  %v245_v28 = vld [vmem:[%s3283_s10 + $0xe8] sm:$0xff]  ;;  %v244_v29 = vld [vmem:[%s3283_s10 + $0xe0] sm:$0xff]  ;;  %v243_v30 = vld [vmem:[%s3283_s10 + $0xd8] sm:$0xff]  ;;  %s2563_s30 = scalar_lea.sflag [#allocation4], %s3269_s29  ;;  %s3104_s4 = sshra.s32 %s2579_s28, 4  ;;  %s3105_s4 = int_to_ptr.hbm [resolvable:$true] %s3104_s4 }
  0x3c   : > { %256 = vperm.xlu0 %2737, %v217_v6   ;;  %v247_v31 = vld [vmem:[%s3283_s10 + $0xf8] sm:$0xff]  ;;  %v246_v32 = vld [vmem:[%s3283_s10 + $0xf0] sm:$0xff]  ;;  %v550_v1 = vld [vmem:[%s3273_s6 + $0x20] sm:$0xff]  ;;  %v7383_v6 = vmov 0  ;;  %s3110_s8 = scalar_lea.hbm %s6923_s3, 2048  ;;  %p3111_p1 = scmp.lt.s32.totalorder %s3105_s4, %s6923_s3 }
  0x3d   : > { %v3364_v4 = vld [vmem:[%s3273_s6 + $0x28] sm:$0xff]  ;;  %v546_v5 = vld [vmem:[%s3273_s6] sm:$0xff]  ;;  %v7384_v6 = vsel %vm3367_vm5, 4294967295, %v7383_v6 }
  0x3e   : > { %7385 = vst [vmem:[#allocation13_spill] sm:$0xff] %v7384_v6  ;;  %v3484_v2 = vld [vmem:[%s3273_s6 + $0x60] sm:$0xff] }
  0x3f   : > { %v3614_v6 = vld [vmem:[%s3273_s6 + $0xa0] sm:$0xff] }
  0x43   : > { %291 = vperm.xlu2 %2739, %v224_v7   ;;  %286 = vperm.xlu1 %2738, %v223_v8   ;;  %v7386_v7 = vmov 0  ;;  %v7389_v8 = vmov 0 }
  0x44   : > { %281 = vperm.xlu0 %2737, %v222_v9   ;;  %v7387_v7 = vsel %vm3371_vm6, 4294967295, %v7386_v7  ;;  %v7390_v8 = vsel %vm3375_vm7, 4294967295, %v7389_v8  ;;  %v7392_v9 = vmov 0 }
  0x45   : > { %7388 = vst [vmem:[#allocation14_spill] sm:$0xff] %v7387_v7  ;;  %v7393_v9 = vsel %vm3379_vm8, 4294967295, %v7392_v9  ;;  %v7447_v7 = vmov 0 }
  0x46   : > { %7391 = vst [vmem:[#allocation15_spill] sm:$0xff] %v7390_v8 }
  0x47   : > { %7394 = vst [vmem:[#allocation16_spill] sm:$0xff] %v7393_v9 }
  0x4b   : > { %306 = vperm.xlu2 %2739, %v227_v10   ;;  %301 = vperm.xlu1 %2738, %v226_v11   ;;  %v3386_v11 = vld [vmem:[%s3273_s6 + $0x8] sm:$0xff] }
  0x4c   : > { %296 = vperm.xlu0 %2737, %v225_v12  }
  0x53   : > { %321 = vperm.xlu2 %2739, %v230_v13   ;;  %316 = vperm.xlu1 %2738, %v229_v14   ;;  %v7397_v14 = vmov 0 }
  0x54   : > { %311 = vperm.xlu0 %2737, %v228_v15   ;;  %v7398_v14 = vsel %vm3396_vm9, 4294967295, %v7397_v14 }
  0x55   : > { %7399 = vst [vmem:[#allocation19_spill] sm:$0xff] %v7398_v14 }
  0x5b   : > { %336 = vperm.xlu2 %2739, %v233_v16   ;;  %331 = vperm.xlu1 %2738, %v232_v17   ;;  %v618_v16 = vunpack.c.l.bf16 %v550_v1 }
  0x5c   : > { %326 = vperm.xlu0 %2737, %v231_v18  }
  0x5d   : > { %vm3444_vm12 = vcmp.gt.f32.partialorder %v618_v16, 0.0  ;;  %v7425_v16 = vmov 0 }
  0x5e   : > { %v7410_v41 = vsel %vm3444_vm12, 4294967295, %v7409_v41 }
  0x5f   : > { %7411 = vst [vmem:[#allocation25_spill] sm:$0xff] %v7410_v41  ;;  %v7532_v41 = vunpack.c.h.bf16 %v3614_v6 }
  0x63   : > { %351 = vperm.xlu2 %2739, %v236_v19   ;;  %346 = vperm.xlu1 %2738, %v235_v20   ;;  %v3410_v19 = vld [vmem:[%s3273_s6 + $0xb0] sm:$0xff]  ;;  %v619_v20 = vunpack.c.h.bf16 %v550_v1 }
  0x64   : > { %341 = vperm.xlu0 %2737, %v234_v21   ;;  %v620_v21 = vunpack.c.l.bf16 %v3364_v4  ;;  %v654_v37 = vunpack.c.l.bf16 %v3410_v19  ;;  %v655_v43 = vunpack.c.h.bf16 %v3410_v19  ;;  %v3508_v19 = vld [vmem:[%s3273_s6 + $0x70] sm:$0xff] }
  0x65   : > { %vm3460_vm13 = vcmp.gt.f32.partialorder %v619_v20, 0.0  ;;  %v3511_v20 = vld [vmem:[%s3273_s6 + $0x78] sm:$0xff] }
  0x66   : > { %v7414_v50 = vsel %vm3460_vm13, 4294967295, %v7413_v50 }
  0x67   : > { %7415 = vst [vmem:[#allocation27_spill] sm:$0xff] %v7414_v50 }
  0x6b   : > { %366 = vperm.xlu2 %2739, %v239_v22   ;;  %361 = vperm.xlu1 %2738, %v238_v23   ;;  %v621_v22 = vunpack.c.h.bf16 %v3364_v4  ;;  %v610_v23 = vunpack.c.l.bf16 %v546_v5  ;;  %v615_v4 = vunpack.c.h.bf16 %v3449_v42 }
  0x6c   : > { %356 = vperm.xlu0 %2737, %v237_v24   ;;  %v7402_v24 = vmov 0 }
  0x6d   : > { %v7403_v24 = vsel %vm3414_vm10, 4294967295, %v7402_v24  ;;  %vm3464_vm14 = vcmp.gt.f32.partialorder %v610_v23, 0.0 }
  0x6e   : > { %7404 = vst [vmem:[#allocation22_spill] sm:$0xff] %v7403_v24  ;;  %v7417_v51 = vsel %vm3464_vm14, 4294967295, %v7416_v51 }
  0x6f   : > { %7418 = vst [vmem:[#allocation28_spill] sm:$0xff] %v7417_v51 }
  0x73   : > { %381 = vperm.xlu2 %2739, %v242_v25   ;;  %376 = vperm.xlu1 %2738, %v241_v26   ;;  %v7405_v25 = vmov 0  ;;  %v3423_v26 = vld [vmem:[%s3273_s6 + $0xb8] sm:$0xff] }
  0x74   : > { %371 = vperm.xlu0 %2737, %v240_v27   ;;  %v7406_v25 = vsel %vm3418_vm11, 4294967295, %v7405_v25  ;;  %v611_v27 = vunpack.c.h.bf16 %v546_v5  ;;  %v656_v44 = vunpack.c.l.bf16 %v3423_v26 }
  0x75   : > { %7407 = vst [vmem:[#allocation23_spill] sm:$0xff] %v7406_v25 }
  0x76   : > { %vm3470_vm15 = vcmp.gt.f32.partialorder %v611_v27, 0.0 }
  0x7b   : > { %396 = vperm.xlu2 %2739, %v245_v28   ;;  %391 = vperm.xlu1 %2738, %v244_v29   ;;  %v612_v28 = vunpack.c.l.bf16 %v3386_v11  ;;  %v613_v29 = vunpack.c.h.bf16 %v3386_v11  ;;  %v3500_v11 = vld [vmem:[%s3273_s6 + $0x68] sm:$0xff] }
  0x7c   : > { %386 = vperm.xlu0 %2737, %v243_v30   ;;  %v3428_v30 = vld [vmem:[%s3273_s6 + $0x30] sm:$0xff] }
  0x7d   : > { %v622_v52 = vunpack.c.l.bf16 %v3428_v30 }
  0x83   : > { %406 = vperm.xlu1 %2738, %v247_v31  }
  0x84   : > { %401 = vperm.xlu0 %2737, %v246_v32   ;;  %v3433_v32 = vld [vmem:[%s3273_s6 + $0x38] sm:$0xff] }
  0x85   : > { %v624_v57 = vunpack.c.l.bf16 %v3433_v32 }
  0x8d   : > { %v3320_v34 = vpop.permute.xlu2 %271 }
  0x8e   : > { %v434_v54 = vadd.f32 %v3325_v38, %v3320_v34  ;;  %v435_v55 = vadd.f32 %v3327_v39, %v3320_v34  ;;  %v436_v10 = vadd.f32 %v3331_v47, %v3320_v34  ;;  %v437_v33 = vadd.f32 %v3333_v48, %v3320_v34 }
  0x90   : > { %v3390_v12 = vsel %vm3340_vm0, %v434_v54, -1e+30  ;;  %v3394_v13 = vsel %vm3344_vm1, %v435_v55, -1e+30  ;;  %v3439_v35 = vsel %vm3348_vm2, %v436_v10, -1e+30  ;;  %v623_v55 = vunpack.c.h.bf16 %v3428_v30 }
  0x91   : > { %7395 = vst [vmem:[#allocation17_spill] sm:$0xff] %v3390_v12  ;;  %v1014_v31 = vmax.f32 %v3390_v12, %v3394_v13  ;;  %v7419_v54 = vmov 0  ;;  %v3494_v5 = vsel %vm3367_vm5, %v437_v33, -1e+30  ;;  %vm3572_vm5 = vcmp.gt.f32.partialorder %v656_v44, 0.0 }
  0x92   : > { %7396 = vst [vmem:[#allocation18_spill] sm:$0xff] %v3394_v13  ;;  %v7420_v54 = vsel %vm3470_vm15, 4294967295, %v7419_v54  ;;  %vm3577_vm2 = vcmp.gt.f32.partialorder %v622_v52, 0.0  ;;  %vm3581_vm1 = vcmp.gt.f32.partialorder %v623_v55, 0.0  ;;  %v7453_v55 = vmov 0 }
  0x93   : > { %7408 = vst [vmem:[#allocation24_spill] sm:$0xff] %v3439_v35  ;;  %v3481_v1 = vmax.f32 %v1014_v31, %v3439_v35  ;;  %v7448_v7 = vsel %vm3577_vm2, 4294967295, %v7447_v7  ;;  %vm3605_vm0 = vcmp.gt.f32.partialorder %v624_v57, 0.0  ;;  %v7477_v35 = vmov 0 }
  0x94   : > { %7421 = vst [vmem:[#allocation29_spill] sm:$0xff] %v7420_v54  ;;  %v7490_v13 = vmov 0  ;;  %v7494_v12 = vmov 0 }
  0x95   : > { %v277_v58 = vpop.permute.xlu2 %276  ;;  %7449 = vst [vmem:[#allocation41_spill] sm:$0xff] %v7448_v7 }
  0x96   : > { %v438_v63 = vadd.f32 %v3325_v38, %v277_v58  ;;  %v439_v0 = vadd.f32 %v3327_v39, %v277_v58  ;;  %v440_v15 = vadd.f32 %v3331_v47, %v277_v58  ;;  %v441_v53 = vadd.f32 %v3333_v48, %v277_v58 }
  0x97   : > { %v7422_v58 = vmov 0 }
  0x98   : > { %v3403_v17 = vsel %vm3352_vm3, %v438_v63, -1e+30  ;;  %v3407_v18 = vsel %vm3356_vm4, %v439_v0, -1e+30  ;;  %v3453_v34 = vsel %vm3371_vm6, %v440_v15, -1e+30 }
  0x99   : > { %7400 = vst [vmem:[#allocation20_spill] sm:$0xff] %v3403_v17  ;;  %v1019_v36 = vmax.f32 %v3403_v17, %v3407_v18  ;;  %v3478_v0 = vld [vmem:[%s3273_s6 + $0x18] sm:$0xff]  ;;  %vm3486_vm6 = vcmp.gt.f32.partialorder %v620_v21, 0.0  ;;  %vm3503_vm4 = vcmp.gt.f32.partialorder %v612_v28, 0.0  ;;  %vm3522_vm3 = vcmp.gt.f32.partialorder %v621_v22, 0.0 }
  0x9a   : > { %7401 = vst [vmem:[#allocation21_spill] sm:$0xff] %v3407_v18  ;;  %v7423_v58 = vsel %vm3486_vm6, 4294967295, %v7422_v58  ;;  %v7426_v16 = vsel %vm3503_vm4, 4294967295, %v7425_v16  ;;  %v7430_v28 = vmov 0  ;;  %v616_v30 = vunpack.c.l.bf16 %v3478_v0  ;;  %v3546_v63 = vld [vmem:[%s3273_s6 + $0x98] sm:$0xff] }
  0x9b   : > { %7412 = vst [vmem:[#allocation26_spill] sm:$0xff] %v3453_v34  ;;  %v3497_v10 = vmax.f32 %v1019_v36, %v3453_v34  ;;  %v7431_v28 = vsel %vm3522_vm3, 4294967295, %v7430_v28  ;;  %v617_v31 = vunpack.c.h.bf16 %v3478_v0  ;;  %v3530_v33 = vsel %vm3375_vm7, %v441_v53, -1e+30  ;;  %v3543_v0 = vld [vmem:[%s3273_s6 + $0x90] sm:$0xff] }
  0x9c   : > { %7424 = vst [vmem:[#allocation30_spill] sm:$0xff] %v7423_v58  ;;  %v7436_v53 = vmov 0  ;;  %vm3552_vm7 = vcmp.gt.f32.partialorder %v655_v43, 0.0  ;;  %v638_v22 = vunpack.c.l.bf16 %v3508_v19  ;;  %v7476_v17 = vunpack.c.l.bf16 %v3484_v2 }
  0x9d   : > { %v292_v40 = vpop.permute.xlu2 %291  ;;  %7427 = vst [vmem:[#allocation31_spill] sm:$0xff] %v7426_v16  ;;  %v7520_v7 = vunpack.c.l.bf16 %v3543_v0  ;;  %v7529_v58 = vmov 0 }
  0x9e   : > { %v450_v46 = vadd.f32 %v3325_v38, %v292_v40  ;;  %v451_v49 = vadd.f32 %v3327_v39, %v292_v40  ;;  %v452_v15 = vadd.f32 %v3331_v47, %v292_v40  ;;  %v453_v21 = vadd.f32 %v3333_v48, %v292_v40  ;;  %7432 = vst [vmem:[#allocation34_spill] sm:$0xff] %v7431_v28 }
  0x9f   : > { %v7433_v40 = vmov 0  ;;  %v7521_v28 = vmov 0 }
  0xa0   : > { %v3516_v23 = vsel %vm3379_vm8, %v450_v46, -1e+30  ;;  %v3520_v27 = vsel %vm3396_vm9, %v451_v49, -1e+30  ;;  %vm3533_vm8 = vcmp.gt.f32.partialorder %v613_v29, 0.0  ;;  %vm3548_vm9 = vcmp.gt.f32.partialorder %v654_v37, 0.0 }
  0xa1   : > { %7428 = vst [vmem:[#allocation32_spill] sm:$0xff] %v3516_v23  ;;  %v7434_v40 = vsel %vm3533_vm8, 4294967295, %v7433_v40  ;;  %v7437_v53 = vsel %vm3548_vm9, 4294967295, %v7436_v53  ;;  %v7439_v29 = vmov 0  ;;  %v1034_v49 = vmax.f32 %v3516_v23, %v3520_v27 }
  0xa2   : > { %7429 = vst [vmem:[#allocation33_spill] sm:$0xff] %v3520_v27  ;;  %v7440_v29 = vsel %vm3552_vm7, 4294967295, %v7439_v29  ;;  %v3566_v43 = vsel %vm3414_vm10, %v452_v15, -1e+30  ;;  %v3570_v9 = vsel %vm3418_vm11, %v453_v21, -1e+30 }
  0xa3   : > { %7435 = vst [vmem:[#allocation35_spill] sm:$0xff] %v7434_v40  ;;  %v7444_v46 = vmov 0  ;;  %v7450_v37 = vmov 0  ;;  %vm3592_vm11 = vcmp.gt.f32.partialorder %v614_v3, 0.0  ;;  %vm3596_vm10 = vcmp.gt.f32.partialorder %v615_v4, 0.0 }
  0xa4   : > { %7438 = vst [vmem:[#allocation36_spill] sm:$0xff] %v7437_v53  ;;  %v7445_v46 = vsel %vm3572_vm5, 4294967295, %v7444_v46  ;;  %v7451_v37 = vsel %vm3581_vm1, 4294967295, %v7450_v37  ;;  %v7454_v55 = vsel %vm3592_vm11, 4294967295, %v7453_v55  ;;  %v7457_v62 = vsel %vm3596_vm10, 4294967295, %v7456_v62 }
  0xa5   : > { %7441 = vst [vmem:[#allocation37_spill] sm:$0xff] %v7440_v29  ;;  %v307_v36 = vpop.permute.xlu2 %306  ;;  %v262_v45 = vpop.permute.xlu1 %261  ;;  %v7459_v15 = vmov 0  ;;  %v3610_v61 = vmax.f32 %v1034_v49, %v3566_v43  ;;  %v7462_v4 = vunpack.c.h.bf16 %v3423_v26  ;;  %v7466_v3 = vmov 0  ;;  %v3637_v26 = vld [vmem:[%s3273_s6 + $0xa8] sm:$0xff] }
  0xa6   : > { %7442 = vst [vmem:[#allocation38_spill] sm:$0xff] %v3566_v43  ;;  %v426_v42 = vadd.f32 %v3325_v38, %v262_v45  ;;  %v252_v8 = vpop.permute.xlu0 %251  ;;  %v427_v14 = vadd.f32 %v3327_v39, %v262_v45  ;;  %v428_v25 = vadd.f32 %v3331_v47, %v262_v45  ;;  %v7460_v15 = vsel %vm3605_vm0, 4294967295, %v7459_v15 }
  0xa7   : > { %7443 = vst [vmem:[#allocation39_spill] sm:$0xff] %v3570_v9  ;;  %v418_v52 = vadd.f32 %v3325_v38, %v252_v8  ;;  %v419_v24 = vadd.f32 %v3327_v39, %v252_v8  ;;  %v420_v21 = vadd.f32 %v3331_v47, %v252_v8  ;;  %vm3618_vm10 = vcmp.gt.f32.partialorder %v7462_v4, 0.0 }
  0xa8   : > { %7446 = vst [vmem:[#allocation40_spill] sm:$0xff] %v7445_v46  ;;  %v3603_v44 = vsel %vm3444_vm12, %v426_v42, -1e+30  ;;  %v7464_v60 = vsel %vm3618_vm10, 4294967295, %v7463_v60  ;;  %v462_v42 = vadd.f32 %v3325_v38, %v307_v36  ;;  %v429_v57 = vadd.f32 %v3333_v48, %v262_v45 }
  0xa9   : > { %7452 = vst [vmem:[#allocation42_spill] sm:$0xff] %v7451_v37  ;;  %v3626_v59 = vsel %vm3460_vm13, %v427_v14, -1e+30  ;;  %v3630_v49 = vsel %vm3464_vm14, %v418_v52, -1e+30  ;;  %vm3632_vm12 = vcmp.gt.f32.partialorder %v616_v30, 0.0  ;;  %v463_v4 = vadd.f32 %v3327_v39, %v307_v36 }
  0xaa   : > { %7455 = vst [vmem:[#allocation43_spill] sm:$0xff] %v7454_v55  ;;  %v7467_v3 = vsel %vm3632_vm12, 4294967295, %v7466_v3  ;;  %v1004_v56 = vmax.f32 %v3603_v44, %v3626_v59  ;;  %v421_v45 = vadd.f32 %v3333_v48, %v252_v8  ;;  %v3645_v14 = vsel %vm3470_vm15, %v419_v24, -1e+30 }
  0xab   : > { %7458 = vst [vmem:[#allocation44_spill] sm:$0xff] %v7457_v62  ;;  %v7469_v52 = vunpack.c.h.bf16 %v3433_v32  ;;  %v7470_v30 = vmov 0  ;;  %v3655_v43 = vsel %vm3486_vm6, %v428_v25, -1e+30  ;;  %v994_v27 = vmax.f32 %v3630_v49, %v3645_v14 }
  0xac   : > { %7461 = vst [vmem:[#allocation45_spill] sm:$0xff] %v7460_v15  ;;  %vm3659_vm13 = vcmp.gt.f32.partialorder %v617_v31, 0.0  ;;  %v7473_v23 = vmov 0  ;;  %v464_v32 = vadd.f32 %v3331_v47, %v307_v36  ;;  %v3669_v54 = vsel %vm3503_vm4, %v420_v21, -1e+30 }
  0xad   : > { %7465 = vst [vmem:[#allocation46_spill] sm:$0xff] %v7464_v60  ;;  %vm3649_vm14 = vcmp.gt.f32.partialorder %v7469_v52, 0.0  ;;  %v7474_v23 = vsel %vm3659_vm13, 4294967295, %v7473_v23  ;;  %v1005_v52 = vmax.f32 %v1004_v56, %v3655_v43  ;;  %v3672_v34 = vpop.permute.xlu2 %321  ;;  %v267_v31 = vpop.permute.xlu1 %266  ;;  %v3676_v18 = vsel %vm3522_vm3, %v429_v57, -1e+30 }
  0xae   : > { %7468 = vst [vmem:[#allocation47_spill] sm:$0xff] %v7467_v3  ;;  %v7471_v30 = vsel %vm3649_vm14, 4294967295, %v7470_v30  ;;  %v995_v8 = vmax.f32 %v994_v27, %v3669_v54  ;;  %v465_v56 = vadd.f32 %v3333_v48, %v307_v36  ;;  %v430_v16 = vadd.f32 %v3325_v38, %v267_v31  ;;  %v257_v21 = vpop.permute.xlu0 %256 }
  0xaf   : > { %7472 = vst [vmem:[#allocation48_spill] sm:$0xff] %v7471_v30  ;;  %v3685_v25 = vsel %vm3533_vm8, %v421_v45, -1e+30  ;;  %vm3689_vm4 = vcmp.gt.f32.partialorder %v7476_v17, 0.0  ;;  %v7480_v27 = vunpack.c.h.bf16 %v3484_v2  ;;  %v7481_v57 = vmov 0 }
  0xb0   : > { %7475 = vst [vmem:[#allocation49_spill] sm:$0xff] %v7474_v23  ;;  %v7478_v35 = vsel %vm3689_vm4, 4294967295, %v7477_v35  ;;  %vm3699_vm3 = vcmp.gt.f32.partialorder %v638_v22, 0.0  ;;  %v7484_v36 = vmov 0  ;;  %v3705_v45 = vsel %vm3548_vm9, %v462_v42, -1e+30 }
  0xb1   : > { %7479 = vst [vmem:[#allocation50_spill] sm:$0xff] %v7478_v35  ;;  %vm3695_vm15 = vcmp.gt.f32.partialorder %v7480_v27, 0.0  ;;  %v7485_v36 = vsel %vm3699_vm3, 4294967295, %v7484_v36  ;;  %v3709_v17 = vsel %vm3552_vm7, %v463_v4, -1e+30  ;;  %v431_v24 = vadd.f32 %v3327_v39, %v267_v31 }
  0xb2   : > { %v7482_v57 = vsel %vm3695_vm15, 4294967295, %v7481_v57  ;;  %7486 = vst [vmem:[#allocation52_spill] sm:$0xff] %v7485_v36  ;;  %v432_v2 = vadd.f32 %v3331_v47, %v267_v31  ;;  %v422_v27 = vadd.f32 %v3325_v38, %v257_v21  ;;  %v423_v22 = vadd.f32 %v3327_v39, %v257_v21 }
  0xb3   : > { %7483 = vst [vmem:[#allocation51_spill] sm:$0xff] %v7482_v57  ;;  %v7489_v40 = vunpack.c.h.bf16 %v3508_v19  ;;  %v424_v42 = vadd.f32 %v3331_v47, %v257_v21  ;;  %v1006_v29 = vmax.f32 %v1005_v52, %v3676_v18  ;;  %v996_v4 = vmax.f32 %v995_v8, %v3685_v25  ;;  %v3746_v8 = vld [vmem:[%s3273_s6 + $0xe0] sm:$0xff] }
  0xb4   : > { %7487 = vst [vmem:[#allocation53_spill] sm:$0xff] %v3705_v45  ;;  %v7493_v53 = vunpack.c.l.bf16 %v3500_v11  ;;  %v3732_v51 = vsel %vm3572_vm5, %v464_v32, -1e+30  ;;  %v433_v19 = vadd.f32 %v3333_v48, %v267_v31  ;;  %v3741_v52 = vsel %vm3581_vm1, %v431_v24, -1e+30 }
  0xb5   : > { %7488 = vst [vmem:[#allocation54_spill] sm:$0xff] %v3709_v17  ;;  %vm3717_vm8 = vcmp.gt.f32.partialorder %v7489_v40, 0.0  ;;  %v3737_v40 = vsel %vm3577_vm2, %v430_v16, -1e+30  ;;  %1007 = vmax.xlane.f32.xlu1 %v1006_v29  ;;  %997 = vmax.xlane.f32.xlu2 %v996_v4  ;;  %v425_v31 = vadd.f32 %v3333_v48, %v257_v21  ;;  %v3753_v16 = vsel %vm3592_vm11, %v422_v27, -1e+30  ;;  %v3809_v60 = vpop.permute.xlu2 %336  ;;  %v287_v15 = vpop.permute.xlu1 %286 }
  0xb6   : > { %v7491_v13 = vsel %vm3717_vm8, 4294967295, %v7490_v13  ;;  %vm3726_vm7 = vcmp.gt.f32.partialorder %v7493_v53, 0.0  ;;  %7497 = vst [vmem:[#allocation57_spill] sm:$0xff] %v3732_v51  ;;  %v1049_v53 = vmax.f32 %v3705_v45, %v3709_v17  ;;  %v1009_v32 = vmax.f32 %v3737_v40, %v3741_v52  ;;  %v3789_v45 = vld [vmem:[%s3273_s6 + $0xc0] sm:$0xff]  ;;  %v282_v3 = vpop.permute.xlu0 %281 }
  0xb7   : > { %7492 = vst [vmem:[#allocation55_spill] sm:$0xff] %v7491_v13  ;;  %v7495_v12 = vsel %vm3726_vm7, 4294967295, %v7494_v12  ;;  %vm7501_vm5 = vnez %v7457_v62  ;;  %v7503_v46 = vunpack.c.h.bf16 %v3500_v11  ;;  %v7504_v17 = vmov 0 }
  0xb8   : > { %7496 = vst [vmem:[#allocation56_spill] sm:$0xff] %v7495_v12  ;;  %v3757_v24 = vsel %vm7501_vm5, %v423_v22, -1e+30  ;;  %v7507_v29 = vunpack.c.l.bf16 %v3511_v20  ;;  %v7508_v4 = vmov 0  ;;  %v7511_v21 = vunpack.c.h.bf16 %v3511_v20 }
  0xb9   : > { %7498 = vst [vmem:[#allocation58_spill] sm:$0xff] %v3737_v40  ;;  %vm3761_vm9 = vcmp.gt.f32.partialorder %v7503_v46, 0.0  ;;  %v7512_v27 = vmov 0  ;;  %v3779_v22 = vsel %vm3605_vm0, %v432_v2, -1e+30  ;;  %v999_v11 = vmax.f32 %v3753_v16, %v3757_v24 }
  0xba   : > { %7499 = vst [vmem:[#allocation59_spill] sm:$0xff] %v3741_v52  ;;  %v7505_v17 = vsel %vm3761_vm9, 4294967295, %v7504_v17  ;;  %vm3767_vm1 = vcmp.gt.f32.partialorder %v7507_v29, 0.0  ;;  %vm3773_vm11 = vcmp.gt.f32.partialorder %v7511_v21, 0.0  ;;  %v653_v46 = vunpack.c.h.bf16 %v3637_v26 }
  0xbb   : > { %7500 = vst [vmem:[#allocation60_spill] sm:$0xff] %v3753_v16  ;;  %v7509_v4 = vsel %vm3767_vm1, 4294967295, %v7508_v4  ;;  %v7513_v27 = vsel %vm3773_vm11, 4294967295, %v7512_v27  ;;  %v3786_v29 = vsel %vm3618_vm10, %v465_v56, -1e+30  ;;  %v3793_v20 = vadd.f32 %v3325_v38, %v3672_v34 }
  0xbc   : > { %7502 = vst [vmem:[#allocation61_spill] sm:$0xff] %v3757_v24  ;;  %v1010_v21 = vmax.f32 %v1009_v32, %v3779_v22  ;;  %v3798_v2 = vsel %vm3632_vm12, %v424_v42, -1e+30  ;;  %v3803_v55 = vadd.f32 %v3327_v39, %v3672_v34  ;;  %v3807_v56 = vadd.f32 %v3331_v47, %v3672_v34 }
  0xbd   : > { %7506 = vst [vmem:[#allocation62_spill] sm:$0xff] %v7505_v17  ;;  %v3813_v32 = vsel %vm3649_vm14, %v433_v19, -1e+30  ;;  %v1000_v42 = vmax.f32 %v999_v11, %v3798_v2  ;;  %v446_v62 = vadd.f32 %v3325_v38, %v287_v15  ;;  %v3819_v37 = vsel %vm3659_vm13, %v425_v31, -1e+30  ;;  %v3926_v12 = vpop.permute.xlu2 %351 }
  0xbe   : > { %7510 = vst [vmem:[#allocation63_spill] sm:$0xff] %v7509_v4  ;;  %vm3823_vm10 = vcmp.gt.f32.partialorder %v7520_v7, 0.0  ;;  %v7524_v30 = vunpack.c.h.bf16 %v3543_v0  ;;  %v7525_v19 = vmov 0  ;;  %v7528_v11 = vunpack.c.l.bf16 %v3614_v6  ;;  %v3865_v6 = vld [vmem:[%s3273_s6 + $0xd0] sm:$0xff] }
  0xbf   : > { %7514 = vst [vmem:[#allocation64_spill] sm:$0xff] %v7513_v27  ;;  %v7522_v28 = vsel %vm3823_vm10, 4294967295, %v7521_v28  ;;  %v3840_v31 = vmax.f32 %v1049_v53, %v3732_v51  ;;  %v658_v7 = vunpack.c.l.bf16 %v3789_v45  ;;  %v447_v23 = vadd.f32 %v3327_v39, %v287_v15 }
  0xc0   : > { %7515 = vst [vmem:[#allocation65_spill] sm:$0xff] %v3779_v22  ;;  %vm3829_vm12 = vcmp.gt.f32.partialorder %v7524_v30, 0.0  ;;  %vm3835_vm5 = vcmp.gt.f32.partialorder %v7528_v11, 0.0  ;;  %v448_v0 = vadd.f32 %v3331_v47, %v287_v15  ;;  %v442_v30 = vadd.f32 %v3325_v38, %v282_v3 }
  0xc1   : > { %7516 = vst [vmem:[#allocation66_spill] sm:$0xff] %v3786_v29  ;;  %v7526_v19 = vsel %vm3829_vm12, 4294967295, %v7525_v19  ;;  %v7530_v58 = vsel %vm3835_vm5, 4294967295, %v7529_v58  ;;  %v443_v50 = vadd.f32 %v3327_v39, %v282_v3  ;;  %vm3849_vm13 = vcmp.gt.f32.partialorder %v7532_v41, 0.0 }
  0xc2   : > { %7517 = vst [vmem:[#allocation67_spill] sm:$0xff] %v3798_v2  ;;  %v7533_v11 = vmov 0  ;;  %v571_v2 = vld [vmem:[%s3273_s6 + $0xc8] sm:$0xff]  ;;  %v444_v53 = vadd.f32 %v3331_v47, %v282_v3  ;;  %v1011_v51 = vmax.f32 %v1010_v21, %v3813_v32  ;;  %v1001_v24 = vmax.f32 %v1000_v42, %v3819_v37 }
  0xc3   : > { %7518 = vst [vmem:[#allocation68_spill] sm:$0xff] %v3813_v32  ;;  %v7534_v11 = vsel %vm3849_vm13, 4294967295, %v7533_v11  ;;  %v445_v16 = vadd.f32 %v3333_v48, %v282_v3  ;;  %v7536_v22 = vunpack.c.l.bf16 %v3546_v63  ;;  %v7537_v52 = vmov 0 }
  0xc4   : > { %7519 = vst [vmem:[#allocation69_spill] sm:$0xff] %v3819_v37  ;;  %v3869_v41 = vsel %vm3689_vm4, %v442_v30, -1e+30  ;;  %v3873_v40 = vsel %vm3695_vm15, %v443_v50, -1e+30  ;;  %v449_v21 = vadd.f32 %v3333_v48, %v287_v15  ;;  %v7544_v42 = vmov 0  ;;  %1012 = vmax.xlane.f32.xlu2 %v1011_v51  ;;  %1002 = vmax.xlane.f32.xlu0 %v1001_v24 }
  0xc5   : > { %7523 = vst [vmem:[#allocation70_spill] sm:$0xff] %v7522_v28  ;;  %vm3860_vm14 = vcmp.gt.f32.partialorder %v7536_v22, 0.0  ;;  %v3878_v3 = vsel %vm3699_vm3, %v446_v62, -1e+30  ;;  %v7543_v22 = vunpack.c.h.bf16 %v3546_v63  ;;  %v7547_v30 = vunpack.c.l.bf16 %v3637_v26 }
  0xc6   : > { %7527 = vst [vmem:[#allocation71_spill] sm:$0xff] %v7526_v19  ;;  %v7538_v52 = vsel %vm3860_vm14, 4294967295, %v7537_v52  ;;  %v7548_v35 = vmov 0  ;;  %vm3892_vm15 = vcmp.gt.f32.partialorder %v653_v46, 0.0  ;;  %v7551_v50 = vmov 0 }
  0xc7   : > { %7531 = vst [vmem:[#allocation72_spill] sm:$0xff] %v7530_v58  ;;  %vm3882_vm0 = vcmp.gt.f32.partialorder %v7543_v22, 0.0  ;;  %vm3888_vm4 = vcmp.gt.f32.partialorder %v7547_v30, 0.0  ;;  %v7552_v50 = vsel %vm3892_vm15, 4294967295, %v7551_v50  ;;  %v1024_v62 = vmax.f32 %v3869_v41, %v3873_v40  ;;  %v573_v30 = vld [vmem:[%s3273_s6 + $0xd8] sm:$0xff] }
  0xc8   : > { %7535 = vst [vmem:[#allocation73_spill] sm:$0xff] %v7534_v11  ;;  %v7545_v42 = vsel %vm3882_vm0, 4294967295, %v7544_v42  ;;  %v7549_v35 = vsel %vm3888_vm4, 4294967295, %v7548_v35  ;;  %v3900_v63 = vsel %vm3717_vm8, %v447_v23, -1e+30  ;;  %v659_v15 = vunpack.c.h.bf16 %v3789_v45 }
  0xc9   : > { %7539 = vst [vmem:[#allocation74_spill] sm:$0xff] %v7538_v52  ;;  %v660_v26 = vunpack.c.l.bf16 %v571_v2  ;;  %v3905_v22 = vsel %vm3726_vm7, %v444_v53, -1e+30  ;;  %v1029_v46 = vmax.f32 %v3878_v3, %v3900_v63  ;;  %v661_v24 = vunpack.c.h.bf16 %v571_v2  ;;  %v302_v2 = vpop.permute.xlu1 %301 }
  0xca   : > { %7540 = vst [vmem:[#allocation75_spill] sm:$0xff] %v3869_v41  ;;  %v3914_v13 = vadd.f32 %v3325_v38, %v3809_v60  ;;  %v3918_v23 = vadd.f32 %v3327_v39, %v3809_v60  ;;  %v1025_v45 = vmax.f32 %v1024_v62, %v3905_v22  ;;  %v662_v53 = vunpack.c.l.bf16 %v3865_v6 }
  0xcb   : > { %7541 = vst [vmem:[#allocation76_spill] sm:$0xff] %v3873_v40  ;;  %v3924_v36 = vadd.f32 %v3331_v47, %v3809_v60  ;;  %v3930_v51 = vsel %vm3761_vm9, %v445_v16, -1e+30  ;;  %v3934_v57 = vsel %vm3767_vm1, %v448_v0, -1e+30  ;;  %vm3942_vm8 = vcmp.gt.f32.partialorder %v658_v7, 0.0 }
  0xcc   : > { %7542 = vst [vmem:[#allocation77_spill] sm:$0xff] %v3878_v3  ;;  %v3938_v62 = vsel %vm3773_vm11, %v449_v21, -1e+30  ;;  %v297_v3 = vpop.permute.xlu0 %296  ;;  %v7558_v40 = vmov 0  ;;  %vm3946_vm3 = vcmp.gt.f32.partialorder %v659_v15, 0.0  ;;  %v7561_v16 = vmov 0 }
  0xcd   : > { %7546 = vst [vmem:[#allocation78_spill] sm:$0xff] %v7545_v42  ;;  %v7559_v40 = vsel %vm3942_vm8, 4294967295, %v7558_v40  ;;  %v7562_v16 = vsel %vm3946_vm3, 4294967295, %v7561_v16  ;;  %v663_v0 = vunpack.c.h.bf16 %v3865_v6  ;;  %v664_v4 = vunpack.c.l.bf16 %v573_v30 }
  0xce   : > { %7550 = vst [vmem:[#allocation79_spill] sm:$0xff] %v7549_v35  ;;  %v459_v27 = vadd.f32 %v3327_v39, %v302_v2  ;;  %v454_v21 = vadd.f32 %v3325_v38, %v297_v3  ;;  %v455_v17 = vadd.f32 %v3327_v39, %v297_v3  ;;  %v665_v41 = vunpack.c.h.bf16 %v573_v30 }
  0xcf   : > { %7553 = vst [vmem:[#allocation80_spill] sm:$0xff] %v7552_v50  ;;  %v456_v7 = vadd.f32 %v3331_v47, %v297_v3  ;;  %v457_v15 = vadd.f32 %v3333_v48, %v297_v3  ;;  %vm3958_vm11 = vcmp.gt.f32.partialorder %v660_v26, 0.0  ;;  %v7564_v37 = vmov 0 }
  0xd0   : > { %7554 = vst [vmem:[#allocation81_spill] sm:$0xff] %v3900_v63  ;;  %v458_v63 = vadd.f32 %v3325_v38, %v302_v2  ;;  %v7565_v37 = vsel %vm3958_vm11, 4294967295, %v7564_v37  ;;  %v3964_v6 = vsel %vm3823_vm10, %v454_v21, -1e+30  ;;  %v3968_v30 = vsel %vm3829_vm12, %v455_v17, -1e+30 }
  0xd1   : > { %7555 = vst [vmem:[#allocation82_spill] sm:$0xff] %v3905_v22  ;;  %v1030_v22 = vmax.f32 %v1029_v46, %v3934_v57  ;;  %v460_v46 = vadd.f32 %v3331_v47, %v302_v2  ;;  %v461_v32 = vadd.f32 %v3333_v48, %v302_v2  ;;  %vm3975_vm1 = vcmp.gt.f32.partialorder %v661_v24, 0.0 }
  0xd2   : > { %7556 = vst [vmem:[#allocation83_spill] sm:$0xff] %v3934_v57  ;;  %v1026_v57 = vmax.f32 %v1025_v45, %v3930_v51  ;;  %v3973_v45 = vsel %vm3835_vm5, %v458_v63, -1e+30  ;;  %v7570_v3 = vmov 0  ;;  %v3981_v26 = vadd.f32 %v3325_v38, %v3926_v12 }
  0xd3   : > { %7557 = vst [vmem:[#allocation84_spill] sm:$0xff] %v3938_v62  ;;  %v7571_v3 = vsel %vm3975_vm1, 4294967295, %v7570_v3  ;;  %v3985_v21 = vadd.f32 %v3327_v39, %v3926_v12  ;;  %v7573_v17 = vmax.f32 %v3481_v1, %v3494_v5  ;;  %v7574_v63 = vmax.f32 %v3497_v10, %v3530_v33 }
  0xd4   : > { %7560 = vst [vmem:[#allocation85_spill] sm:$0xff] %v7559_v40  ;;  %v1039_v24 = vmax.f32 %v3964_v6, %v3968_v30  ;;  %v3997_v2 = vsel %vm3849_vm13, %v459_v27, -1e+30  ;;  %v4001_v58 = vadd.f32 %v3331_v47, %v3926_v12  ;;  %1027 = vmax.xlane.f32.xlu1 %v1026_v57  ;;  %v1031_v19 = vmax.f32 %v1030_v22, %v3938_v62  ;;  %v4024_v22 = vpop.permute.xlu2 %366  ;;  %v312_v50 = vpop.permute.xlu0 %311 }
  0xd5   : > { %7563 = vst [vmem:[#allocation86_spill] sm:$0xff] %v7562_v16  ;;  %1017 = vmax.xlane.f32.xlu2 %v7573_v17  ;;  %1022 = vmax.xlane.f32.xlu0 %v7574_v63  ;;  %v4006_v1 = vsel %vm3860_vm14, %v456_v7, -1e+30  ;;  %v1044_v10 = vmax.f32 %v3973_v45, %v3997_v2  ;;  %v575_v17 = vld [vmem:[%s3273_s6 + $0xe8] sm:$0xff]  ;;  %v4013_v63 = vsel %vm3882_vm0, %v457_v15, -1e+30  ;;  %v317_v7 = vpop.permute.xlu1 %316  ;;  %v4046_v35 = vadd.f32 %v3333_v48, %v3672_v34 }
  0xd6   : > { %7566 = vst [vmem:[#allocation87_spill] sm:$0xff] %v7565_v37  ;;  %v1040_v27 = vmax.f32 %v1039_v24, %v4006_v1  ;;  %v4018_v11 = vsel %vm3888_vm4, %v460_v46, -1e+30  ;;  %v4022_v57 = vsel %vm3892_vm15, %v461_v32, -1e+30  ;;  %vm4026_vm13 = vcmp.gt.f32.partialorder %v662_v53, 0.0 }
  0xd7   : > { %7567 = vst [vmem:[#allocation88_spill] sm:$0xff] %v3964_v6  ;;  %v7580_v52 = vmov 0  ;;  %vm4030_vm5 = vcmp.gt.f32.partialorder %v663_v0, 0.0  ;;  %v7583_v15 = vmov 0  ;;  %vm4034_vm0 = vcmp.gt.f32.partialorder %v664_v4, 0.0 }
  0xd8   : > { %7568 = vst [vmem:[#allocation89_spill] sm:$0xff] %v3968_v30  ;;  %v7581_v52 = vsel %vm4026_vm13, 4294967295, %v7580_v52  ;;  %v7584_v15 = vsel %vm4030_vm5, 4294967295, %v7583_v15  ;;  %v7586_v24 = vmov 0  ;;  %vm4038_vm4 = vcmp.gt.f32.partialorder %v665_v41, 0.0 }
  0xd9   : > { %7569 = vst [vmem:[#allocation90_spill] sm:$0xff] %v3973_v45  ;;  %v7587_v24 = vsel %vm4034_vm0, 4294967295, %v7586_v24  ;;  %v7589_v46 = vmov 0  ;;  %v470_v32 = vadd.f32 %v3325_v38, %v317_v7  ;;  %v1045_v53 = vmax.f32 %v1044_v10, %v4018_v11 }
  0xda   : > { %7572 = vst [vmem:[#allocation91_spill] sm:$0xff] %v7571_v3  ;;  %v7590_v46 = vsel %vm4038_vm4, 4294967295, %v7589_v46  ;;  %v667_v0 = vunpack.c.h.bf16 %v3746_v8  ;;  %v471_v4 = vadd.f32 %v3327_v39, %v317_v7  ;;  %v466_v42 = vadd.f32 %v3325_v38, %v312_v50 }
  0xdb   : > { %7575 = vst [vmem:[#allocation92_spill] sm:$0xff] %v3997_v2  ;;  %v467_v41 = vadd.f32 %v3327_v39, %v312_v50  ;;  %v668_v28 = vunpack.c.l.bf16 %v575_v17  ;;  %v472_v2 = vadd.f32 %v3331_v47, %v317_v7  ;;  %v468_v45 = vadd.f32 %v3331_v47, %v312_v50 }
  0xdc   : > { %7576 = vst [vmem:[#allocation93_spill] sm:$0xff] %v4006_v1  ;;  %v1041_v1 = vmax.f32 %v1040_v27, %v4013_v63  ;;  %v469_v10 = vadd.f32 %v3333_v48, %v312_v50  ;;  %v4058_v34 = vsel %vm3942_vm8, %v466_v42, -1e+30  ;;  %v473_v30 = vadd.f32 %v3333_v48, %v317_v7 }
  0xdd   : > { %7577 = vst [vmem:[#allocation94_spill] sm:$0xff] %v4013_v63  ;;  %v4067_v6 = vsel %vm4026_vm13, %v470_v32, -1e+30  ;;  %v4071_v62 = vadd.f32 %v3325_v38, %v4024_v22  ;;  %v4075_v50 = vadd.f32 %v3327_v39, %v4024_v22  ;;  %1032 = vmax.xlane.f32.xlu2 %v1031_v19  ;;  %v7595_v42 = vmax.f32 %v3610_v61, %v3570_v9 }
  0xde   : > { %7578 = vst [vmem:[#allocation95_spill] sm:$0xff] %v4018_v11  ;;  %v4062_v11 = vsel %vm3946_vm3, %v467_v41, -1e+30  ;;  %v4084_v7 = vsel %vm4030_vm5, %v471_v4, -1e+30  ;;  %v4088_v32 = vadd.f32 %v3331_v47, %v4024_v22  ;;  %1042 = vmax.xlane.f32.xlu1 %v1041_v1  ;;  %v669_v19 = vunpack.c.h.bf16 %v575_v17  ;;  %v4111_v1 = vpop.permute.xlu2 %381  ;;  %v332_v17 = vpop.permute.xlu1 %331 }
  0xdf   : > { %7579 = vst [vmem:[#allocation96_spill] sm:$0xff] %v4022_v57  ;;  %1037 = vmax.xlane.f32.xlu0 %v7595_v42  ;;  %v1054_v27 = vmax.f32 %v4058_v34, %v4062_v11  ;;  %v4092_v41 = vsel %vm3958_vm11, %v468_v45, -1e+30  ;;  %v1059_v61 = vmax.f32 %v4067_v6, %v4084_v7  ;;  %v4098_v42 = vsel %vm3975_vm1, %v469_v10, -1e+30 }
  0xe0   : > { %7582 = vst [vmem:[#allocation97_spill] sm:$0xff] %v7581_v52  ;;  %v7600_v52 = vmov 0  ;;  %vm4107_vm13 = vcmp.gt.f32.partialorder %v667_v0, 0.0  ;;  %v7603_v45 = vmov 0  ;;  %v1046_v3 = vmax.f32 %v1045_v53, %v4022_v57  ;;  %v327_v0 = vpop.permute.xlu0 %326 }
  0xe1   : > { %7585 = vst [vmem:[#allocation98_spill] sm:$0xff] %v7584_v15  ;;  %v1055_v4 = vmax.f32 %v1054_v27, %v4092_v41  ;;  %v7599_v15 = vunpack.c.l.bf16 %v3746_v8  ;;  %v7604_v45 = vsel %vm4107_vm13, 4294967295, %v7603_v45  ;;  %v4116_v10 = vsel %vm4034_vm0, %v472_v2, -1e+30 }
  0xe2   : > { %7588 = vst [vmem:[#allocation99_spill] sm:$0xff] %v7587_v24  ;;  %v4120_v8 = vsel %vm4038_vm4, %v473_v30, -1e+30  ;;  %vm4122_vm15 = vcmp.gt.f32.partialorder %v668_v28, 0.0  ;;  %v1060_v27 = vmax.f32 %v1059_v61, %v4116_v10  ;;  %vm4127_vm1 = vcmp.gt.f32.partialorder %v669_v19, 0.0  ;;  %v576_v28 = vld [vmem:[%s3273_s6 + $0xf0] sm:$0xff] }
  0xe3   : > { %7591 = vst [vmem:[#allocation100_spill] sm:$0xff] %v7590_v46  ;;  %vm4103_vm5 = vcmp.gt.f32.partialorder %v7599_v15, 0.0  ;;  %v7608_v15 = vmov 0  ;;  %v7611_v37 = vmov 0  ;;  %v4139_v30 = vsel %vm4107_vm13, %v3803_v55, -1e+30 }
  0xe4   : > { %7592 = vst [vmem:[#allocation101_spill] sm:$0xff] %v4058_v34  ;;  %v7601_v52 = vsel %vm4103_vm5, 4294967295, %v7600_v52  ;;  %v7609_v15 = vsel %vm4122_vm15, 4294967295, %v7608_v15  ;;  %v7612_v37 = vsel %vm4127_vm1, 4294967295, %v7611_v37  ;;  %v4134_v2 = vsel %vm4103_vm5, %v3793_v20, -1e+30 }
  0xe5   : > { %7593 = vst [vmem:[#allocation102_spill] sm:$0xff] %v4062_v11  ;;  %v4144_v53 = vadd.f32 %v3325_v38, %v4111_v1  ;;  %v4148_v61 = vadd.f32 %v3327_v39, %v4111_v1  ;;  %v4152_v19 = vadd.f32 %v3331_v47, %v4111_v1  ;;  %v482_v20 = vadd.f32 %v3325_v38, %v332_v17  ;;  %v578_v34 = vld [vmem:[%s3273_s6 + $0x100] sm:$0xff] }
  0xe6   : > { %7594 = vst [vmem:[#allocation103_spill] sm:$0xff] %v4067_v6  ;;  %v483_v55 = vadd.f32 %v3327_v39, %v332_v17  ;;  %v479_v46 = vadd.f32 %v3327_v39, %v327_v0  ;;  %v1056_v24 = vmax.f32 %v1055_v4, %v4098_v42  ;;  %v480_v16 = vadd.f32 %v3331_v47, %v327_v0 }
  0xe7   : > { %7596 = vst [vmem:[#allocation104_spill] sm:$0xff] %v4084_v7  ;;  %v4164_v40 = vsel %vm4122_vm15, %v3807_v56, -1e+30  ;;  %v670_v7 = vunpack.c.l.bf16 %v576_v28  ;;  %1047 = vmax.xlane.f32.xlu2 %v1046_v3  ;;  %v7617_v6 = vmax.f32 %v3840_v31, %v3786_v29  ;;  %v671_v11 = vunpack.c.h.bf16 %v576_v28 }
  0xe8   : > { %7597 = vst [vmem:[#allocation105_spill] sm:$0xff] %v4092_v41  ;;  %v481_v41 = vadd.f32 %v3333_v48, %v327_v0  ;;  %1057 = vmax.xlane.f32.xlu1 %v1056_v24  ;;  %v1061_v56 = vmax.f32 %v1060_v27, %v4120_v8  ;;  %v7618_v3 = vmov 0  ;;  %v4183_v31 = vsel %vm4127_vm1, %v4046_v35, -1e+30 }
  0xe9   : > { %7598 = vst [vmem:[#allocation106_spill] sm:$0xff] %v4098_v42  ;;  %1052 = vmax.xlane.f32.xlu0 %v7617_v6  ;;  %vm4176_vm15 = vcmp.gt.f32.partialorder %v670_v7, 0.0  ;;  %vm4185_vm13 = vcmp.gt.f32.partialorder %v671_v11, 0.0  ;;  %v7625_v6 = vmov 0  ;;  %v7628_v24 = vmov 0  ;;  %v4197_v7 = vpop.permute.xlu2 %396 }
  0xea   : > { %7602 = vst [vmem:[#allocation107_spill] sm:$0xff] %v7601_v52  ;;  %v577_v52 = vld [vmem:[%s3273_s6 + $0xf8] sm:$0xff]  ;;  %v7619_v3 = vsel %vm4176_vm15, 4294967295, %v7618_v3  ;;  %v4207_v11 = vsel %vm4185_vm13, %v479_v46, -1e+30  ;;  %v674_v27 = vunpack.c.l.bf16 %v578_v34  ;;  %v675_v28 = vunpack.c.h.bf16 %v578_v34 }
  0xeb   : > { %7605 = vst [vmem:[#allocation108_spill] sm:$0xff] %v7604_v45  ;;  %v478_v45 = vadd.f32 %v3325_v38, %v327_v0  ;;  %v672_v4 = vunpack.c.l.bf16 %v577_v52  ;;  %v673_v42 = vunpack.c.h.bf16 %v577_v52  ;;  %v7622_v52 = vmov 0  ;;  %v579_v0 = vld [vmem:[%s3273_s6 + $0x108] sm:$0xff] }
  0xec   : > { %7606 = vst [vmem:[#allocation109_spill] sm:$0xff] %v4116_v10  ;;  %v1064_v10 = vmax.f32 %v4134_v2, %v4139_v30  ;;  %v7623_v52 = vsel %vm4185_vm13, 4294967295, %v7622_v52  ;;  %v4223_v46 = vadd.f32 %v3325_v38, %v4197_v7  ;;  %v4227_v34 = vadd.f32 %v3327_v39, %v4197_v7 }
  0xed   : > { %7607 = vst [vmem:[#allocation110_spill] sm:$0xff] %v4120_v8  ;;  %vm4189_vm5 = vcmp.gt.f32.partialorder %v672_v4, 0.0  ;;  %vm4193_vm4 = vcmp.gt.f32.partialorder %v673_v42, 0.0  ;;  %v4203_v35 = vsel %vm4176_vm15, %v478_v45, -1e+30  ;;  %v342_v4 = vpop.permute.xlu0 %341  ;;  %v485_v45 = vadd.f32 %v3333_v48, %v332_v17  ;;  %v581_v8 = vld [vmem:[%s3273_s6 + $0x118] sm:$0xff] }
  0xee   : > { %7610 = vst [vmem:[#allocation111_spill] sm:$0xff] %v7609_v15  ;;  %v484_v15 = vadd.f32 %v3331_v47, %v332_v17  ;;  %v7626_v6 = vsel %vm4189_vm5, 4294967295, %v7625_v6  ;;  %v7629_v24 = vsel %vm4193_vm4, 4294967295, %v7628_v24  ;;  %v1069_v17 = vmax.f32 %v4203_v35, %v4207_v11 }
  0xef   : > { %7613 = vst [vmem:[#allocation112_spill] sm:$0xff] %v7612_v37  ;;  %v4213_v37 = vsel %vm4189_vm5, %v480_v16, -1e+30  ;;  %vm4247_vm1 = vcmp.gt.f32.partialorder %v674_v27, 0.0  ;;  %vm4251_vm0 = vcmp.gt.f32.partialorder %v675_v28, 0.0  ;;  %v490_v57 = vadd.f32 %v3325_v38, %v342_v4  ;;  %1062 = vmax.xlane.f32.xlu2 %v1061_v56 }
  0xf0   : > { %7614 = vst [vmem:[#allocation113_spill] sm:$0xff] %v4134_v2  ;;  %v7638_v2 = vmov 0  ;;  %v4264_v27 = vsel %vm4247_vm1, %v482_v20, -1e+30  ;;  %v491_v28 = vadd.f32 %v3327_v39, %v342_v4  ;;  %v4273_v56 = vsel %vm4251_vm0, %v483_v55, -1e+30 }
  0xf1   : > { %7615 = vst [vmem:[#allocation114_spill] sm:$0xff] %v4139_v30  ;;  %v1065_v30 = vmax.f32 %v1064_v10, %v4164_v40  ;;  %v4199_v10 = vpop.permute.xlu1 %346  ;;  %v7639_v2 = vsel %vm4251_vm0, 4294967295, %v7638_v2  ;;  %v681_v20 = vunpack.c.h.bf16 %v581_v8  ;;  %v492_v9 = vadd.f32 %v3331_v47, %v342_v4 }
  0xf2   : > { %7616 = vst [vmem:[#allocation115_spill] sm:$0xff] %v4164_v40  ;;  %v4235_v16 = vadd.f32 %v3325_v38, %v4199_v10  ;;  %v7635_v40 = vmov 0  ;;  %v7650_v55 = vmov 0 }
  0xf3   : > { %7620 = vst [vmem:[#allocation116_spill] sm:$0xff] %v7619_v3  ;;  %v1066_v42 = vmax.f32 %v1065_v30, %v4183_v31  ;;  %v4217_v3 = vsel %vm4193_vm4, %v481_v41, -1e+30  ;;  %v4231_v30 = vadd.f32 %v3331_v47, %v4197_v7  ;;  %v4239_v41 = vadd.f32 %v3327_v39, %v4199_v10 }
  0xf4   : > { %7621 = vst [vmem:[#allocation117_spill] sm:$0xff] %v4183_v31  ;;  %v4245_v31 = vadd.f32 %v3331_v47, %v4199_v10  ;;  %v7636_v40 = vsel %vm4247_vm1, 4294967295, %v7635_v40 }
  0xf5   : > { %7624 = vst [vmem:[#allocation118_spill] sm:$0xff] %v7623_v52  ;;  %v580_v52 = vld [vmem:[%s3273_s6 + $0x110] sm:$0xff]  ;;  %1067 = vmax.xlane.f32.xlu0 %v1066_v42 }
  0xf6   : > { %7627 = vst [vmem:[#allocation119_spill] sm:$0xff] %v7626_v6  ;;  %v677_v6 = vunpack.c.h.bf16 %v579_v0  ;;  %v678_v29 = vunpack.c.l.bf16 %v580_v52  ;;  %v679_v42 = vunpack.c.h.bf16 %v580_v52  ;;  %v7653_v52 = vmov 0 }
  0xf7   : > { %7630 = vst [vmem:[#allocation120_spill] sm:$0xff] %v7629_v24  ;;  %v676_v24 = vunpack.c.l.bf16 %v579_v0  ;;  %v1070_v0 = vmax.f32 %v1069_v17, %v4213_v37  ;;  %v582_v17 = vld [vmem:[%s3273_s6 + $0x120] sm:$0xff] }
  0xf8   : > { %7631 = vst [vmem:[#allocation121_spill] sm:$0xff] %v4203_v35  ;;  %vm4267_vm5 = vcmp.gt.f32.partialorder %v677_v6, 0.0  ;;  %v7645_v35 = vmov 0  ;;  %vm4286_vm0 = vcmp.gt.f32.partialorder %v678_v29, 0.0  ;;  %vm4290_vm1 = vcmp.gt.f32.partialorder %v679_v42, 0.0 }
  0xf9   : > { %7632 = vst [vmem:[#allocation122_spill] sm:$0xff] %v4207_v11  ;;  %vm4258_vm4 = vcmp.gt.f32.partialorder %v676_v24, 0.0  ;;  %v7641_v11 = vmov 0  ;;  %v7646_v35 = vsel %vm4267_vm5, 4294967295, %v7645_v35  ;;  %v1071_v24 = vmax.f32 %v1070_v0, %v4217_v3  ;;  %v4280_v6 = vpop.permute.xlu1 %361 }
  0xfa   : > { %7633 = vst [vmem:[#allocation123_spill] sm:$0xff] %v4213_v37  ;;  %v7642_v11 = vsel %vm4258_vm4, 4294967295, %v7641_v11  ;;  %v1074_v37 = vmax.f32 %v4264_v27, %v4273_v56  ;;  %v4284_v63 = vsel %vm4258_vm4, %v484_v15, -1e+30  ;;  %v7651_v55 = vsel %vm4286_vm0, 4294967295, %v7650_v55 }
  0xfb   : > { %7634 = vst [vmem:[#allocation124_spill] sm:$0xff] %v4217_v3  ;;  %v7654_v52 = vsel %vm4290_vm1, 4294967295, %v7653_v52  ;;  %1072 = vmax.xlane.f32.xlu1 %v1071_v24  ;;  %v4298_v0 = vsel %vm4267_vm5, %v485_v45, -1e+30  ;;  %v489_v29 = vadd.f32 %v3333_v48, %v3809_v60  ;;  %v682_v15 = vunpack.c.l.bf16 %v582_v17 }
  0xfc   : > { %7637 = vst [vmem:[#allocation125_spill] sm:$0xff] %v7636_v40  ;;  %v680_v40 = vunpack.c.l.bf16 %v581_v8  ;;  %v4294_v8 = vpop.permute.xlu0 %356  ;;  %v4305_v42 = vadd.f32 %v3325_v38, %v4280_v6  ;;  %v7657_v24 = vmov 0  ;;  %v493_v45 = vadd.f32 %v3333_v48, %v342_v4 }
  0xfd   : > { %7640 = vst [vmem:[#allocation126_spill] sm:$0xff] %v7639_v2  ;;  %v4309_v2 = vadd.f32 %v3327_v39, %v4280_v6  ;;  %vm4318_vm5 = vcmp.gt.f32.partialorder %v681_v20, 0.0  ;;  %v7660_v60 = vmov 0  ;;  %v4335_v4 = vadd.f32 %v3331_v47, %v4280_v6 }
  0xfe   : > { %7643 = vst [vmem:[#allocation127_spill] sm:$0xff] %v7642_v11  ;;  %v1075_v11 = vmax.f32 %v1074_v37, %v4284_v63  ;;  %vm4311_vm4 = vcmp.gt.f32.partialorder %v680_v40, 0.0  ;;  %v7661_v60 = vsel %vm4318_vm5, 4294967295, %v7660_v60  ;;  %v4330_v40 = vsel %vm4290_vm1, %v3918_v23, -1e+30 }
  0xff   : > { %7644 = vst [vmem:[#allocation128_spill] sm:$0xff] %v4264_v27  ;;  %v7658_v24 = vsel %vm4311_vm4, 4294967295, %v7657_v24  ;;  %vm4348_vm1 = vcmp.gt.f32.partialorder %v682_v15, 0.0  ;;  %v7697_v3 = vmov 0 }
 0x100   : > { %7647 = vst [vmem:[#allocation129_spill] sm:$0xff] %v7646_v35  ;;  %v583_v35 = vld [vmem:[%s3273_s6 + $0x128] sm:$0xff]  ;;  %v1076_v37 = vmax.f32 %v1075_v11, %v4298_v0  ;;  %v4340_v11 = vsel %vm4311_vm4, %v3924_v36, -1e+30  ;;  %v7670_v36 = vmov 0 }
 0x101   : > { %7648 = vst [vmem:[#allocation130_spill] sm:$0xff] %v4273_v56  ;;  %v584_v56 = vld [vmem:[%s3273_s6 + $0x130] sm:$0xff]  ;;  %v684_v23 = vunpack.c.l.bf16 %v583_v35 }
 0x102   : > { %7649 = vst [vmem:[#allocation131_spill] sm:$0xff] %v4284_v63  ;;  %v4325_v63 = vsel %vm4286_vm0, %v3914_v13, -1e+30  ;;  %v683_v13 = vunpack.c.h.bf16 %v582_v17  ;;  %1077 = vmax.xlane.f32.xlu2 %v1076_v37  ;;  %v4359_v17 = vsel %vm4348_vm1, %v490_v57, -1e+30  ;;  %v585_v37 = vld [vmem:[%s3273_s6 + $0x138] sm:$0xff]  ;;  %v4376_v57 = vadd.f32 %v3325_v38, %v4294_v8 }
 0x103   : > { %7652 = vst [vmem:[#allocation132_spill] sm:$0xff] %v7651_v55  ;;  %v1079_v20 = vmax.f32 %v4325_v63, %v4330_v40  ;;  %v685_v55 = vunpack.c.h.bf16 %v583_v35  ;;  %v7677_v35 = vmov 0 }
 0x104   : > { %7655 = vst [vmem:[#allocation133_spill] sm:$0xff] %v7654_v52  ;;  %v4346_v52 = vsel %vm4318_vm5, %v489_v29, -1e+30  ;;  %vm4353_vm0 = vcmp.gt.f32.partialorder %v683_v13, 0.0  ;;  %vm4362_vm5 = vcmp.gt.f32.partialorder %v684_v23, 0.0  ;;  %v7674_v29 = vmov 0 }
 0x105   : > { %7656 = vst [vmem:[#allocation134_spill] sm:$0xff] %v4298_v0  ;;  %v7667_v0 = vmov 0  ;;  %v1080_v27 = vmax.f32 %v1079_v20, %v4340_v11  ;;  %v7671_v36 = vsel %vm4353_vm0, 4294967295, %v7670_v36  ;;  %v7675_v29 = vsel %vm4362_vm5, 4294967295, %v7674_v29 }
 0x106   : > { %7659 = vst [vmem:[#allocation135_spill] sm:$0xff] %v7658_v24  ;;  %v7668_v0 = vsel %vm4348_vm1, 4294967295, %v7667_v0  ;;  %vm4366_vm4 = vcmp.gt.f32.partialorder %v685_v55, 0.0  ;;  %v4372_v15 = vsel %vm4353_vm0, %v491_v28, -1e+30  ;;  %v687_v20 = vunpack.c.h.bf16 %v584_v56  ;;  %v4385_v24 = vpop.permute.xlu1 %376 }
 0x107   : > { %7662 = vst [vmem:[#allocation136_spill] sm:$0xff] %v7661_v60  ;;  %v686_v60 = vunpack.c.l.bf16 %v584_v56  ;;  %v7678_v35 = vsel %vm4366_vm4, 4294967295, %v7677_v35  ;;  %v4380_v13 = vadd.f32 %v3327_v39, %v4294_v8  ;;  %v1081_v23 = vmax.f32 %v1080_v27, %v4346_v52 }
 0x108   : > { %7663 = vst [vmem:[#allocation137_spill] sm:$0xff] %v4325_v63  ;;  %v1084_v55 = vmax.f32 %v4359_v17, %v4372_v15  ;;  %v4389_v28 = vadd.f32 %v3331_v47, %v4294_v8  ;;  %v4393_v56 = vsel %vm4362_vm5, %v492_v9, -1e+30  ;;  %v4399_v27 = vsel %vm4366_vm4, %v493_v45, -1e+30 }
 0x109   : > { %7664 = vst [vmem:[#allocation138_spill] sm:$0xff] %v4330_v40  ;;  %1082 = vmax.xlane.f32.xlu0 %v1081_v23  ;;  %v4408_v9 = vadd.f32 %v3327_v39, %v4385_v24  ;;  %v689_v40 = vunpack.c.h.bf16 %v585_v37  ;;  %vm4413_vm5 = vcmp.gt.f32.partialorder %v686_v60, 0.0  ;;  %v7683_v23 = vmov 0 }
 0x10a   : > { %7665 = vst [vmem:[#allocation139_spill] sm:$0xff] %v4340_v11  ;;  %v4404_v11 = vadd.f32 %v3325_v38, %v4385_v24  ;;  %v7684_v23 = vsel %vm4413_vm5, 4294967295, %v7683_v23  ;;  %vm4417_vm4 = vcmp.gt.f32.partialorder %v687_v20, 0.0  ;;  %v7686_v45 = vmov 0 }
 0x10b   : > { %7666 = vst [vmem:[#allocation140_spill] sm:$0xff] %v4346_v52  ;;  %v1085_v52 = vmax.f32 %v1084_v55, %v4393_v56  ;;  %v7687_v45 = vsel %vm4417_vm4, 4294967295, %v7686_v45  ;;  %v7689_v55 = vmov 0  ;;  %v4434_v60 = vsel %vm4413_vm5, %v4235_v16, -1e+30 }
 0x10c   : > { %7669 = vst [vmem:[#allocation141_spill] sm:$0xff] %v7668_v0  ;;  %v688_v0 = vunpack.c.l.bf16 %v585_v37  ;;  %v588_v37 = vld [vmem:[%s3273_s6 + $0x150] sm:$0xff]  ;;  %vm4446_vm1 = vcmp.gt.f32.partialorder %v689_v40, 0.0  ;;  %v501_v40 = vadd.f32 %v3333_v48, %v3926_v12 }
 0x10d   : > { %7672 = vst [vmem:[#allocation142_spill] sm:$0xff] %v7671_v36  ;;  %v497_v36 = vadd.f32 %v3333_v48, %v4199_v10  ;;  %v586_v10 = vld [vmem:[%s3273_s6 + $0x140] sm:$0xff]  ;;  %v1086_v63 = vmax.f32 %v1085_v52, %v4399_v27  ;;  %v7694_v52 = vmov 0 }
 0x10e   : > { %7673 = vst [vmem:[#allocation143_spill] sm:$0xff] %v4359_v17  ;;  %vm4421_vm0 = vcmp.gt.f32.partialorder %v688_v0, 0.0  ;;  %v4439_v0 = vsel %vm4417_vm4, %v4239_v41, -1e+30  ;;  %v7695_v52 = vsel %vm4446_vm1, 4294967295, %v7694_v52  ;;  %v691_v41 = vunpack.c.h.bf16 %v586_v10 }
 0x10f   : > { %7676 = vst [vmem:[#allocation144_spill] sm:$0xff] %v7675_v29  ;;  %v4410_v29 = vpop.permute.xlu0 %371  ;;  %v7690_v55 = vsel %vm4421_vm0, 4294967295, %v7689_v55  ;;  %1087 = vmax.xlane.f32.xlu1 %v1086_v63  ;;  %v4455_v16 = vsel %vm4421_vm0, %v4245_v31, -1e+30  ;;  %v4467_v63 = vsel %vm4446_vm1, %v497_v36, -1e+30 }
 0x110   : > { %7679 = vst [vmem:[#allocation145_spill] sm:$0xff] %v7678_v35  ;;  %v587_v35 = vld [vmem:[%s3273_s6 + $0x148] sm:$0xff]  ;;  %v4444_v20 = vadd.f32 %v3325_v38, %v4410_v29  ;;  %vm4469_vm0 = vcmp.gt.f32.partialorder %v691_v41, 0.0  ;;  %v7700_v31 = vmov 0 }
 0x111   : > { %7680 = vst [vmem:[#allocation146_spill] sm:$0xff] %v4372_v15  ;;  %v693_v15 = vunpack.c.h.bf16 %v587_v35  ;;  %v7701_v31 = vsel %vm4469_vm0, 4294967295, %v7700_v31 }
 0x112   : > { %7681 = vst [vmem:[#allocation147_spill] sm:$0xff] %v4393_v56  ;;  %v4429_v56 = vadd.f32 %v3331_v47, %v4385_v24 }
 0x113   : > { %7682 = vst [vmem:[#allocation148_spill] sm:$0xff] %v4399_v27  ;;  %v690_v27 = vunpack.c.l.bf16 %v586_v10  ;;  %vm4487_vm1 = vcmp.gt.f32.partialorder %v693_v15, 0.0  ;;  %v7707_v10 = vmov 0  ;;  %v505_v15 = vadd.f32 %v3333_v48, %v4294_v8 }
 0x114   : > { %7685 = vst [vmem:[#allocation149_spill] sm:$0xff] %v7684_v23  ;;  %v1089_v23 = vmax.f32 %v4434_v60, %v4439_v0  ;;  %v7708_v10 = vsel %vm4487_vm1, 4294967295, %v7707_v10 }
 0x115   : > { %7688 = vst [vmem:[#allocation150_spill] sm:$0xff] %v7687_v45  ;;  %v692_v45 = vunpack.c.l.bf16 %v587_v35  ;;  %vm4460_vm4 = vcmp.gt.f32.partialorder %v690_v27, 0.0  ;;  %v7703_v35 = vmov 0  ;;  %v4484_v27 = vadd.f32 %v3327_v39, %v4410_v29 }
 0x116   : > { %7691 = vst [vmem:[#allocation151_spill] sm:$0xff] %v7690_v55  ;;  %v1090_v17 = vmax.f32 %v1089_v23, %v4455_v16  ;;  %v7698_v3 = vsel %vm4460_vm4, 4294967295, %v7697_v3  ;;  %v4480_v12 = vsel %vm4460_vm4, %v3981_v26, -1e+30  ;;  %v4494_v23 = vsel %vm4469_vm0, %v3985_v21, -1e+30 }
 0x117   : > { %7692 = vst [vmem:[#allocation152_spill] sm:$0xff] %v4434_v60  ;;  %v694_v60 = vunpack.c.l.bf16 %v588_v37  ;;  %vm4473_vm5 = vcmp.gt.f32.partialorder %v692_v45, 0.0  ;;  %v1094_v26 = vmax.f32 %v4480_v12, %v4494_v23  ;;  %v695_v45 = vunpack.c.h.bf16 %v588_v37  ;;  %v4528_v8 = vpop.permute.xlu0 %386 }
 0x118   : > { %7693 = vst [vmem:[#allocation153_spill] sm:$0xff] %v4439_v0  ;;  %v589_v0 = vld [vmem:[%s3273_s6 + $0x158] sm:$0xff]  ;;  %v7704_v35 = vsel %vm4473_vm5, 4294967295, %v7703_v35  ;;  %v1091_v36 = vmax.f32 %v1090_v17, %v4467_v63  ;;  %v4502_v17 = vadd.f32 %v3331_v47, %v4410_v29  ;;  %v4507_v21 = vsel %vm4473_vm5, %v4001_v58, -1e+30 }
 0x119   : > { %7696 = vst [vmem:[#allocation154_spill] sm:$0xff] %v7695_v52  ;;  %v696_v41 = vunpack.c.l.bf16 %v589_v0  ;;  %v697_v52 = vunpack.c.h.bf16 %v589_v0  ;;  %vm4511_vm0 = vcmp.gt.f32.partialorder %v694_v60, 0.0  ;;  %v7712_v37 = vmov 0  ;;  %v590_v60 = vld [vmem:[%s3273_s6 + $0x160] sm:$0xff] }
 0x11a   : > { %7699 = vst [vmem:[#allocation155_spill] sm:$0xff] %v7698_v3  ;;  %v4498_v3 = vpop.permute.xlu1 %391  ;;  %1092 = vmax.xlane.f32.xlu2 %v1091_v36  ;;  %v7713_v37 = vsel %vm4511_vm0, 4294967295, %v7712_v37  ;;  %v4517_v0 = vsel %vm4487_vm1, %v501_v40, -1e+30  ;;  %vm4520_vm4 = vcmp.gt.f32.partialorder %v695_v45, 0.0  ;;  %v7716_v36 = vmov 0 }
 0x11b   : > { %7702 = vst [vmem:[#allocation156_spill] sm:$0xff] %v7701_v31  ;;  %v1095_v31 = vmax.f32 %v1094_v26, %v4507_v21  ;;  %v7717_v36 = vsel %vm4520_vm4, 4294967295, %v7716_v36  ;;  %vm4524_vm5 = vcmp.gt.f32.partialorder %v696_v41, 0.0  ;;  %v7719_v58 = vmov 0  ;;  %v591_v41 = vld [vmem:[%s3273_s6 + $0x168] sm:$0xff] }
 0x11c   : > { %7705 = vst [vmem:[#allocation157_spill] sm:$0xff] %v7704_v35  ;;  %v7720_v58 = vsel %vm4524_vm5, 4294967295, %v7719_v58  ;;  %vm4531_vm13 = vcmp.gt.f32.partialorder %v697_v52, 0.0  ;;  %v7722_v35 = vmov 0  ;;  %v4538_v40 = vsel %vm4511_vm0, %v4376_v57, -1e+30 }
 0x11d   : > { %7706 = vst [vmem:[#allocation158_spill] sm:$0xff] %v4480_v12  ;;  %v7723_v35 = vsel %vm4531_vm13, 4294967295, %v7722_v35  ;;  %v4543_v26 = vsel %vm4520_vm4, %v4380_v13, -1e+30  ;;  %v4547_v45 = vadd.f32 %v3325_v38, %v4498_v3  ;;  %v1096_v52 = vmax.f32 %v1095_v31, %v4517_v0  ;;  %v592_v13 = vld [vmem:[%s3273_s6 + $0x170] sm:$0xff] }
 0x11e   : > { %7709 = vst [vmem:[#allocation159_spill] sm:$0xff] %v7708_v10  ;;  %v1099_v10 = vmax.f32 %v4538_v40, %v4543_v26  ;;  %v4555_v57 = vadd.f32 %v3327_v39, %v4498_v3  ;;  %v4559_v55 = vadd.f32 %v3331_v47, %v4498_v3  ;;  %v4569_v31 = vadd.f32 %v3325_v38, %v4528_v8 }
 0x11f   : > { %7710 = vst [vmem:[#allocation160_spill] sm:$0xff] %v4494_v23  ;;  %1097 = vmax.xlane.f32.xlu0 %v1096_v52  ;;  %v700_v12 = vunpack.c.l.bf16 %v591_v41  ;;  %v703_v52 = vunpack.c.h.bf16 %v592_v13 }
 0x120   : > { %7711 = vst [vmem:[#allocation161_spill] sm:$0xff] %v4507_v21  ;;  %v4573_v21 = vsel %vm4531_vm13, %v505_v15, -1e+30 }
 0x121   : > { %7714 = vst [vmem:[#allocation162_spill] sm:$0xff] %v7713_v37  ;;  %v698_v37 = vunpack.c.l.bf16 %v590_v60  ;;  %vm4588_vm13 = vcmp.gt.f32.partialorder %v700_v12, 0.0  ;;  %vm4617_vm0 = vcmp.gt.f32.partialorder %v703_v52, 0.0 }
 0x122   : > { %7715 = vst [vmem:[#allocation163_spill] sm:$0xff] %v4517_v0  ;;  %v699_v0 = vunpack.c.h.bf16 %v590_v60  ;;  %v702_v60 = vunpack.c.l.bf16 %v592_v13 }
 0x123   : > { %7718 = vst [vmem:[#allocation164_spill] sm:$0xff] %v7717_v36  ;;  %v4565_v36 = vsel %vm4524_vm5, %v4389_v28, -1e+30  ;;  %vm4577_vm1 = vcmp.gt.f32.partialorder %v698_v37, 0.0  ;;  %v7730_v28 = vmov 0 }
 0x124   : > { %7721 = vst [vmem:[#allocation165_spill] sm:$0xff] %v7720_v58  ;;  %v1100_v23 = vmax.f32 %v1099_v10, %v4565_v36  ;;  %v7727_v58 = vmov 0  ;;  %vm4581_vm5 = vcmp.gt.f32.partialorder %v699_v0, 0.0  ;;  %v509_v10 = vadd.f32 %v3333_v48, %v4280_v6 }
 0x125   : > { %7724 = vst [vmem:[#allocation166_spill] sm:$0xff] %v7723_v35  ;;  %v7728_v58 = vsel %vm4577_vm1, 4294967295, %v7727_v58  ;;  %v7731_v28 = vsel %vm4581_vm5, 4294967295, %v7730_v28  ;;  %v4595_v37 = vsel %vm4577_vm1, %v4305_v42, -1e+30  ;;  %v7736_v0 = vmov 0  ;;  %v4659_v35 = vpop.permute.xlu1 %406 }
 0x126   : > { %7725 = vst [vmem:[#allocation167_spill] sm:$0xff] %v4538_v40  ;;  %v593_v40 = vld [vmem:[%s3273_s6 + $0x178] sm:$0xff]  ;;  %v1101_v15 = vmax.f32 %v1100_v23, %v4573_v21  ;;  %v4604_v23 = vsel %vm4581_vm5, %v4309_v2, -1e+30  ;;  %v4609_v6 = vsel %vm4588_vm13, %v4335_v4, -1e+30  ;;  %v513_v4 = vadd.f32 %v3333_v48, %v4024_v22 }
 0x127   : > { %7726 = vst [vmem:[#allocation168_spill] sm:$0xff] %v4543_v26  ;;  %v701_v26 = vunpack.c.h.bf16 %v591_v41  ;;  %v7733_v41 = vmov 0  ;;  %v704_v12 = vunpack.c.l.bf16 %v593_v40  ;;  %v1104_v42 = vmax.f32 %v4595_v37, %v4604_v23  ;;  %v594_v2 = vld [vmem:[%s3273_s6 + $0x180] sm:$0xff] }
 0x128   : > { %7729 = vst [vmem:[#allocation169_spill] sm:$0xff] %v7728_v58  ;;  %v7734_v41 = vsel %vm4588_vm13, 4294967295, %v7733_v41  ;;  %1102 = vmax.xlane.f32.xlu1 %v1101_v15  ;;  %v705_v13 = vunpack.c.h.bf16 %v593_v40  ;;  %vm4613_vm1 = vcmp.gt.f32.partialorder %v702_v60, 0.0  ;;  %v7742_v58 = vmov 0 }
 0x129   : > { %7732 = vst [vmem:[#allocation170_spill] sm:$0xff] %v7731_v28  ;;  %vm4597_vm4 = vcmp.gt.f32.partialorder %v701_v26, 0.0  ;;  %v7739_v26 = vmov 0  ;;  %v7743_v58 = vsel %vm4617_vm0, 4294967295, %v7742_v58  ;;  %v595_v28 = vld [vmem:[%s3273_s6 + $0x188] sm:$0xff]  ;;  %vm4625_vm13 = vcmp.gt.f32.partialorder %v704_v12, 0.0 }
 0x12a   : > { %7735 = vst [vmem:[#allocation171_spill] sm:$0xff] %v7734_v41  ;;  %v7737_v0 = vsel %vm4597_vm4, 4294967295, %v7736_v0  ;;  %v7740_v26 = vsel %vm4613_vm1, 4294967295, %v7739_v26  ;;  %v7745_v41 = vmov 0  ;;  %v4632_v40 = vsel %vm4613_vm1, %v4071_v62, -1e+30 }
 0x12b   : > { %7738 = vst [vmem:[#allocation172_spill] sm:$0xff] %v7737_v0  ;;  %v7746_v41 = vsel %vm4625_vm13, 4294967295, %v7745_v41  ;;  %v4637_v60 = vsel %vm4617_vm0, %v4075_v50, -1e+30  ;;  %v4641_v52 = vsel %vm4597_vm4, %v509_v10, -1e+30  ;;  %v1105_v22 = vmax.f32 %v1104_v42, %v4609_v6 }
 0x12c   : > { %7741 = vst [vmem:[#allocation173_spill] sm:$0xff] %v7740_v26  ;;  %vm4644_vm5 = vcmp.gt.f32.partialorder %v705_v13, 0.0  ;;  %v7751_v15 = vmov 0  ;;  %v1109_v62 = vmax.f32 %v4632_v40, %v4637_v60  ;;  %v4653_v12 = vsel %vm4625_vm13, %v4088_v32, -1e+30 }
 0x12d   : > { %7744 = vst [vmem:[#allocation174_spill] sm:$0xff] %v7743_v58  ;;  %v7752_v15 = vsel %vm4644_vm5, 4294967295, %v7751_v15  ;;  %v706_v50 = vunpack.c.l.bf16 %v594_v2  ;;  %v707_v58 = vunpack.c.h.bf16 %v594_v2  ;;  %v708_v0 = vunpack.c.l.bf16 %v595_v28 }
 0x12e   : > { %7747 = vst [vmem:[#allocation175_spill] sm:$0xff] %v7746_v41  ;;  %v1106_v10 = vmax.f32 %v1105_v22, %v4641_v52  ;;  %v1110_v42 = vmax.f32 %v1109_v62, %v4653_v12  ;;  %v517_v13 = vadd.f32 %v3333_v48, %v4410_v29  ;;  %v709_v26 = vunpack.c.h.bf16 %v595_v28  ;;  %v4677_v29 = vpop.permute.xlu0 %401  ;;  %v596_v28 = vld [vmem:[%s3273_s6 + $0x190] sm:$0xff] }
 0x12f   : > { %7748 = vst [vmem:[#allocation176_spill] sm:$0xff] %v4632_v40  ;;  %vm4665_vm13 = vcmp.gt.f32.partialorder %v706_v50, 0.0  ;;  %v7756_v32 = vmov 0  ;;  %vm4669_vm0 = vcmp.gt.f32.partialorder %v707_v58, 0.0  ;;  %v7759_v2 = vmov 0  ;;  %v597_v50 = vld [vmem:[%s3273_s6 + $0x198] sm:$0xff] }
 0x130   : > { %7749 = vst [vmem:[#allocation177_spill] sm:$0xff] %v4637_v60  ;;  %v4663_v60 = vsel %vm4644_vm5, %v513_v4, -1e+30  ;;  %v7757_v32 = vsel %vm4665_vm13, 4294967295, %v7756_v32  ;;  %v7760_v2 = vsel %vm4669_vm0, 4294967295, %v7759_v2  ;;  %vm4673_vm4 = vcmp.gt.f32.partialorder %v708_v0, 0.0  ;;  %1107 = vmax.xlane.f32.xlu2 %v1106_v10 }
 0x131   : > { %7750 = vst [vmem:[#allocation178_spill] sm:$0xff] %v4641_v52  ;;  %v7762_v22 = vmov 0  ;;  %v1111_v4 = vmax.f32 %v1110_v42, %v4663_v60  ;;  %vm4681_vm5 = vcmp.gt.f32.partialorder %v709_v26, 0.0  ;;  %v7765_v62 = vmov 0 }
 0x132   : > { %7753 = vst [vmem:[#allocation179_spill] sm:$0xff] %v7752_v15  ;;  %v7763_v22 = vsel %vm4673_vm4, 4294967295, %v7762_v22  ;;  %v7766_v62 = vsel %vm4681_vm5, 4294967295, %v7765_v62  ;;  %v4688_v58 = vsel %vm4665_vm13, %v4444_v20, -1e+30  ;;  %v4698_v10 = vadd.f32 %v3327_v39, %v4528_v8  ;;  %v598_v15 = vld [vmem:[%s3273_s6 + $0x1a0] sm:$0xff] }
 0x133   : > { %7754 = vst [vmem:[#allocation180_spill] sm:$0xff] %v4653_v12  ;;  %v4693_v0 = vsel %vm4669_vm0, %v4484_v27, -1e+30  ;;  %v4702_v26 = vadd.f32 %v3331_v47, %v4528_v8  ;;  %v4708_v20 = vadd.f32 %v3325_v38, %v4659_v35  ;;  %1112 = vmax.xlane.f32.xlu0 %v1111_v4  ;;  %v4714_v27 = vsel %vm4673_vm4, %v4502_v17, -1e+30 }
 0x134   : > { %7755 = vst [vmem:[#allocation181_spill] sm:$0xff] %v4663_v60  ;;  %v1114_v42 = vmax.f32 %v4688_v58, %v4693_v0  ;;  %v4718_v41 = vsel %vm4681_vm5, %v517_v13, -1e+30  ;;  %v710_v4 = vunpack.c.l.bf16 %v596_v28  ;;  %v711_v12 = vunpack.c.h.bf16 %v596_v28 }
 0x135   : > { %7758 = vst [vmem:[#allocation182_spill] sm:$0xff] %v7757_v32  ;;  %v4726_v32 = vadd.f32 %v3325_v38, %v4677_v29  ;;  %v712_v40 = vunpack.c.l.bf16 %v597_v50  ;;  %v521_v17 = vadd.f32 %v3333_v48, %v4385_v24  ;;  %v714_v13 = vunpack.c.l.bf16 %v598_v15 }
 0x136   : > { %7761 = vst [vmem:[#allocation183_spill] sm:$0xff] %v7760_v2  ;;  %v4722_v2 = vadd.f32 %v3327_v39, %v4659_v35  ;;  %v1115_v60 = vmax.f32 %v1114_v42, %v4714_v27  ;;  %vm4733_vm1 = vcmp.gt.f32.partialorder %v710_v4, 0.0  ;;  %v7770_v52 = vmov 0  ;;  %v601_v4 = vld [vmem:[%s3273_s6 + $0x1b8] sm:$0xff] }
 0x137   : > { %7764 = vst [vmem:[#allocation184_spill] sm:$0xff] %v7763_v22  ;;  %v599_v22 = vld [vmem:[%s3273_s6 + $0x1a8] sm:$0xff]  ;;  %v7771_v52 = vsel %vm4733_vm1, 4294967295, %v7770_v52  ;;  %vm4737_vm5 = vcmp.gt.f32.partialorder %v711_v12, 0.0  ;;  %v7773_v38 = vmov 0  ;;  %vm4741_vm4 = vcmp.gt.f32.partialorder %v712_v40, 0.0 }
 0x138   : > { %7767 = vst [vmem:[#allocation185_spill] sm:$0xff] %v7766_v62  ;;  %v713_v62 = vunpack.c.h.bf16 %v597_v50  ;;  %v7774_v38 = vsel %vm4737_vm5, 4294967295, %v7773_v38  ;;  %v7776_v28 = vmov 0  ;;  %v7779_v24 = vmov 0 }
 0x139   : > { %7768 = vst [vmem:[#allocation186_spill] sm:$0xff] %v4688_v58  ;;  %v1116_v58 = vmax.f32 %v1115_v60, %v4718_v41  ;;  %v7777_v28 = vsel %vm4741_vm4, 4294967295, %v7776_v28  ;;  %v4752_v60 = vsel %vm4733_vm1, %v4404_v11, -1e+30  ;;  %v716_v12 = vunpack.c.l.bf16 %v599_v22  ;;  %v600_v11 = vld [vmem:[%s3273_s6 + $0x1b0] sm:$0xff] }
 0x13a   : > { %7769 = vst [vmem:[#allocation187_spill] sm:$0xff] %v4693_v0  ;;  %v715_v0 = vunpack.c.h.bf16 %v598_v15  ;;  %vm4745_vm0 = vcmp.gt.f32.partialorder %v713_v62, 0.0  ;;  %v4757_v15 = vsel %vm4737_vm5, %v4408_v9, -1e+30  ;;  %v4761_v40 = vadd.f32 %v3327_v39, %v4677_v29 }
 0x13b   : > { %7772 = vst [vmem:[#allocation188_spill] sm:$0xff] %v7771_v52  ;;  %v7780_v24 = vsel %vm4745_vm0, 4294967295, %v7779_v24  ;;  %1117 = vmax.xlane.f32.xlu1 %v1116_v58  ;;  %v1119_v62 = vmax.f32 %v4752_v60, %v4757_v15  ;;  %v525_v50 = vadd.f32 %v3333_v48, %v4111_v1  ;;  %v717_v42 = vunpack.c.h.bf16 %v599_v22  ;;  %v602_v1 = vld [vmem:[%s3273_s6 + $0x1c0] sm:$0xff] }
 0x13c   : > { %7775 = vst [vmem:[#allocation189_spill] sm:$0xff] %v7774_v38  ;;  %v4772_v9 = vsel %vm4741_vm4, %v4429_v56, -1e+30  ;;  %vm4774_vm5 = vcmp.gt.f32.partialorder %v714_v13, 0.0  ;;  %v7783_v58 = vmov 0  ;;  %vm4778_vm1 = vcmp.gt.f32.partialorder %v715_v0, 0.0 }
 0x13d   : > { %7778 = vst [vmem:[#allocation190_spill] sm:$0xff] %v7777_v28  ;;  %v7784_v58 = vsel %vm4774_vm5, 4294967295, %v7783_v58  ;;  %v7786_v39 = vmov 0  ;;  %vm4782_vm13 = vcmp.gt.f32.partialorder %v716_v12, 0.0  ;;  %v7789_v38 = vmov 0 }
 0x13e   : > { %7781 = vst [vmem:[#allocation191_spill] sm:$0xff] %v7780_v24  ;;  %v7787_v39 = vsel %vm4778_vm1, 4294967295, %v7786_v39  ;;  %v7790_v38 = vsel %vm4782_vm13, 4294967295, %v7789_v38  ;;  %v4789_v22 = vsel %vm4745_vm0, %v521_v17, -1e+30  ;;  %v1120_v56 = vmax.f32 %v1119_v62, %v4772_v9 }
 0x13f   : > { %7782 = vst [vmem:[#allocation192_spill] sm:$0xff] %v4772_v9  ;;  %v4795_v0 = vsel %vm4774_vm5, %v4144_v53, -1e+30  ;;  %v4800_v13 = vsel %vm4778_vm1, %v4148_v61, -1e+30  ;;  %vm4802_vm4 = vcmp.gt.f32.partialorder %v717_v42, 0.0  ;;  %v718_v24 = vunpack.c.l.bf16 %v600_v11 }
 0x140   : > { %7785 = vst [vmem:[#allocation193_spill] sm:$0xff] %v7784_v58  ;;  %v7792_v12 = vmov 0  ;;  %v4809_v17 = vsel %vm4782_vm13, %v4152_v19, -1e+30  ;;  %v1124_v62 = vmax.f32 %v4795_v0, %v4800_v13  ;;  %v1121_v53 = vmax.f32 %v1120_v56, %v4789_v22  ;;  %v603_v19 = vld [vmem:[%s3273_s6 + $0x1c8] sm:$0xff]  ;;  %v604_v9 = vld [vmem:[%s3273_s6 + $0x1d0] sm:$0xff] }
 0x141   : > { %7788 = vst [vmem:[#allocation194_spill] sm:$0xff] %v7787_v39  ;;  %v7793_v12 = vsel %vm4802_vm4, 4294967295, %v7792_v12  ;;  %v719_v58 = vunpack.c.h.bf16 %v600_v11  ;;  %v720_v28 = vunpack.c.l.bf16 %v601_v4  ;;  %v721_v39 = vunpack.c.h.bf16 %v601_v4 }
 0x142   : > { %7791 = vst [vmem:[#allocation195_spill] sm:$0xff] %v7790_v38  ;;  %v1125_v61 = vmax.f32 %v1124_v62, %v4809_v17  ;;  %v529_v42 = vadd.f32 %v3333_v48, %v4528_v8  ;;  %vm4817_vm0 = vcmp.gt.f32.partialorder %v718_v24, 0.0  ;;  %v7796_v52 = vmov 0  ;;  %1122 = vmax.xlane.f32.xlu2 %v1121_v53 }
 0x143   : > { %7794 = vst [vmem:[#allocation196_spill] sm:$0xff] %v7793_v12  ;;  %v7797_v52 = vsel %vm4817_vm0, 4294967295, %v7796_v52  ;;  %v722_v38 = vunpack.c.l.bf16 %v602_v1  ;;  %v4825_v56 = vsel %vm4802_vm4, %v525_v50, -1e+30  ;;  %vm4827_vm13 = vcmp.gt.f32.partialorder %v719_v58, 0.0 }
 0x144   : > { %7795 = vst [vmem:[#allocation197_spill] sm:$0xff] %v4809_v17  ;;  %v7800_v11 = vmov 0  ;;  %vm4831_vm1 = vcmp.gt.f32.partialorder %v720_v28, 0.0  ;;  %v7803_v4 = vmov 0  ;;  %v4838_v8 = vsel %vm4817_vm0, %v4569_v31, -1e+30 }
 0x145   : > { %7798 = vst [vmem:[#allocation198_spill] sm:$0xff] %v7797_v52  ;;  %v7801_v11 = vsel %vm4827_vm13, 4294967295, %v7800_v11  ;;  %v7804_v4 = vsel %vm4831_vm1, 4294967295, %v7803_v4  ;;  %v1126_v24 = vmax.f32 %v1125_v61, %v4825_v56  ;;  %vm4841_vm5 = vcmp.gt.f32.partialorder %v721_v39, 0.0  ;;  %v605_v52 = vld [vmem:[%s3273_s6 + $0x1d8] sm:$0xff]  ;;  %v8048_v17 = vld [vmem:[#allocation138_spill] sm:$0xff] }
 0x146   : > { %7799 = vst [vmem:[#allocation199_spill] sm:$0xff] %v4825_v56  ;;  %v7806_v62 = vmov 0  ;;  %v4848_v50 = vsel %vm4827_vm13, %v4698_v10, -1e+30  ;;  %v533_v28 = vadd.f32 %v3333_v48, %v4498_v3  ;;  %v723_v53 = vunpack.c.h.bf16 %v602_v1 }
 0x147   : > { %7802 = vst [vmem:[#allocation200_spill] sm:$0xff] %v7801_v11  ;;  %v7807_v62 = vsel %vm4841_vm5, 4294967295, %v7806_v62  ;;  %v1129_v58 = vmax.f32 %v4838_v8, %v4848_v50  ;;  %v724_v31 = vunpack.c.l.bf16 %v603_v19  ;;  %v725_v12 = vunpack.c.h.bf16 %v603_v19  ;;  %1127 = vmax.xlane.f32.xlu0 %v1126_v24  ;;  %v607_v11 = vld [vmem:[%s3273_s6 + $0x1e8] sm:$0xff] }
 0x148   : > { %7805 = vst [vmem:[#allocation201_spill] sm:$0xff] %v7804_v4  ;;  %v4858_v39 = vsel %vm4831_vm1, %v4702_v26, -1e+30  ;;  %vm4860_vm4 = vcmp.gt.f32.partialorder %v722_v38, 0.0  ;;  %v7809_v10 = vmov 0  ;;  %v726_v3 = vunpack.c.l.bf16 %v604_v9  ;;  %v606_v4 = vld [vmem:[%s3273_s6 + $0x1e0] sm:$0xff] }
 0x149   : > { %7808 = vst [vmem:[#allocation202_spill] sm:$0xff] %v7807_v62  ;;  %v7810_v10 = vsel %vm4860_vm4, 4294967295, %v7809_v10  ;;  %v727_v61 = vunpack.c.h.bf16 %v604_v9  ;;  %v4866_v1 = vsel %vm4841_vm5, %v529_v42, -1e+30  ;;  %v1130_v19 = vmax.f32 %v1129_v58, %v4858_v39 }
 0x14a   : > { %7811 = vst [vmem:[#allocation203_spill] sm:$0xff] %v7810_v10  ;;  %vm4869_vm13 = vcmp.gt.f32.partialorder %v723_v53, 0.0  ;;  %v7812_v24 = vmov 0  ;;  %vm4873_vm1 = vcmp.gt.f32.partialorder %v724_v31, 0.0  ;;  %v7815_v26 = vmov 0 }
 0x14b   : > { %v7813_v24 = vsel %vm4869_vm13, 4294967295, %v7812_v24  ;;  %v7816_v26 = vsel %vm4873_vm1, 4294967295, %v7815_v26  ;;  %vm4877_vm0 = vcmp.gt.f32.partialorder %v725_v12, 0.0  ;;  %v7818_v38 = vmov 0 }
 0x14c   : > { %7814 = vst [vmem:[#allocation204_spill] sm:$0xff] %v7813_v24  ;;  %v7819_v38 = vsel %vm4877_vm0, 4294967295, %v7818_v38  ;;  %v4884_v9 = vsel %vm4860_vm4, %v4547_v45, -1e+30  ;;  %v4889_v42 = vsel %vm4869_vm13, %v4555_v57, -1e+30  ;;  %v728_v58 = vunpack.c.l.bf16 %v605_v52 }
 0x14d   : > { %7817 = vst [vmem:[#allocation205_spill] sm:$0xff] %v7816_v26  ;;  %v1131_v53 = vmax.f32 %v1130_v19, %v4866_v1  ;;  %v1134_v31 = vmax.f32 %v4884_v9, %v4889_v42  ;;  %v537_v12 = vadd.f32 %v3333_v48, %v4197_v7  ;;  %v729_v62 = vunpack.c.h.bf16 %v605_v52  ;;  %v608_v7 = vld [vmem:[%s3273_s6 + $0x1f0] sm:$0xff] }
 0x14e   : > { %7820 = vst [vmem:[#allocation206_spill] sm:$0xff] %v7819_v38  ;;  %v4901_v45 = vsel %vm4873_vm1, %v4559_v55, -1e+30  ;;  %vm4903_vm4 = vcmp.gt.f32.partialorder %v726_v3, 0.0  ;;  %v7824_v57 = vmov 0  ;;  %vm4907_vm13 = vcmp.gt.f32.partialorder %v727_v61, 0.0 }
 0x14f   : > { %7821 = vst [vmem:[#allocation207_spill] sm:$0xff] %v4884_v9  ;;  %v7825_v57 = vsel %vm4903_vm4, 4294967295, %v7824_v57  ;;  %v7827_v19 = vmov 0  ;;  %vm4911_vm5 = vcmp.gt.f32.partialorder %v728_v58, 0.0  ;;  %v7830_v24 = vmov 0  ;;  %1132 = vmax.xlane.f32.xlu1 %v1131_v53 }
 0x150   : > { %7822 = vst [vmem:[#allocation208_spill] sm:$0xff] %v4889_v42  ;;  %v7828_v19 = vsel %vm4907_vm13, 4294967295, %v7827_v19  ;;  %v7831_v24 = vsel %vm4911_vm5, 4294967295, %v7830_v24  ;;  %v4918_v52 = vsel %vm4877_vm0, %v533_v28, -1e+30  ;;  %v1135_v55 = vmax.f32 %v1134_v31, %v4901_v45 }
 0x151   : > { %7823 = vst [vmem:[#allocation209_spill] sm:$0xff] %v4901_v45  ;;  %v4924_v3 = vsel %vm4903_vm4, %v4223_v46, -1e+30  ;;  %v4929_v61 = vsel %vm4907_vm13, %v4227_v34, -1e+30  ;;  %vm4931_vm1 = vcmp.gt.f32.partialorder %v729_v62, 0.0  ;;  %v730_v31 = vunpack.c.l.bf16 %v606_v4 }
 0x152   : > { %7826 = vst [vmem:[#allocation210_spill] sm:$0xff] %v7825_v57  ;;  %v7836_v58 = vmov 0  ;;  %v4938_v28 = vsel %vm4911_vm5, %v4231_v30, -1e+30  ;;  %v1139_v53 = vmax.f32 %v4924_v3, %v4929_v61  ;;  %v1136_v46 = vmax.f32 %v1135_v55, %v4918_v52  ;;  %v609_v30 = vld [vmem:[%s3273_s6 + $0x1f8] sm:$0xff]  ;;  %s3106_s6 = scalar_lea.hbm %s3105_s4, 1024 }
 0x153   : > { %7829 = vst [vmem:[#allocation211_spill] sm:$0xff] %v7828_v19  ;;  %v7837_v58 = vsel %vm4931_vm1, 4294967295, %v7836_v58  ;;  %v731_v38 = vunpack.c.h.bf16 %v606_v4  ;;  %v732_v26 = vunpack.c.l.bf16 %v607_v11  ;;  %v733_v19 = vunpack.c.h.bf16 %v607_v11  ;;  %p3107_p6 = scmp.ne.s32.totalorder %s3105_s4, %s3106_s6  ;;  %p3112_p3 = scmp.lt.s32.totalorder %s3110_s8, %s3106_s6 }
 0x154   : > { %7832 = vst [vmem:[#allocation212_spill] sm:$0xff] %v7831_v24  ;;  %v540_v34 = vadd.f32 %v3331_v47, %v4677_v29  ;;  %v1140_v62 = vmax.f32 %v1139_v53, %v4938_v28  ;;  %vm4946_vm0 = vcmp.gt.f32.partialorder %v730_v31, 0.0  ;;  %v7840_v57 = vmov 0  ;;  %1137 = vmax.xlane.f32.xlu2 %v1136_v46 }
 0x155   : > { %7833 = vst [vmem:[#allocation213_spill] sm:$0xff] %v4918_v52  ;;  %v7841_v57 = vsel %vm4946_vm0, 4294967295, %v7840_v57  ;;  %v734_v24 = vunpack.c.l.bf16 %v608_v7  ;;  %v4953_v10 = vsel %vm4931_vm1, %v537_v12, -1e+30  ;;  %vm4955_vm5 = vcmp.gt.f32.partialorder %v731_v38, 0.0  ;;  %v7954_v52 = vld [vmem:[#allocation105_spill] sm:$0xff]  ;;  %p3108_p13 = pnand %p3107_p6, %p3233_p11  ;;  %p3113_p4 = por %p3112_p3, %p3111_p1 }
 0x156   : > { %7834 = vst [vmem:[#allocation214_spill] sm:$0xff] %v4924_v3  ;;  %v7844_v4 = vmov 0  ;;  %vm4959_vm13 = vcmp.gt.f32.partialorder %v732_v26, 0.0  ;;  %v7847_v11 = vmov 0  ;;  %v4966_v55 = vsel %vm4946_vm0, %v4726_v32, -1e+30 }
 0x157   : > { %7835 = vst [vmem:[#allocation215_spill] sm:$0xff] %v4929_v61  ;;  %v7845_v4 = vsel %vm4955_vm5, 4294967295, %v7844_v4  ;;  %v7848_v11 = vsel %vm4959_vm13, 4294967295, %v7847_v11  ;;  %v1141_v53 = vmax.f32 %v1140_v62, %v4953_v10  ;;  %v541_v31 = vadd.f32 %v3333_v48, %v4677_v29  ;;  %p3109_p0 = pneg %p3108_p13 }
 0x158   : > { %7838 = vst [vmem:[#allocation216_spill] sm:$0xff] %v7837_v58  ;;  %vm4971_vm1 = vcmp.gt.f32.partialorder %v733_v19, 0.0  ;;  %v7851_v12 = vmov 0  ;;  %v4978_v26 = vsel %vm4955_vm5, %v4761_v40, -1e+30  ;;  %v735_v46 = vunpack.c.h.bf16 %v608_v7 }
 0x159   : > { %7839 = vst [vmem:[#allocation217_spill] sm:$0xff] %v4938_v28  ;;  %v7852_v12 = vsel %vm4971_vm1, 4294967295, %v7851_v12  ;;  %v1144_v38 = vmax.f32 %v4966_v55, %v4978_v26  ;;  %v736_v32 = vunpack.c.l.bf16 %v609_v30  ;;  %v737_v58 = vunpack.c.h.bf16 %v609_v30  ;;  %1142 = vmax.xlane.f32.xlu0 %v1141_v53  ;;  %p3114_p7 = pnand %p3113_p4, %p3109_p0 }
 0x15a   : > { %7842 = vst [vmem:[#allocation218_spill] sm:$0xff] %v7841_v57  ;;  %v544_v62 = vadd.f32 %v3331_v47, %v4659_v35  ;;  %v4986_v29 = vsel %vm4959_vm13, %v540_v34, -1e+30  ;;  %vm4988_vm4 = vcmp.gt.f32.partialorder %v734_v24, 0.0  ;;  %v7856_v19 = vmov 0 }
 0x15b   : > { %7843 = vst [vmem:[#allocation219_spill] sm:$0xff] %v4953_v10  ;;  %v7857_v19 = vsel %vm4988_vm4, 4294967295, %v7856_v19  ;;  %v1145_v40 = vmax.f32 %v1144_v38, %v4986_v29  ;;  %vm4993_vm5 = vcmp.gt.f32.partialorder %v735_v46, 0.0  ;;  %vm4997_vm0 = vcmp.gt.f32.partialorder %v736_v32, 0.0  ;;  %v998_v46 = vpop.xlane.xlu2 %997 }
 0x15c   : > { %7846 = vst [vmem:[#allocation220_spill] sm:$0xff] %v7845_v4  ;;  %v7859_v4 = vmov 0  ;;  %v7862_v7 = vmov 0  ;;  %v5003_v47 = vsel %vm4971_vm1, %v541_v31, -1e+30  ;;  %v545_v24 = vadd.f32 %v3333_v48, %v4659_v35 }
 0x15d   : > { %7849 = vst [vmem:[#allocation221_spill] sm:$0xff] %v7848_v11  ;;  %v7860_v4 = vsel %vm4993_vm5, 4294967295, %v7859_v4  ;;  %v7863_v7 = vsel %vm4997_vm0, 4294967295, %v7862_v7  ;;  %v5010_v34 = vsel %vm4988_vm4, %v4708_v20, -1e+30  ;;  %v1146_v53 = vmax.f32 %v1145_v40, %v5003_v47 }
 0x15e   : > { %7850 = vst [vmem:[#allocation222_spill] sm:$0xff] %v4966_v55  ;;  %v5015_v30 = vsel %vm4993_vm5, %v4722_v2, -1e+30  ;;  %vm5018_vm13 = vcmp.gt.f32.partialorder %v737_v58, 0.0  ;;  %v7868_v38 = vmov 0  ;;  %v1008_v58 = vpop.xlane.xlu1 %1007 }
 0x15f   : > { %7853 = vst [vmem:[#allocation223_spill] sm:$0xff] %v7852_v12  ;;  %v7869_v38 = vsel %vm5018_vm13, 4294967295, %v7868_v38  ;;  %v1149_v31 = vmax.f32 %v5010_v34, %v5015_v30  ;;  %v5026_v48 = vsel %vm4997_vm0, %v544_v62, -1e+30  ;;  %1147 = vmax.xlane.f32.xlu1 %v1146_v53  ;;  %v5031_v2 = vsel %vm5018_vm13, %v545_v24, -1e+30 }
 0x160   : > { %7854 = vst [vmem:[#allocation224_spill] sm:$0xff] %v4978_v26  ;;  %v1162_v32 = vsub.f32 %v3603_v44, %v1008_v58  ;;  %v1163_v40 = vsub.f32 %v3626_v59, %v1008_v58  ;;  %v1165_v62 = vsub.f32 %v3676_v18, %v1008_v58  ;;  %v1154_v53 = vsub.f32 %v3630_v49, %v998_v46  ;;  %v1003_v49 = vpop.xlane.xlu0 %1002  ;;  %v7875_v12 = vld [vmem:[#allocation65_spill] sm:$0xff] }
 0x161   : > { %7855 = vst [vmem:[#allocation225_spill] sm:$0xff] %v4986_v29  ;;  %v1150_v35 = vmax.f32 %v1149_v31, %v5026_v48  ;;  %v1155_v31 = vsub.f32 %v3645_v14, %v998_v46  ;;  %v7873_v14 = vld [vmem:[#allocation58_spill] sm:$0xff]  ;;  %v7922_v29 = vld [vmem:[#allocation33_spill] sm:$0xff] }
 0x162   : > { %7858 = vst [vmem:[#allocation226_spill] sm:$0xff] %v7857_v19  ;;  %v1300_v24 = vmul.f32 1.442695, %v1163_v40  ;;  %v1157_v19 = vsub.f32 %v3685_v25, %v998_v46  ;;  %v1282_v44 = vmul.f32 1.442695, %v1154_v53  ;;  %v7874_v40 = vld [vmem:[#allocation59_spill] sm:$0xff] }
 0x163   : > { %7861 = vst [vmem:[#allocation227_spill] sm:$0xff] %v7860_v4  ;;  %v1151_v20 = vmax.f32 %v1150_v35, %v5031_v2  ;;  %v1156_v35 = vsub.f32 %v3669_v54, %v998_v46  ;;  %v1284_v59 = vmul.f32 1.442695, %v1155_v31  ;;  %v7878_v53 = vld [vmem:[#allocation61_spill] sm:$0xff] }
 0x164   : > { %7864 = vst [vmem:[#allocation228_spill] sm:$0xff] %v7863_v7  ;;  %v1164_v7 = vsub.f32 %v3655_v43, %v1008_v58  ;;  %v1288_v18 = vmul.f32 1.442695, %v1157_v19  ;;  %v1013_v58 = vpop.xlane.xlu2 %1012  ;;  %v1159_v31 = vsub.f32 %v7878_v53, %v1003_v49 }
 0x165   : > { %7865 = vst [vmem:[#allocation229_spill] sm:$0xff] %v5003_v47  ;;  %1152 = vmax.xlane.f32.xlu2 %v1151_v20  ;;  %v1304_v20 = vmul.f32 1.442695, %v1165_v62  ;;  %v1286_v43 = vmul.f32 1.442695, %v1156_v35  ;;  %v1168_v54 = vsub.f32 %v7875_v12, %v1013_v58  ;;  %v7876_v62 = vld [vmem:[#allocation68_spill] sm:$0xff] }
 0x166   : > { %7866 = vst [vmem:[#allocation230_spill] sm:$0xff] %v5010_v34  ;;  %v1302_v4 = vmul.f32 1.442695, %v1164_v7  ;;  %v1167_v7 = vsub.f32 %v7874_v40, %v1013_v58  ;;  %v1169_v25 = vsub.f32 %v7876_v62, %v1013_v58  ;;  %v7880_v40 = vld [vmem:[#allocation69_spill] sm:$0xff] }
 0x167   : > { %7867 = vst [vmem:[#allocation231_spill] sm:$0xff] %v5015_v30  ;;  %v1310_v35 = vmul.f32 1.442695, %v1168_v54  ;;  %v1161_v57 = vsub.f32 %v7880_v40, %v1003_v49  ;;  %v7896_v40 = vld [vmem:[#allocation18_spill] sm:$0xff] }
 0x168   : > { %7870 = vst [vmem:[#allocation232_spill] sm:$0xff] %v7869_v38  ;;  %v1298_v38 = vmul.f32 1.442695, %v1162_v32  ;;  %v1166_v32 = vsub.f32 %v7873_v14, %v1013_v58  ;;  %v1308_v19 = vmul.f32 1.442695, %v1167_v7  ;;  %v7879_v14 = vld [vmem:[#allocation67_spill] sm:$0xff] }
 0x169   : > { %7871 = vst [vmem:[#allocation233_spill] sm:$0xff] %v5026_v48  ;;  %v1160_v11 = vsub.f32 %v7879_v14, %v1003_v49  ;;  %v7881_v58 = vld [vmem:[#allocation25_spill] sm:$0xff] }
 0x16a   : > { %7872 = vst [vmem:[#allocation234_spill] sm:$0xff] %v5031_v2  ;;  %2740 = vpow2.f32 %v1298_v38  ;;  %v7877_v38 = vld [vmem:[#allocation60_spill] sm:$0xff]  ;;  %vm7882_vm13 = vnez %v7881_v58 }
 0x16b   : > { %2742 = vpow2.f32 %v1300_v24  ;;  %v1158_v46 = vsub.f32 %v7877_v38, %v1003_v49  ;;  %v1306_v24 = vmul.f32 1.442695, %v1166_v32  ;;  %v7884_v32 = vld [vmem:[#allocation27_spill] sm:$0xff]  ;;  %v1294_v54 = vmul.f32 1.442695, %v1160_v11  ;;  %v7897_v58 = vld [vmem:[#allocation24_spill] sm:$0xff] }
 0x16c   : > { %2744 = vpow2.f32 %v1302_v4  ;;  %vm7885_vm0 = vnez %v7884_v32  ;;  %v1028_v32 = vpop.xlane.xlu1 %1027 }
 0x16d   : > { %2746 = vpow2.f32 %v1304_v20 }
 0x16e   : > { %2748 = vpow2.f32 %v1282_v44  ;;  %v1312_v44 = vmul.f32 1.442695, %v1169_v25  ;;  %v1296_v25 = vmul.f32 1.442695, %v1161_v57  ;;  %v7895_v57 = vld [vmem:[#allocation17_spill] sm:$0xff] }
 0x16f   : > { %2750 = vpow2.f32 %v1284_v59  ;;  %v1290_v59 = vmul.f32 1.442695, %v1158_v46 }
 0x170   : > { %v2741_v4 = vpop.eup %2740  ;;  %2752 = vpow2.f32 %v1286_v43  ;;  %v1292_v43 = vmul.f32 1.442695, %v1159_v31 }
 0x171   : > { %v2743_v20 = vpop.eup %2742  ;;  %2754 = vpow2.f32 %v1288_v18  ;;  %v5052_v62 = vsel %vm7882_vm13, %v2741_v4, 0.0  ;;  %v7889_v4 = vld [vmem:[#allocation34_spill] sm:$0xff] }
 0x172   : > { %v2745_v12 = vpop.eup %2744  ;;  %2756 = vpow2.f32 %v1306_v24  ;;  %7883 = vst [vmem:[#allocation58_spill] sm:$0xff] %v5052_v62  ;;  %v5056_v7 = vsel %vm7885_vm0, %v2743_v20, 0.0  ;;  %v1018_v24 = vpop.xlane.xlu2 %1017  ;;  %vm7890_vm13 = vnez %v7889_v4  ;;  %v7898_v4 = vld [vmem:[#allocation75_spill] sm:$0xff] }
 0x173   : > { %v2747_v38 = vpop.eup %2746  ;;  %2758 = vpow2.f32 %v1308_v19  ;;  %7886 = vst [vmem:[#allocation59_spill] sm:$0xff] %v5056_v7  ;;  %v5060_v49 = vsel %vm3486_vm6, %v2745_v12, 0.0  ;;  %v1676_v31 = vadd.f32 %v5056_v7, %v5052_v62  ;;  %v7892_v19 = vld [vmem:[#allocation28_spill] sm:$0xff]  ;;  %v1171_v12 = vsub.f32 %v7896_v40, %v1018_v24 }
 0x174   : > { %v2749_v18 = vpop.eup %2748  ;;  %2760 = vpow2.f32 %v1310_v35  ;;  %7888 = vst [vmem:[#allocation65_spill] sm:$0xff] %v5060_v49  ;;  %v5064_v14 = vsel %vm7890_vm13, %v2747_v38, 0.0  ;;  %vm7893_vm0 = vnez %v7892_v19  ;;  %v1170_v35 = vsub.f32 %v7895_v57, %v1018_v24  ;;  %v7899_v7 = vld [vmem:[#allocation76_spill] sm:$0xff]  ;;  %v1023_v19 = vpop.xlane.xlu0 %1022 }
 0x175   : > { %v2751_v46 = vpop.eup %2750  ;;  %2762 = vpow2.f32 %v1312_v44  ;;  %7891 = vst [vmem:[#allocation68_spill] sm:$0xff] %v5064_v14  ;;  %v5070_v20 = vsel %vm7893_vm0, %v2749_v18, 0.0  ;;  %v1172_v44 = vsub.f32 %v7897_v58, %v1018_v24  ;;  %v1173_v38 = vsub.f32 %v3494_v5, %v1018_v24  ;;  %v7900_v58 = vld [vmem:[#allocation82_spill] sm:$0xff] }
 0x176   : > { %7894 = vst [vmem:[#allocation60_spill] sm:$0xff] %v5070_v20  ;;  %v2753_v11 = vpop.eup %2752  ;;  %2764 = vpow2.f32 %v1290_v59  ;;  %v1178_v2 = vsub.f32 %v7898_v4, %v1028_v32  ;;  %v1179_v62 = vsub.f32 %v7899_v7, %v1028_v32  ;;  %v1314_v59 = vmul.f32 1.442695, %v1170_v35  ;;  %v7901_v4 = vld [vmem:[#allocation20_spill] sm:$0xff] }
 0x177   : > { %v2755_v53 = vpop.eup %2754  ;;  %2766 = vpow2.f32 %v1292_v43  ;;  %v1316_v48 = vmul.f32 1.442695, %v1171_v12  ;;  %v1318_v57 = vmul.f32 1.442695, %v1172_v44  ;;  %v1320_v40 = vmul.f32 1.442695, %v1173_v38 }
 0x178   : > { %v5078_v18 = vpop.eup %2756  ;;  %2768 = vpow2.f32 %v1294_v54  ;;  %v1180_v34 = vsub.f32 %v7900_v58, %v1028_v32  ;;  %v1181_v43 = vsub.f32 %v3930_v51, %v1028_v32  ;;  %v1330_v24 = vmul.f32 1.442695, %v1178_v2  ;;  %v7902_v12 = vld [vmem:[#allocation21_spill] sm:$0xff]  ;;  %v7903_v38 = vld [vmem:[#allocation26_spill] sm:$0xff] }
 0x179   : > { %v5080_v30 = vpop.eup %2758  ;;  %2770 = vpow2.f32 %v1296_v25  ;;  %v1332_v7 = vmul.f32 1.442695, %v1179_v62  ;;  %v1174_v10 = vsub.f32 %v7901_v4, %v1023_v19  ;;  %v1175_v44 = vsub.f32 %v7902_v12, %v1023_v19  ;;  %v7904_v4 = vld [vmem:[#allocation29_spill] sm:$0xff] }
 0x17a   : > { %v5084_v5 = vpop.eup %2760  ;;  %2772 = vpow2.f32 %v1314_v59  ;;  %v1334_v54 = vmul.f32 1.442695, %v1180_v34  ;;  %v1336_v35 = vmul.f32 1.442695, %v1181_v43  ;;  %v1176_v58 = vsub.f32 %v7903_v38, %v1023_v19  ;;  %v7907_v38 = vld [vmem:[#allocation31_spill] sm:$0xff] }
 0x17b   : > { %v5087_v28 = vpop.eup %2762  ;;  %2774 = vpow2.f32 %v1316_v48  ;;  %v1177_v51 = vsub.f32 %v3530_v33, %v1023_v19  ;;  %v1322_v32 = vmul.f32 1.442695, %v1174_v10  ;;  %v1324_v2 = vmul.f32 1.442695, %v1175_v44  ;;  %v1033_v48 = vpop.xlane.xlu2 %1032 }
 0x17c   : > { %v5090_v25 = vpop.eup %2764  ;;  %2776 = vpow2.f32 %v1318_v57  ;;  %v1677_v62 = vadd.f32 %v1676_v31, %v5060_v49  ;;  %vm7905_vm6 = vnez %v7904_v4  ;;  %v1326_v57 = vmul.f32 1.442695, %v1176_v58  ;;  %v1043_v10 = vpop.xlane.xlu1 %1042  ;;  %v7913_v58 = vld [vmem:[#allocation77_spill] sm:$0xff] }
 0x17d   : > { %v5094_v59 = vpop.eup %2766  ;;  %2778 = vpow2.f32 %v1320_v40  ;;  %v5099_v34 = vsel %vm7905_vm6, %v2751_v46, 0.0  ;;  %v1328_v12 = vmul.f32 1.442695, %v1177_v51  ;;  %vm7908_vm13 = vnez %v7907_v38  ;;  %v7910_v40 = vld [vmem:[#allocation35_spill] sm:$0xff]  ;;  %v1038_v3 = vpop.xlane.xlu0 %1037 }
 0x17e   : > { %7906 = vst [vmem:[#allocation61_spill] sm:$0xff] %v5099_v34  ;;  %v5101_v43 = vpop.eup %2768  ;;  %2780 = vpow2.f32 %v1330_v24  ;;  %v5105_v33 = vsel %vm7908_vm13, %v2753_v11, 0.0  ;;  %v1678_v31 = vadd.f32 %v1677_v62, %v5064_v14  ;;  %vm7911_vm0 = vnez %v7910_v40  ;;  %v7914_v11 = vld [vmem:[#allocation81_spill] sm:$0xff]  ;;  %v7915_v38 = vld [vmem:[#allocation83_spill] sm:$0xff]  ;;  %v7917_v40 = vld [vmem:[#allocation88_spill] sm:$0xff] }
 0x17f   : > { %7909 = vst [vmem:[#allocation67_spill] sm:$0xff] %v5105_v33  ;;  %v5107_v19 = vpop.eup %2770  ;;  %2782 = vpow2.f32 %v1332_v7  ;;  %v5112_v46 = vsel %vm7911_vm0, %v2755_v53, 0.0  ;;  %v1666_v44 = vadd.f32 %v5099_v34, %v5070_v20  ;;  %v1182_v51 = vsub.f32 %v7913_v58, %v1033_v48  ;;  %v7916_v53 = vld [vmem:[#allocation84_spill] sm:$0xff] }
 0x180   : > { %7912 = vst [vmem:[#allocation69_spill] sm:$0xff] %v5112_v46  ;;  %v5116_v24 = vpop.eup %2772  ;;  %2784 = vpow2.f32 %v1334_v54  ;;  %v1183_v4 = vsub.f32 %v7914_v11, %v1033_v48  ;;  %v1184_v49 = vsub.f32 %v7915_v38, %v1033_v48  ;;  %1679 = vadd.xlane.f32.xlu2 %v1678_v31  ;;  %v1185_v62 = vsub.f32 %v7916_v53, %v1033_v48  ;;  %v7918_v31 = vld [vmem:[#allocation89_spill] sm:$0xff] }
 0x181   : > { %v5121_v61 = vpop.eup %2774  ;;  %2786 = vpow2.f32 %v1336_v35  ;;  %v1667_v7 = vadd.f32 %v1666_v44, %v5105_v33  ;;  %v1190_v14 = vsub.f32 %v7917_v40, %v1043_v10  ;;  %v1338_v54 = vmul.f32 1.442695, %v1182_v51  ;;  %v7919_v48 = vld [vmem:[#allocation93_spill] sm:$0xff]  ;;  %v7920_v40 = vld [vmem:[#allocation94_spill] sm:$0xff] }
 0x182   : > { %v5126_v34 = vpop.eup %2776  ;;  %2788 = vpow2.f32 %v1322_v32  ;;  %v1340_v20 = vmul.f32 1.442695, %v1183_v4  ;;  %v1342_v58 = vmul.f32 1.442695, %v1184_v49  ;;  %v1344_v35 = vmul.f32 1.442695, %v1185_v62 }
 0x183   : > { %v5128_v11 = vpop.eup %2778  ;;  %2790 = vpow2.f32 %v1324_v2  ;;  %v1668_v38 = vadd.f32 %v1667_v7, %v5112_v46  ;;  %v1191_v47 = vsub.f32 %v7918_v31, %v1043_v10  ;;  %v1192_v53 = vsub.f32 %v7919_v48, %v1043_v10  ;;  %v7921_v4 = vld [vmem:[#allocation32_spill] sm:$0xff] }
 0x184   : > { %v5132_v44 = vpop.eup %2780  ;;  %2792 = vpow2.f32 %v1326_v57  ;;  %v1193_v33 = vsub.f32 %v7920_v40, %v1043_v10  ;;  %v1354_v32 = vmul.f32 1.442695, %v1190_v14  ;;  %v1186_v2 = vsub.f32 %v7921_v4, %v1038_v3  ;;  %v7923_v57 = vld [vmem:[#allocation38_spill] sm:$0xff]  ;;  %v7924_v14 = vld [vmem:[#allocation39_spill] sm:$0xff]  ;;  %v1058_v55 = vpop.xlane.xlu1 %1057 }
 0x185   : > { %v5136_v51 = vpop.eup %2782  ;;  %2794 = vpow2.f32 %v1328_v12  ;;  %1669 = vadd.xlane.f32.xlu0 %v1668_v38  ;;  %v1356_v49 = vmul.f32 1.442695, %v1191_v47  ;;  %v1187_v7 = vsub.f32 %v7922_v29, %v1038_v3  ;;  %v1358_v31 = vmul.f32 1.442695, %v1192_v53  ;;  %v7945_v29 = vld [vmem:[#allocation49_spill] sm:$0xff] }
 0x186   : > { %v5140_v62 = vpop.eup %2784  ;;  %2796 = vpow2.f32 %v1338_v54  ;;  %v1360_v46 = vmul.f32 1.442695, %v1193_v33  ;;  %v1188_v26 = vsub.f32 %v7923_v57, %v1038_v3  ;;  %v1189_v10 = vsub.f32 %v7924_v14, %v1038_v3  ;;  %v7927_v33 = vld [vmem:[#allocation42_spill] sm:$0xff] }
 0x187   : > { %v5143_v48 = vpop.eup %2786  ;;  %2798 = vpow2.f32 %v1340_v20  ;;  %v1346_v40 = vmul.f32 1.442695, %v1186_v2  ;;  %v1348_v12 = vmul.f32 1.442695, %v1187_v7  ;;  %v5151_v4 = vsel %vm3577_vm2, %v5078_v18, 0.0  ;;  %v7930_v20 = vld [vmem:[#allocation45_spill] sm:$0xff]  ;;  %v1048_v18 = vpop.xlane.xlu2 %1047 }
 0x188   : > { %v5146_v38 = vpop.eup %2788  ;;  %2800 = vpow2.f32 %v1342_v58  ;;  %v1350_v47 = vmul.f32 1.442695, %v1188_v26  ;;  %7926 = vst [vmem:[#allocation25_spill] sm:$0xff] %v5151_v4  ;;  %vm7928_vm6 = vnez %v7927_v33  ;;  %v1352_v3 = vmul.f32 1.442695, %v1189_v10  ;;  %v7933_v26 = vld [vmem:[#allocation48_spill] sm:$0xff] }
 0x189   : > { %v5156_v54 = vsel %vm7928_vm6, %v5080_v30, 0.0  ;;  %v5158_v53 = vpop.eup %2790  ;;  %2802 = vpow2.f32 %v1344_v35  ;;  %vm7931_vm13 = vnez %v7930_v20  ;;  %vm7934_vm0 = vnez %v7933_v26  ;;  %v7936_v35 = vld [vmem:[#allocation43_spill] sm:$0xff]  ;;  %v7948_v26 = vld [vmem:[#allocation90_spill] sm:$0xff] }
 0x18a   : > { %7929 = vst [vmem:[#allocation27_spill] sm:$0xff] %v5156_v54  ;;  %v5163_v2 = vsel %vm7931_vm13, %v5084_v5, 0.0  ;;  %v5168_v58 = vsel %vm7934_vm0, %v5087_v28, 0.0  ;;  %v5170_v7 = vpop.eup %2792  ;;  %2804 = vpow2.f32 %v1354_v32  ;;  %v1681_v30 = vadd.f32 %v5156_v54, %v5151_v4  ;;  %v7939_v5 = vld [vmem:[#allocation44_spill] sm:$0xff]  ;;  %v7942_v28 = vld [vmem:[#allocation47_spill] sm:$0xff] }
 0x18b   : > { %7932 = vst [vmem:[#allocation30_spill] sm:$0xff] %v5163_v2  ;;  %vm7937_vm2 = vnez %v7936_v35  ;;  %vm7940_vm6 = vnez %v7939_v5  ;;  %v5184_v10 = vpop.eup %2794  ;;  %2806 = vpow2.f32 %v1356_v49  ;;  %vm7943_vm13 = vnez %v7942_v28  ;;  %v7949_v35 = vld [vmem:[#allocation92_spill] sm:$0xff] }
 0x18c   : > { %7935 = vst [vmem:[#allocation34_spill] sm:$0xff] %v5168_v58  ;;  %v5177_v57 = vsel %vm7937_vm2, %v5090_v25, 0.0  ;;  %v5182_v14 = vsel %vm7940_vm6, %v5094_v59, 0.0  ;;  %v5189_v32 = vsel %vm7943_vm13, %v5101_v43, 0.0  ;;  %vm7946_vm0 = vnez %v7945_v29  ;;  %v5198_v20 = vpop.eup %2796  ;;  %v7950_v29 = vld [vmem:[#allocation95_spill] sm:$0xff]  ;;  %v7951_v54 = vld [vmem:[#allocation96_spill] sm:$0xff] }
 0x18d   : > { %7938 = vst [vmem:[#allocation28_spill] sm:$0xff] %v5177_v57  ;;  %v5194_v33 = vsel %vm7946_vm0, %v5107_v19, 0.0  ;;  %v1671_v25 = vadd.f32 %v5182_v14, %v5177_v57  ;;  %2808 = vpow2.f32 %v1358_v31  ;;  %v1682_v59 = vadd.f32 %v1681_v30, %v5163_v2  ;;  %v5203_v28 = vpop.eup %2798 }
 0x18e   : > { %7941 = vst [vmem:[#allocation17_spill] sm:$0xff] %v5182_v14  ;;  %v1194_v49 = vsub.f32 %v7948_v26, %v1048_v18  ;;  %v1195_v5 = vsub.f32 %v7949_v35, %v1048_v18  ;;  %2810 = vpow2.f32 %v1360_v46  ;;  %v1196_v19 = vsub.f32 %v7950_v29, %v1048_v18  ;;  %v5208_v14 = vpop.eup %2800  ;;  %v1053_v26 = vpop.xlane.xlu0 %1052  ;;  %v7953_v29 = vld [vmem:[#allocation102_spill] sm:$0xff] }
 0x18f   : > { %7944 = vst [vmem:[#allocation18_spill] sm:$0xff] %v5189_v32  ;;  %v1672_v43 = vadd.f32 %v1671_v25, %v5189_v32  ;;  %v1197_v4 = vsub.f32 %v7951_v54, %v1048_v18  ;;  %2812 = vpow2.f32 %v1346_v40  ;;  %v1683_v31 = vadd.f32 %v1682_v59, %v5168_v58  ;;  %v5211_v57 = vpop.eup %2802  ;;  %v7952_v54 = vld [vmem:[#allocation101_spill] sm:$0xff] }
 0x190   : > { %7947 = vst [vmem:[#allocation24_spill] sm:$0xff] %v5194_v33  ;;  %v1362_v30 = vmul.f32 1.442695, %v1194_v49  ;;  %v1364_v2 = vmul.f32 1.442695, %v1195_v5  ;;  %2814 = vpow2.f32 %v1348_v12  ;;  %v5214_v32 = vpop.eup %2804  ;;  %v1202_v18 = vsub.f32 %v7952_v54, %v1058_v55  ;;  %v7955_v5 = vld [vmem:[#allocation106_spill] sm:$0xff] }
 0x191   : > { %v1673_v46 = vadd.f32 %v1672_v43, %v5194_v33  ;;  %v1366_v35 = vmul.f32 1.442695, %v1196_v19  ;;  %v1368_v25 = vmul.f32 1.442695, %v1197_v4  ;;  %2816 = vpow2.f32 %v1350_v47  ;;  %1684 = vadd.xlane.f32.xlu0 %v1683_v31  ;;  %v5219_v49 = vpop.eup %2806  ;;  %v7956_v58 = vld [vmem:[#allocation53_spill] sm:$0xff]  ;;  %v7957_v19 = vld [vmem:[#allocation54_spill] sm:$0xff] }
 0x192   : > { %v1203_v40 = vsub.f32 %v7953_v29, %v1058_v55  ;;  %v1204_v59 = vsub.f32 %v7954_v52, %v1058_v55  ;;  %2818 = vpow2.f32 %v1352_v3  ;;  %v1205_v12 = vsub.f32 %v7955_v5, %v1058_v55  ;;  %v7958_v29 = vld [vmem:[#allocation57_spill] sm:$0xff]  ;;  %v7959_v3 = vld [vmem:[#allocation66_spill] sm:$0xff] }
 0x193   : > { %1674 = vadd.xlane.f32.xlu1 %v1673_v46  ;;  %v1198_v43 = vsub.f32 %v7956_v58, %v1053_v26  ;;  %v1199_v4 = vsub.f32 %v7957_v19, %v1053_v26  ;;  %v5224_v33 = vpop.eup %2808  ;;  %2820 = vpow2.f32 %v1362_v30  ;;  %v1378_v47 = vmul.f32 1.442695, %v1202_v18  ;;  %v7960_v5 = vld [vmem:[#allocation50_spill] sm:$0xff] }
 0x194   : > { %v1380_v31 = vmul.f32 1.442695, %v1203_v40  ;;  %v1382_v54 = vmul.f32 1.442695, %v1204_v59  ;;  %v5226_v45 = vpop.eup %2810  ;;  %2822 = vpow2.f32 %v1364_v2  ;;  %v1384_v52 = vmul.f32 1.442695, %v1205_v12 }
 0x195   : > { %v1200_v42 = vsub.f32 %v7958_v29, %v1053_v26  ;;  %v1201_v46 = vsub.f32 %v7959_v3, %v1053_v26  ;;  %v5230_v9 = vpop.eup %2812  ;;  %2824 = vpow2.f32 %v1366_v35  ;;  %v1370_v55 = vmul.f32 1.442695, %v1198_v43  ;;  %v7963_v59 = vld [vmem:[#allocation51_spill] sm:$0xff]  ;;  %v7976_v29 = vld [vmem:[#allocation10_spill] sm:$0xff] }
 0x196   : > { %v1372_v58 = vmul.f32 1.442695, %v1199_v4  ;;  %vm7961_vm2 = vnez %v7960_v5  ;;  %v5237_v18 = vpop.eup %2814  ;;  %2826 = vpow2.f32 %v1368_v25  ;;  %vm7964_vm6 = vnez %v7963_v59 }
 0x197   : > { %v5235_v30 = vsel %vm7961_vm2, %v5132_v44, 0.0  ;;  %v1374_v40 = vmul.f32 1.442695, %v1200_v42  ;;  %v1376_v2 = vmul.f32 1.442695, %v1201_v46  ;;  %v5242_v12 = vsel %vm7964_vm6, %v5136_v51, 0.0  ;;  %v5244_v26 = vpop.eup %2816 }
 0x198   : > { %7962 = vst [vmem:[#allocation75_spill] sm:$0xff] %v5235_v30  ;;  %2828 = vpow2.f32 %v1378_v47  ;;  %v5249_v43 = vsel %vm3726_vm7, %v5140_v62, 0.0  ;;  %v5254_v19 = vsel %vm3761_vm9, %v5143_v48, 0.0  ;;  %v1696_v42 = vadd.f32 %v5242_v12, %v5235_v30  ;;  %v5258_v25 = vpop.eup %2818  ;;  %v7970_v51 = vld [vmem:[#allocation8_spill] sm:$0xff]  ;;  %v7973_v47 = vld [vmem:[#allocation9_spill] sm:$0xff] }
 0x199   : > { %7965 = vst [vmem:[#allocation76_spill] sm:$0xff] %v5242_v12  ;;  %2830 = vpow2.f32 %v1380_v31  ;;  %vm7971_vm13 = vnez %v7970_v51  ;;  %vm7974_vm7 = vnez %v7973_v47  ;;  %vm7977_vm9 = vnez %v7976_v29  ;;  %v5275_v3 = vpop.eup %2820  ;;  %v7979_v46 = vld [vmem:[#allocation13_spill] sm:$0xff] }
 0x19a   : > { %7967 = vst [vmem:[#allocation82_spill] sm:$0xff] %v5249_v43  ;;  %v5263_v4 = vsel %vm7971_vm13, %v5116_v24, 0.0  ;;  %v5268_v62 = vsel %vm7974_vm7, %v5121_v61, 0.0  ;;  %v5273_v48 = vsel %vm7977_vm9, %v5126_v34, 0.0  ;;  %2832 = vpow2.f32 %v1382_v54  ;;  %v1063_v61 = vpop.xlane.xlu2 %1062  ;;  %v5285_v59 = vpop.eup %2822  ;;  %v7982_v34 = vld [vmem:[#allocation11_spill] sm:$0xff]  ;;  %v7985_v54 = vld [vmem:[#allocation12_spill] sm:$0xff] }
 0x19b   : > { %7969 = vst [vmem:[#allocation20_spill] sm:$0xff] %v5254_v19  ;;  %v1697_v31 = vadd.f32 %v1696_v42, %v5249_v43  ;;  %vm7980_vm0 = vnez %v7979_v46  ;;  %v1686_v5 = vadd.f32 %v5268_v62, %v5263_v4  ;;  %2834 = vpow2.f32 %v1384_v52  ;;  %v5302_v51 = vpop.eup %2824 }
 0x19c   : > { %7972 = vst [vmem:[#allocation21_spill] sm:$0xff] %v5263_v4  ;;  %v5281_v24 = vsel %vm7980_vm0, %v5128_v11, 0.0  ;;  %vm7983_vm2 = vnez %v7982_v34  ;;  %vm7986_vm6 = vnez %v7985_v54  ;;  %v7988_v11 = vld [vmem:[#allocation14_spill] sm:$0xff]  ;;  %2836 = vpow2.f32 %v1370_v55  ;;  %v5311_v46 = vpop.eup %2826  ;;  %v7995_v54 = vld [vmem:[#allocation104_spill] sm:$0xff]  ;;  %v1073_v55 = vpop.xlane.xlu1 %1072 }
 0x19d   : > { %7975 = vst [vmem:[#allocation26_spill] sm:$0xff] %v5268_v62  ;;  %v5290_v35 = vsel %vm7983_vm2, %v5146_v38, 0.0  ;;  %v5295_v44 = vsel %vm7986_vm6, %v5158_v53, 0.0  ;;  %vm7989_vm13 = vnez %v7988_v11  ;;  %v1698_v52 = vadd.f32 %v1697_v31, %v5254_v19  ;;  %v7991_v38 = vld [vmem:[#allocation15_spill] sm:$0xff]  ;;  %v8003_v4 = vld [vmem:[#allocation114_spill] sm:$0xff] }
 0x19e   : > { %7978 = vst [vmem:[#allocation29_spill] sm:$0xff] %v5273_v48  ;;  %v5300_v42 = vsel %vm7989_vm13, %v5170_v7, 0.0  ;;  %v1687_v47 = vadd.f32 %v1686_v5, %v5273_v48  ;;  %vm7992_vm7 = vnez %v7991_v38  ;;  %2838 = vpow2.f32 %v1372_v58  ;;  %v7994_v7 = vld [vmem:[#allocation103_spill] sm:$0xff]  ;;  %v5317_v43 = vpop.eup %2828  ;;  %v7996_v5 = vld [vmem:[#allocation109_spill] sm:$0xff]  ;;  %v7997_v38 = vld [vmem:[#allocation110_spill] sm:$0xff] }
 0x19f   : > { %7981 = vst [vmem:[#allocation31_spill] sm:$0xff] %v5281_v24  ;;  %v5309_v29 = vsel %vm7992_vm7, %v5184_v10, 0.0  ;;  %v1691_v53 = vadd.f32 %v5295_v44, %v5290_v35  ;;  %v1206_v34 = vsub.f32 %v7994_v7, %v1063_v61  ;;  %v1207_v11 = vsub.f32 %v7995_v54, %v1063_v61  ;;  %1699 = vadd.xlane.f32.xlu0 %v1698_v52  ;;  %v5322_v12 = vpop.eup %2830  ;;  %v7998_v52 = vld [vmem:[#allocation121_spill] sm:$0xff] }
 0x1a0   : > { %7984 = vst [vmem:[#allocation35_spill] sm:$0xff] %v5290_v35  ;;  %2840 = vpow2.f32 %v1374_v40  ;;  %v1688_v31 = vadd.f32 %v1687_v47, %v5281_v24  ;;  %v1208_v10 = vsub.f32 %v7996_v5, %v1063_v61  ;;  %v1209_v19 = vsub.f32 %v7997_v38, %v1063_v61  ;;  %v5325_v54 = vpop.eup %2832  ;;  %v7999_v47 = vld [vmem:[#allocation122_spill] sm:$0xff] }
 0x1a1   : > { %7987 = vst [vmem:[#allocation77_spill] sm:$0xff] %v5295_v44  ;;  %2842 = vpow2.f32 %v1376_v2  ;;  %v1692_v58 = vadd.f32 %v1691_v53, %v5300_v42  ;;  %v1386_v30 = vmul.f32 1.442695, %v1206_v34  ;;  %v1388_v7 = vmul.f32 1.442695, %v1207_v11  ;;  %v1068_v44 = vpop.xlane.xlu0 %1067  ;;  %v5329_v5 = vpop.eup %2834  ;;  %v8000_v2 = vld [vmem:[#allocation123_spill] sm:$0xff] }
 0x1a2   : > { %7990 = vst [vmem:[#allocation81_spill] sm:$0xff] %v5300_v42  ;;  %1689 = vadd.xlane.f32.xlu1 %v1688_v31  ;;  %v1390_v35 = vmul.f32 1.442695, %v1208_v10  ;;  %v1392_v40 = vmul.f32 1.442695, %v1209_v19  ;;  %v1214_v48 = vsub.f32 %v7998_v52, %v1073_v55  ;;  %v1215_v24 = vsub.f32 %v7999_v47, %v1073_v55  ;;  %v8001_v53 = vld [vmem:[#allocation124_spill] sm:$0xff]  ;;  %v5334_v11 = vpop.eup %2836 }
 0x1a3   : > { %7993 = vst [vmem:[#allocation83_spill] sm:$0xff] %v5309_v29  ;;  %v1693_v61 = vadd.f32 %v1692_v58, %v5309_v29  ;;  %2844 = vpow2.f32 %v1386_v30  ;;  %v1216_v38 = vsub.f32 %v8000_v2, %v1073_v55  ;;  %v1217_v34 = vsub.f32 %v8001_v53, %v1073_v55  ;;  %v8002_v10 = vld [vmem:[#allocation113_spill] sm:$0xff]  ;;  %v8004_v2 = vld [vmem:[#allocation115_spill] sm:$0xff] }
 0x1a4   : > { %2846 = vpow2.f32 %v1388_v7  ;;  %v1402_v42 = vmul.f32 1.442695, %v1214_v48  ;;  %v1404_v31 = vmul.f32 1.442695, %v1215_v24  ;;  %v1210_v19 = vsub.f32 %v8002_v10, %v1068_v44  ;;  %v5337_v62 = vpop.eup %2838  ;;  %v8005_v53 = vld [vmem:[#allocation117_spill] sm:$0xff] }
 0x1a5   : > { %1694 = vadd.xlane.f32.xlu2 %v1693_v61  ;;  %2848 = vpow2.f32 %v1390_v35  ;;  %v1406_v52 = vmul.f32 1.442695, %v1216_v38  ;;  %v1408_v47 = vmul.f32 1.442695, %v1217_v34  ;;  %v1211_v58 = vsub.f32 %v8003_v4, %v1068_v44 }
 0x1a6   : > { %v5340_v30 = vpop.eup %2840  ;;  %2850 = vpow2.f32 %v1392_v40  ;;  %v1212_v55 = vsub.f32 %v8004_v2, %v1068_v44  ;;  %v1213_v29 = vsub.f32 %v8005_v53, %v1068_v44  ;;  %v1394_v7 = vmul.f32 1.442695, %v1210_v19  ;;  %v8012_v19 = vld [vmem:[#allocation78_spill] sm:$0xff]  ;;  %v8021_v2 = vld [vmem:[#allocation63_spill] sm:$0xff] }
 0x1a7   : > { %v5344_v48 = vpop.eup %2842  ;;  %2852 = vpow2.f32 %v1402_v42  ;;  %v1396_v24 = vmul.f32 1.442695, %v1211_v58  ;;  %v5349_v35 = vsel %vm3823_vm10, %v5214_v32, 0.0  ;;  %v5354_v4 = vsel %vm3829_vm12, %v5219_v49, 0.0 }
 0x1a8   : > { %8007 = vst [vmem:[#allocation84_spill] sm:$0xff] %v5349_v35  ;;  %2854 = vpow2.f32 %v1404_v31  ;;  %v1398_v40 = vmul.f32 1.442695, %v1212_v55  ;;  %v1400_v38 = vmul.f32 1.442695, %v1213_v29  ;;  %v5359_v34 = vsel %vm3860_vm14, %v5224_v33, 0.0 }
 0x1a9   : > { %8009 = vst [vmem:[#allocation88_spill] sm:$0xff] %v5354_v4  ;;  %v5361_v42 = vpop.eup %2844  ;;  %2856 = vpow2.f32 %v1406_v52  ;;  %vm8013_vm10 = vnez %v8012_v19  ;;  %v1711_v49 = vadd.f32 %v5354_v4, %v5349_v35  ;;  %v8015_v31 = vld [vmem:[#allocation52_spill] sm:$0xff]  ;;  %v8018_v33 = vld [vmem:[#allocation55_spill] sm:$0xff]  ;;  %vm8022_vm9 = vnez %v8021_v2 }
 0x1aa   : > { %8011 = vst [vmem:[#allocation89_spill] sm:$0xff] %v5359_v34  ;;  %v5366_v32 = vsel %vm8013_vm10, %v5226_v45, 0.0  ;;  %vm8016_vm12 = vnez %v8015_v31  ;;  %v5375_v58 = vpop.eup %2846  ;;  %2858 = vpow2.f32 %v1408_v47  ;;  %vm8019_vm14 = vnez %v8018_v33  ;;  %v8024_v55 = vld [vmem:[#allocation64_spill] sm:$0xff]  ;;  %v8036_v31 = vld [vmem:[#allocation23_spill] sm:$0xff] }
 0x1ab   : > { %8014 = vst [vmem:[#allocation93_spill] sm:$0xff] %v5366_v32  ;;  %v5373_v29 = vsel %vm8016_vm12, %v5198_v20, 0.0  ;;  %v5380_v52 = vsel %vm8019_vm14, %v5203_v28, 0.0  ;;  %v5385_v45 = vsel %vm8022_vm9, %v5208_v14, 0.0  ;;  %vm8025_vm0 = vnez %v8024_v55  ;;  %v5392_v20 = vpop.eup %2848  ;;  %v8027_v28 = vld [vmem:[#allocation16_spill] sm:$0xff]  ;;  %v1078_v14 = vpop.xlane.xlu2 %1077 }
 0x1ac   : > { %8017 = vst [vmem:[#allocation94_spill] sm:$0xff] %v5373_v29  ;;  %v5390_v53 = vsel %vm8025_vm0, %v5211_v57, 0.0  ;;  %2860 = vpow2.f32 %v1394_v7  ;;  %v1712_v47 = vadd.f32 %v1711_v49, %v5359_v34  ;;  %v1701_v10 = vadd.f32 %v5380_v52, %v5373_v29  ;;  %v5402_v44 = vpop.eup %2850  ;;  %v8030_v57 = vld [vmem:[#allocation19_spill] sm:$0xff]  ;;  %v8033_v7 = vld [vmem:[#allocation22_spill] sm:$0xff] }
 0x1ad   : > { %8020 = vst [vmem:[#allocation32_spill] sm:$0xff] %v5380_v52  ;;  %vm8028_vm2 = vnez %v8027_v28  ;;  %2862 = vpow2.f32 %v1396_v24  ;;  %vm8031_vm6 = vnez %v8030_v57  ;;  %vm8034_vm13 = vnez %v8033_v7  ;;  %v5419_v2 = vpop.eup %2852  ;;  %v8040_v7 = vld [vmem:[#allocation130_spill] sm:$0xff] }
 0x1ae   : > { %8023 = vst [vmem:[#allocation33_spill] sm:$0xff] %v5385_v45  ;;  %v5400_v61 = vsel %vm8028_vm2, %v5230_v9, 0.0  ;;  %v5407_v19 = vsel %vm8031_vm6, %v5237_v18, 0.0  ;;  %v5412_v49 = vsel %vm8034_vm13, %v5244_v26, 0.0  ;;  %vm8037_vm7 = vnez %v8036_v31  ;;  %v1088_v9 = vpop.xlane.xlu1 %1087  ;;  %v5425_v28 = vpop.eup %2854  ;;  %v8039_v26 = vld [vmem:[#allocation128_spill] sm:$0xff] }
 0x1af   : > { %8026 = vst [vmem:[#allocation38_spill] sm:$0xff] %v5390_v53  ;;  %v5417_v33 = vsel %vm8037_vm7, %v5258_v25, 0.0  ;;  %2864 = vpow2.f32 %v1398_v40  ;;  %v1713_v24 = vadd.f32 %v1712_v47, %v5366_v32  ;;  %v1702_v55 = vadd.f32 %v1701_v10, %v5385_v45  ;;  %v8041_v25 = vld [vmem:[#allocation131_spill] sm:$0xff]  ;;  %v5430_v4 = vpop.eup %2856  ;;  %v8042_v10 = vld [vmem:[#allocation134_spill] sm:$0xff] }
 0x1b0   : > { %8029 = vst [vmem:[#allocation39_spill] sm:$0xff] %v5400_v61  ;;  %v1706_v18 = vadd.f32 %v5407_v19, %v5400_v61  ;;  %2866 = vpow2.f32 %v1400_v38  ;;  %v1218_v57 = vsub.f32 %v8039_v26, %v1078_v14  ;;  %v1219_v31 = vsub.f32 %v8040_v7, %v1078_v14  ;;  %v8043_v45 = vld [vmem:[#allocation143_spill] sm:$0xff]  ;;  %v1083_v61 = vpop.xlane.xlu0 %1082  ;;  %v5436_v52 = vpop.eup %2858  ;;  %v8044_v7 = vld [vmem:[#allocation146_spill] sm:$0xff] }
 0x1b1   : > { %8032 = vst [vmem:[#allocation41_spill] sm:$0xff] %v5407_v19  ;;  %v1220_v34 = vsub.f32 %v8041_v25, %v1078_v14  ;;  %1714 = vadd.xlane.f32.xlu0 %v1713_v24  ;;  %v1703_v40 = vadd.f32 %v1702_v55, %v5390_v53  ;;  %v1221_v32 = vsub.f32 %v8042_v10, %v1078_v14  ;;  %v8045_v53 = vld [vmem:[#allocation147_spill] sm:$0xff] }
 0x1b2   : > { %8035 = vst [vmem:[#allocation42_spill] sm:$0xff] %v5412_v49  ;;  %v1707_v47 = vadd.f32 %v1706_v18, %v5412_v49  ;;  %v1226_v19 = vsub.f32 %v8043_v45, %v1088_v9  ;;  %v1410_v38 = vmul.f32 1.442695, %v1218_v57  ;;  %v1412_v26 = vmul.f32 1.442695, %v1219_v31  ;;  %v5439_v25 = vpop.eup %2860  ;;  %v8046_v49 = vld [vmem:[#allocation148_spill] sm:$0xff] }
 0x1b3   : > { %8038 = vst [vmem:[#allocation45_spill] sm:$0xff] %v5417_v33  ;;  %v1414_v29 = vmul.f32 1.442695, %v1220_v34  ;;  %v1227_v35 = vsub.f32 %v8044_v7, %v1088_v9  ;;  %1704 = vadd.xlane.f32.xlu1 %v1703_v40  ;;  %v1416_v55 = vmul.f32 1.442695, %v1221_v32  ;;  %v1228_v18 = vsub.f32 %v8045_v53, %v1088_v9  ;;  %v5444_v10 = vpop.eup %2862  ;;  %v8047_v57 = vld [vmem:[#allocation137_spill] sm:$0xff] }
 0x1b4   : > { %v1708_v24 = vadd.f32 %v1707_v47, %v5417_v33  ;;  %v1229_v14 = vsub.f32 %v8046_v49, %v1088_v9  ;;  %2868 = vpow2.f32 %v1410_v38  ;;  %v1426_v45 = vmul.f32 1.442695, %v1226_v19  ;;  %v8049_v53 = vld [vmem:[#allocation139_spill] sm:$0xff]  ;;  %v8050_v9 = vld [vmem:[#allocation140_spill] sm:$0xff] }
 0x1b5   : > { %v1428_v56 = vmul.f32 1.442695, %v1227_v35  ;;  %v1222_v31 = vsub.f32 %v8047_v57, %v1083_v61  ;;  %v5447_v34 = vpop.eup %2864  ;;  %2870 = vpow2.f32 %v1412_v26  ;;  %v1430_v7 = vmul.f32 1.442695, %v1228_v18 }
 0x1b6   : > { %1709 = vadd.xlane.f32.xlu2 %v1708_v24  ;;  %v1432_v40 = vmul.f32 1.442695, %v1229_v14  ;;  %v1223_v47 = vsub.f32 %v8048_v17, %v1083_v61  ;;  %v5450_v32 = vpop.eup %2866  ;;  %2872 = vpow2.f32 %v1414_v29  ;;  %v1224_v49 = vsub.f32 %v8049_v53, %v1083_v61 }
 0x1b7   : > { %v1225_v33 = vsub.f32 %v8050_v9, %v1083_v61  ;;  %v1418_v38 = vmul.f32 1.442695, %v1222_v31  ;;  %2874 = vpow2.f32 %v1416_v55  ;;  %v5457_v57 = vsel %vm3942_vm8, %v5317_v43, 0.0  ;;  %v8056_v55 = vld [vmem:[#allocation91_spill] sm:$0xff] }
 0x1b8   : > { %v1420_v35 = vmul.f32 1.442695, %v1223_v47  ;;  %v5462_v24 = vsel %vm3946_vm3, %v5322_v12, 0.0  ;;  %2876 = vpow2.f32 %v1426_v45  ;;  %v1422_v17 = vmul.f32 1.442695, %v1224_v49  ;;  %v8059_v12 = vld [vmem:[#allocation72_spill] sm:$0xff] }
 0x1b9   : > { %8053 = vst [vmem:[#allocation48_spill] sm:$0xff] %v5462_v24  ;;  %v1424_v29 = vmul.f32 1.442695, %v1225_v33  ;;  %v5467_v61 = vsel %vm3958_vm11, %v5325_v54, 0.0  ;;  %2878 = vpow2.f32 %v1428_v56  ;;  %vm8057_vm10 = vnez %v8056_v55  ;;  %v8061_v54 = vld [vmem:[#allocation73_spill] sm:$0xff]  ;;  %v8063_v31 = vld [vmem:[#allocation79_spill] sm:$0xff] }
 0x1ba   : > { %8055 = vst [vmem:[#allocation43_spill] sm:$0xff] %v5467_v61  ;;  %v5472_v14 = vsel %vm8057_vm10, %v5329_v5, 0.0  ;;  %v1726_v43 = vadd.f32 %v5462_v24, %v5457_v57  ;;  %vm8060_vm3 = vnez %v8059_v12  ;;  %v5481_v33 = vpop.eup %2868  ;;  %2880 = vpow2.f32 %v1430_v7  ;;  %v8065_v47 = vld [vmem:[#allocation80_spill] sm:$0xff]  ;;  %v8077_v55 = vld [vmem:[#allocation46_spill] sm:$0xff] }
 0x1bb   : > { %8058 = vst [vmem:[#allocation44_spill] sm:$0xff] %v5472_v14  ;;  %v5479_v45 = vsel %vm8060_vm3, %v5275_v3, 0.0  ;;  %vm8062_vm8 = vnez %v8061_v54  ;;  %vm8064_vm11 = vnez %v8063_v31  ;;  %vm8066_vm12 = vnez %v8065_v47  ;;  %v5498_v3 = vpop.eup %2870  ;;  %v1103_v54 = vpop.xlane.xlu1 %1102 }
 0x1bc   : > { %v5486_v56 = vsel %vm8062_vm8, %v5285_v59, 0.0  ;;  %v5491_v5 = vsel %vm8064_vm11, %v5302_v51, 0.0  ;;  %v5496_v53 = vsel %vm8066_vm12, %v5311_v46, 0.0  ;;  %2882 = vpow2.f32 %v1432_v40  ;;  %v8068_v59 = vld [vmem:[#allocation36_spill] sm:$0xff]  ;;  %v1093_v51 = vpop.xlane.xlu2 %1092  ;;  %v5508_v19 = vpop.eup %2872  ;;  %v8071_v46 = vld [vmem:[#allocation37_spill] sm:$0xff] }
 0x1bd   : > { %8067 = vst [vmem:[#allocation47_spill] sm:$0xff] %v5496_v53  ;;  %v1727_v7 = vadd.f32 %v1726_v43, %v5467_v61  ;;  %v1716_v49 = vadd.f32 %v5486_v56, %v5479_v45  ;;  %vm8069_vm14 = vnez %v8068_v59  ;;  %2884 = vpow2.f32 %v1418_v38  ;;  %v8074_v40 = vld [vmem:[#allocation40_spill] sm:$0xff]  ;;  %v8081_v59 = vld [vmem:[#allocation153_spill] sm:$0xff] }
 0x1be   : > { %v5506_v9 = vsel %vm8069_vm14, %v5334_v11, 0.0  ;;  %vm8072_vm9 = vnez %v8071_v46  ;;  %vm8075_vm0 = vnez %v8074_v40  ;;  %vm8078_vm2 = vnez %v8077_v55  ;;  %v5525_v11 = vpop.eup %2874  ;;  %v1098_v55 = vpop.xlane.xlu0 %1097 }
 0x1bf   : > { %8070 = vst [vmem:[#allocation49_spill] sm:$0xff] %v5506_v9  ;;  %v5513_v26 = vsel %vm8072_vm9, %v5337_v62, 0.0  ;;  %v5518_v18 = vsel %vm8075_vm0, %v5340_v30, 0.0  ;;  %v5523_v43 = vsel %vm8078_vm2, %v5344_v48, 0.0  ;;  %2886 = vpow2.f32 %v1420_v35  ;;  %v5531_v31 = vpop.eup %2876  ;;  %v8080_v30 = vld [vmem:[#allocation152_spill] sm:$0xff] }
 0x1c0   : > { %8073 = vst [vmem:[#allocation90_spill] sm:$0xff] %v5513_v26  ;;  %v1728_v38 = vadd.f32 %v1727_v7, %v5472_v14  ;;  %v1717_v12 = vadd.f32 %v1716_v49, %v5491_v5  ;;  %v1721_v62 = vadd.f32 %v5513_v26, %v5506_v9  ;;  %2888 = vpow2.f32 %v1422_v17  ;;  %v5536_v40 = vpop.eup %2878  ;;  %v8082_v14 = vld [vmem:[#allocation167_spill] sm:$0xff] }
 0x1c1   : > { %8076 = vst [vmem:[#allocation92_spill] sm:$0xff] %v5518_v18  ;;  %v1230_v47 = vsub.f32 %v8080_v30, %v1093_v51  ;;  %v1231_v46 = vsub.f32 %v8081_v59, %v1093_v51  ;;  %v1232_v48 = vsub.f32 %v4455_v16, %v1093_v51  ;;  %2890 = vpow2.f32 %v1424_v29  ;;  %v5541_v26 = vpop.eup %2880 }
 0x1c2   : > { %8079 = vst [vmem:[#allocation95_spill] sm:$0xff] %v5523_v43  ;;  %1729 = vadd.xlane.f32.xlu0 %v1728_v38  ;;  %v1718_v35 = vadd.f32 %v1717_v12, %v5496_v53  ;;  %v1722_v7 = vadd.f32 %v1721_v62, %v5518_v18  ;;  %v1233_v49 = vsub.f32 %v4467_v63, %v1093_v51  ;;  %v5544_v61 = vpop.eup %2882  ;;  %v8083_v38 = vld [vmem:[#allocation168_spill] sm:$0xff] }
 0x1c3   : > { %v1434_v17 = vmul.f32 1.442695, %v1230_v47  ;;  %v1436_v9 = vmul.f32 1.442695, %v1231_v46  ;;  %v1438_v30 = vmul.f32 1.442695, %v1232_v48  ;;  %v1238_v59 = vsub.f32 %v8082_v14, %v1103_v54  ;;  %v5549_v18 = vpop.eup %2884 }
 0x1c4   : > { %1719 = vadd.xlane.f32.xlu1 %v1718_v35  ;;  %v1723_v16 = vadd.f32 %v1722_v7, %v5523_v43  ;;  %v1440_v29 = vmul.f32 1.442695, %v1233_v49  ;;  %v1239_v12 = vsub.f32 %v8083_v38, %v1103_v54  ;;  %v1240_v62 = vsub.f32 %v4565_v36, %v1103_v54  ;;  %v8084_v47 = vld [vmem:[#allocation158_spill] sm:$0xff]  ;;  %v8085_v7 = vld [vmem:[#allocation160_spill] sm:$0xff]  ;;  %v8086_v38 = vld [vmem:[#allocation161_spill] sm:$0xff] }
 0x1c5   : > { %2892 = vpow2.f32 %v1434_v17  ;;  %v1241_v63 = vsub.f32 %v4573_v21, %v1103_v54  ;;  %v1450_v51 = vmul.f32 1.442695, %v1238_v59  ;;  %v1234_v46 = vsub.f32 %v8084_v47, %v1098_v55  ;;  %v5553_v48 = vpop.eup %2886  ;;  %v8087_v17 = vld [vmem:[#allocation163_spill] sm:$0xff]  ;;  %v8095_v47 = vld [vmem:[#allocation120_spill] sm:$0xff] }
 0x1c6   : > { %1724 = vadd.xlane.f32.xlu2 %v1723_v16  ;;  %2894 = vpow2.f32 %v1436_v9  ;;  %v1452_v14 = vmul.f32 1.442695, %v1239_v12  ;;  %v1454_v35 = vmul.f32 1.442695, %v1240_v62  ;;  %v1235_v49 = vsub.f32 %v8085_v7, %v1098_v55  ;;  %v5556_v43 = vpop.eup %2888 }
 0x1c7   : > { %2896 = vpow2.f32 %v1438_v30  ;;  %v1456_v36 = vmul.f32 1.442695, %v1241_v63  ;;  %v1236_v24 = vsub.f32 %v8086_v38, %v1098_v55  ;;  %v1237_v53 = vsub.f32 %v8087_v17, %v1098_v55  ;;  %v5560_v21 = vpop.eup %2890  ;;  %v8089_v30 = vld [vmem:[#allocation118_spill] sm:$0xff]  ;;  %v8092_v55 = vld [vmem:[#allocation119_spill] sm:$0xff] }
 0x1c8   : > { %2898 = vpow2.f32 %v1440_v29  ;;  %v1442_v54 = vmul.f32 1.442695, %v1234_v46  ;;  %v1444_v59 = vmul.f32 1.442695, %v1235_v49  ;;  %v5565_v9 = vsel %vm4176_vm15, %v5419_v2, 0.0  ;;  %v8104_v49 = vld [vmem:[#allocation100_spill] sm:$0xff] }
 0x1c9   : > { %2900 = vpow2.f32 %v1450_v51  ;;  %v1446_v12 = vmul.f32 1.442695, %v1236_v24  ;;  %v1448_v62 = vmul.f32 1.442695, %v1237_v53  ;;  %vm8090_vm6 = vnez %v8089_v30  ;;  %v8100_v51 = vld [vmem:[#allocation98_spill] sm:$0xff] }
 0x1ca   : > { %v5570_v63 = vsel %vm8090_vm6, %v5425_v28, 0.0  ;;  %2902 = vpow2.f32 %v1452_v14  ;;  %vm8093_vm13 = vnez %v8092_v55  ;;  %vm8096_vm7 = vnez %v8095_v47  ;;  %v8098_v28 = vld [vmem:[#allocation97_spill] sm:$0xff]  ;;  %v8102_v14 = vld [vmem:[#allocation99_spill] sm:$0xff] }
 0x1cb   : > { %8091 = vst [vmem:[#allocation96_spill] sm:$0xff] %v5570_v63  ;;  %v5575_v29 = vsel %vm8093_vm13, %v5430_v4, 0.0  ;;  %v5580_v46 = vsel %vm8096_vm7, %v5436_v52, 0.0  ;;  %v1741_v2 = vadd.f32 %v5570_v63, %v5565_v9  ;;  %v5584_v24 = vpop.eup %2892  ;;  %2904 = vpow2.f32 %v1454_v35  ;;  %v8119_v63 = vld [vmem:[#allocation187_spill] sm:$0xff] }
 0x1cc   : > { %8094 = vst [vmem:[#allocation101_spill] sm:$0xff] %v5575_v29  ;;  %vm8099_vm15 = vnez %v8098_v28  ;;  %vm8101_vm10 = vnez %v8100_v51  ;;  %vm8103_vm3 = vnez %v8102_v14  ;;  %v5601_v7 = vpop.eup %2894  ;;  %2906 = vpow2.f32 %v1456_v36  ;;  %v8109_v36 = vld [vmem:[#allocation108_spill] sm:$0xff]  ;;  %v1118_v51 = vpop.xlane.xlu1 %1117 }
 0x1cd   : > { %8097 = vst [vmem:[#allocation102_spill] sm:$0xff] %v5580_v46  ;;  %v5589_v53 = vsel %vm8099_vm15, %v5361_v42, 0.0  ;;  %v5594_v4 = vsel %vm8101_vm10, %v5375_v58, 0.0  ;;  %v5599_v52 = vsel %vm8103_vm3, %v5392_v20, 0.0  ;;  %v1742_v35 = vadd.f32 %v1741_v2, %v5575_v29  ;;  %v1108_v58 = vpop.xlane.xlu2 %1107  ;;  %v5611_v17 = vpop.eup %2896  ;;  %v8106_v20 = vld [vmem:[#allocation107_spill] sm:$0xff] }
 0x1ce   : > { %vm8105_vm8 = vnez %v8104_v49  ;;  %v1731_v38 = vadd.f32 %v5594_v4, %v5589_v53  ;;  %2908 = vpow2.f32 %v1442_v54  ;;  %vm8107_vm11 = vnez %v8106_v20  ;;  %v5628_v47 = vpop.eup %2898  ;;  %v1113_v29 = vpop.xlane.xlu0 %1112 }
 0x1cf   : > { %v5607_v42 = vsel %vm8105_vm8, %v5402_v44, 0.0  ;;  %v5616_v16 = vsel %vm8107_vm11, %v5439_v25, 0.0  ;;  %vm8110_vm12 = vnez %v8109_v36  ;;  %v8112_v44 = vld [vmem:[#allocation111_spill] sm:$0xff]  ;;  %2910 = vpow2.f32 %v1444_v59  ;;  %v8115_v25 = vld [vmem:[#allocation112_spill] sm:$0xff] }
 0x1d0   : > { %8108 = vst [vmem:[#allocation105_spill] sm:$0xff] %v5616_v16  ;;  %v5621_v30 = vsel %vm8110_vm12, %v5444_v10, 0.0  ;;  %vm8113_vm14 = vnez %v8112_v44  ;;  %v1743_v54 = vadd.f32 %v1742_v35, %v5580_v46  ;;  %v1732_v2 = vadd.f32 %v1731_v38, %v5599_v52  ;;  %v5637_v10 = vpop.eup %2900  ;;  %v8117_v38 = vld [vmem:[#allocation178_spill] sm:$0xff] }
 0x1d1   : > { %8111 = vst [vmem:[#allocation106_spill] sm:$0xff] %v5621_v30  ;;  %v5626_v55 = vsel %vm8113_vm14, %v5447_v34, 0.0  ;;  %vm8116_vm9 = vnez %v8115_v25  ;;  %2912 = vpow2.f32 %v1446_v12  ;;  %v1736_v34 = vadd.f32 %v5621_v30, %v5616_v16  ;;  %v5643_v49 = vpop.eup %2902  ;;  %v8118_v46 = vld [vmem:[#allocation186_spill] sm:$0xff]  ;;  %v8122_v16 = vld [vmem:[#allocation180_spill] sm:$0xff] }
 0x1d2   : > { %8114 = vst [vmem:[#allocation53_spill] sm:$0xff] %v5626_v55  ;;  %v5635_v28 = vsel %vm8116_vm9, %v5450_v32, 0.0  ;;  %v1242_v14 = vsub.f32 %v4595_v37, %v1108_v58  ;;  %v1243_v59 = vsub.f32 %v4604_v23, %v1108_v58  ;;  %2914 = vpow2.f32 %v1448_v62  ;;  %1744 = vadd.xlane.f32.xlu0 %v1743_v54  ;;  %v5648_v36 = vpop.eup %2904 }
 0x1d3   : > { %v1733_v35 = vadd.f32 %v1732_v2, %v5607_v42  ;;  %v1244_v32 = vsub.f32 %v4609_v6, %v1108_v58  ;;  %v1245_v20 = vsub.f32 %v8117_v38, %v1108_v58  ;;  %v1737_v12 = vadd.f32 %v1736_v34, %v5626_v55  ;;  %v5652_v23 = vpop.eup %2906 }
 0x1d4   : > { %v1458_v44 = vmul.f32 1.442695, %v1242_v14  ;;  %v1460_v25 = vmul.f32 1.442695, %v1243_v59  ;;  %v1250_v37 = vsub.f32 %v8118_v46, %v1118_v51  ;;  %v1251_v2 = vsub.f32 %v8119_v63, %v1118_v51  ;;  %v5656_v30 = vpop.eup %2908  ;;  %v8121_v63 = vld [vmem:[#allocation177_spill] sm:$0xff] }
 0x1d5   : > { %1734 = vadd.xlane.f32.xlu1 %v1733_v35  ;;  %v1462_v62 = vmul.f32 1.442695, %v1244_v32  ;;  %v1464_v54 = vmul.f32 1.442695, %v1245_v20  ;;  %v1252_v6 = vsub.f32 %v4714_v27, %v1118_v51  ;;  %v1738_v58 = vadd.f32 %v1737_v12, %v5635_v28  ;;  %v5660_v59 = vpop.eup %2910  ;;  %v8120_v35 = vld [vmem:[#allocation176_spill] sm:$0xff] }
 0x1d6   : > { %2916 = vpow2.f32 %v1458_v44  ;;  %v1253_v34 = vsub.f32 %v4718_v41, %v1118_v51  ;;  %v1474_v14 = vmul.f32 1.442695, %v1250_v37  ;;  %v1476_v46 = vmul.f32 1.442695, %v1251_v2  ;;  %v8123_v41 = vld [vmem:[#allocation181_spill] sm:$0xff] }
 0x1d7   : > { %2918 = vpow2.f32 %v1460_v25  ;;  %v1478_v38 = vmul.f32 1.442695, %v1252_v6  ;;  %v1246_v32 = vsub.f32 %v8120_v35, %v1113_v29  ;;  %v5663_v20 = vpop.eup %2912  ;;  %1739 = vadd.xlane.f32.xlu2 %v1738_v58  ;;  %v1247_v55 = vsub.f32 %v8121_v63, %v1113_v29  ;;  %v8124_v25 = vld [vmem:[#allocation141_spill] sm:$0xff] }
 0x1d8   : > { %2920 = vpow2.f32 %v1462_v62  ;;  %v1480_v27 = vmul.f32 1.442695, %v1253_v34  ;;  %v1248_v12 = vsub.f32 %v8122_v16, %v1113_v29  ;;  %v5667_v44 = vpop.eup %2914  ;;  %v1249_v51 = vsub.f32 %v8123_v41, %v1113_v29  ;;  %v8126_v62 = vld [vmem:[#allocation142_spill] sm:$0xff]  ;;  %v8132_v35 = vld [vmem:[#allocation145_spill] sm:$0xff] }
 0x1d9   : > { %2922 = vpow2.f32 %v1464_v54  ;;  %v1466_v37 = vmul.f32 1.442695, %v1246_v32  ;;  %vm8125_vm0 = vnez %v8124_v25  ;;  %v1468_v6 = vmul.f32 1.442695, %v1247_v55  ;;  %v8129_v54 = vld [vmem:[#allocation144_spill] sm:$0xff]  ;;  %v8137_v32 = vld [vmem:[#allocation126_spill] sm:$0xff] }
 0x1da   : > { %v5673_v2 = vsel %vm8125_vm0, %v5531_v31, 0.0  ;;  %2924 = vpow2.f32 %v1474_v14  ;;  %v1470_v58 = vmul.f32 1.442695, %v1248_v12  ;;  %vm8127_vm2 = vnez %v8126_v62  ;;  %v8141_v12 = vld [vmem:[#allocation129_spill] sm:$0xff] }
 0x1db   : > { %v5678_v34 = vsel %vm8127_vm2, %v5536_v40, 0.0  ;;  %2926 = vpow2.f32 %v1476_v46  ;;  %v1472_v16 = vmul.f32 1.442695, %v1249_v51  ;;  %vm8130_vm6 = vnez %v8129_v54  ;;  %v8135_v40 = vld [vmem:[#allocation125_spill] sm:$0xff]  ;;  %v1123_v51 = vpop.xlane.xlu2 %1122 }
 0x1dc   : > { %8128 = vst [vmem:[#allocation54_spill] sm:$0xff] %v5678_v34  ;;  %v5683_v29 = vsel %vm8130_vm6, %v5541_v26, 0.0  ;;  %vm8133_vm13 = vnez %v8132_v35  ;;  %v5690_v14 = vpop.eup %2916  ;;  %2928 = vpow2.f32 %v1478_v38  ;;  %v1756_v55 = vadd.f32 %v5678_v34, %v5673_v2 }
 0x1dd   : > { %8131 = vst [vmem:[#allocation57_spill] sm:$0xff] %v5683_v29  ;;  %v5688_v31 = vsel %vm8133_vm13, %v5544_v61, 0.0  ;;  %vm8136_vm7 = vnez %v8135_v40  ;;  %vm8138_vm15 = vnez %v8137_v32  ;;  %v5704_v63 = vpop.eup %2918  ;;  %2930 = vpow2.f32 %v1480_v27  ;;  %v8139_v61 = vld [vmem:[#allocation127_spill] sm:$0xff]  ;;  %v8143_v27 = vld [vmem:[#allocation132_spill] sm:$0xff]  ;;  %v1133_v32 = vpop.xlane.xlu1 %1132 }
 0x1de   : > { %8134 = vst [vmem:[#allocation66_spill] sm:$0xff] %v5688_v31  ;;  %v5697_v46 = vsel %vm8136_vm7, %v5481_v33, 0.0  ;;  %v5702_v26 = vsel %vm8138_vm15, %v5498_v3, 0.0  ;;  %vm8140_vm10 = vnez %v8139_v61  ;;  %vm8142_vm3 = vnez %v8141_v12  ;;  %v5718_v25 = vpop.eup %2920  ;;  %v8147_v40 = vld [vmem:[#allocation135_spill] sm:$0xff] }
 0x1df   : > { %v5709_v38 = vsel %vm8140_vm10, %v5508_v19, 0.0  ;;  %v5714_v41 = vsel %vm8142_vm3, %v5525_v11, 0.0  ;;  %v1746_v33 = vadd.f32 %v5702_v26, %v5697_v46  ;;  %2932 = vpow2.f32 %v1466_v37  ;;  %v8145_v19 = vld [vmem:[#allocation133_spill] sm:$0xff]  ;;  %v5731_v11 = vpop.eup %2922 }
 0x1e0   : > { %v1757_v3 = vadd.f32 %v1756_v55, %v5683_v29  ;;  %vm8144_vm8 = vnez %v8143_v27  ;;  %vm8146_vm11 = vnez %v8145_v19  ;;  %2934 = vpow2.f32 %v1468_v6  ;;  %v8149_v55 = vld [vmem:[#allocation136_spill] sm:$0xff]  ;;  %v5744_v61 = vpop.eup %2924 }
 0x1e1   : > { %v5724_v62 = vsel %vm8144_vm8, %v5549_v18, 0.0  ;;  %v5729_v54 = vsel %vm8146_vm11, %v5553_v48, 0.0  ;;  %v1747_v35 = vadd.f32 %v1746_v33, %v5709_v38  ;;  %vm8148_vm12 = vnez %v8147_v40  ;;  %v5750_v33 = vpop.eup %2926 }
 0x1e2   : > { %v5737_v37 = vsel %vm8148_vm12, %v5556_v43, 0.0  ;;  %vm8150_vm14 = vnez %v8149_v55  ;;  %2936 = vpow2.f32 %v1470_v58  ;;  %v1758_v48 = vadd.f32 %v1757_v3, %v5688_v31  ;;  %v5755_v40 = vpop.eup %2928 }
 0x1e3   : > { %v5742_v18 = vsel %vm8150_vm14, %v5560_v21, 0.0  ;;  %v1751_v6 = vadd.f32 %v5729_v54, %v5724_v62  ;;  %v1254_v12 = vsub.f32 %v4752_v60, %v1123_v51  ;;  %2938 = vpow2.f32 %v1472_v16  ;;  %v8152_v21 = vld [vmem:[#allocation192_spill] sm:$0xff]  ;;  %v5760_v60 = vpop.eup %2930 }
 0x1e4   : > { %8151 = vst [vmem:[#allocation50_spill] sm:$0xff] %v5742_v18  ;;  %v1748_v43 = vadd.f32 %v1747_v35, %v5714_v41  ;;  %v1255_v27 = vsub.f32 %v4757_v15, %v1123_v51  ;;  %v1256_v19 = vsub.f32 %v8152_v21, %v1123_v51  ;;  %1759 = vadd.xlane.f32.xlu0 %v1758_v48  ;;  %v1128_v21 = vpop.xlane.xlu0 %1127 }
 0x1e5   : > { %v1752_v58 = vadd.f32 %v1751_v6, %v5737_v37  ;;  %v1257_v3 = vsub.f32 %v4789_v22, %v1123_v51  ;;  %v1482_v55 = vmul.f32 1.442695, %v1254_v12  ;;  %v1262_v31 = vsub.f32 %v4838_v8, %v1133_v32  ;;  %v5764_v34 = vpop.eup %2932 }
 0x1e6   : > { %1749 = vadd.xlane.f32.xlu1 %v1748_v43  ;;  %v1484_v16 = vmul.f32 1.442695, %v1255_v27  ;;  %v1486_v29 = vmul.f32 1.442695, %v1256_v19  ;;  %v1263_v35 = vsub.f32 %v4848_v50, %v1133_v32  ;;  %v1264_v15 = vsub.f32 %v4858_v39, %v1133_v32  ;;  %v5768_v51 = vpop.eup %2934 }
 0x1e7   : > { %v1753_v48 = vadd.f32 %v1752_v58, %v5742_v18  ;;  %2940 = vpow2.f32 %v1482_v55  ;;  %v1488_v6 = vmul.f32 1.442695, %v1257_v3  ;;  %v1265_v22 = vsub.f32 %v4866_v1, %v1133_v32  ;;  %v8153_v3 = vld [vmem:[#allocation197_spill] sm:$0xff]  ;;  %v8154_v32 = vld [vmem:[#allocation199_spill] sm:$0xff] }
 0x1e8   : > { %2942 = vpow2.f32 %v1484_v16  ;;  %v1498_v8 = vmul.f32 1.442695, %v1262_v31  ;;  %v1500_v12 = vmul.f32 1.442695, %v1263_v35  ;;  %v1502_v43 = vmul.f32 1.442695, %v1264_v15  ;;  %v5770_v27 = vpop.eup %2936 }
 0x1e9   : > { %1754 = vadd.xlane.f32.xlu2 %v1753_v48  ;;  %2944 = vpow2.f32 %v1486_v29  ;;  %v1504_v50 = vmul.f32 1.442695, %v1265_v22  ;;  %v1258_v39 = vsub.f32 %v4795_v0, %v1128_v21  ;;  %v1259_v19 = vsub.f32 %v4800_v13, %v1128_v21  ;;  %v5774_v58 = vpop.eup %2938  ;;  %v8155_v31 = vld [vmem:[#allocation162_spill] sm:$0xff]  ;;  %v8158_v29 = vld [vmem:[#allocation164_spill] sm:$0xff] }
 0x1ea   : > { %2946 = vpow2.f32 %v1488_v6  ;;  %v1260_v1 = vsub.f32 %v8153_v3, %v1128_v21  ;;  %v1261_v55 = vsub.f32 %v8154_v32, %v1128_v21  ;;  %vm8156_vm9 = vnez %v8155_v31  ;;  %v8161_v21 = vld [vmem:[#allocation165_spill] sm:$0xff]  ;;  %v8173_v3 = vld [vmem:[#allocation151_spill] sm:$0xff] }
 0x1eb   : > { %v5781_v16 = vsel %vm8156_vm9, %v5637_v10, 0.0  ;;  %2948 = vpow2.f32 %v1498_v8  ;;  %v1490_v35 = vmul.f32 1.442695, %v1258_v39  ;;  %vm8159_vm0 = vnez %v8158_v29  ;;  %v8164_v8 = vld [vmem:[#allocation149_spill] sm:$0xff]  ;;  %v8167_v39 = vld [vmem:[#allocation166_spill] sm:$0xff] }
 0x1ec   : > { %8157 = vst [vmem:[#allocation51_spill] sm:$0xff] %v5781_v16  ;;  %v5786_v0 = vsel %vm8159_vm0, %v5643_v49, 0.0  ;;  %2950 = vpow2.f32 %v1500_v12  ;;  %v1492_v13 = vmul.f32 1.442695, %v1259_v19  ;;  %v1494_v15 = vmul.f32 1.442695, %v1260_v1 }
 0x1ed   : > { %8160 = vst [vmem:[#allocation56_spill] sm:$0xff] %v5786_v0  ;;  %v1496_v48 = vmul.f32 1.442695, %v1261_v55  ;;  %v5788_v6 = vpop.eup %2940  ;;  %2952 = vpow2.f32 %v1502_v43  ;;  %vm8162_vm2 = vnez %v8161_v21  ;;  %v1771_v10 = vadd.f32 %v5786_v0, %v5781_v16  ;;  %v8170_v19 = vld [vmem:[#allocation150_spill] sm:$0xff] }
 0x1ee   : > { %v5793_v22 = vsel %vm8162_vm2, %v5648_v36, 0.0  ;;  %vm8165_vm6 = vnez %v8164_v8  ;;  %v5802_v12 = vpop.eup %2942  ;;  %2954 = vpow2.f32 %v1504_v50  ;;  %vm8168_vm13 = vnez %v8167_v39  ;;  %v8195_v16 = vld [vmem:[#allocation222_spill] sm:$0xff] }
 0x1ef   : > { %8163 = vst [vmem:[#allocation62_spill] sm:$0xff] %v5793_v22  ;;  %v5800_v49 = vsel %vm8165_vm6, %v5584_v24, 0.0  ;;  %v5807_v43 = vsel %vm8168_vm13, %v5652_v23, 0.0  ;;  %vm8171_vm7 = vnez %v8170_v19  ;;  %vm8174_vm15 = vnez %v8173_v3  ;;  %v5819_v24 = vpop.eup %2944  ;;  %v8176_v23 = vld [vmem:[#allocation155_spill] sm:$0xff] }
 0x1f0   : > { %8166 = vst [vmem:[#allocation8_spill] sm:$0xff] %v5800_v49  ;;  %v5812_v36 = vsel %vm8171_vm7, %v5601_v7, 0.0  ;;  %v5817_v1 = vsel %vm8174_vm15, %v5611_v17, 0.0  ;;  %2956 = vpow2.f32 %v1490_v35  ;;  %v1772_v50 = vadd.f32 %v1771_v10, %v5793_v22  ;;  %v1138_v7 = vpop.xlane.xlu2 %1137  ;;  %v5829_v31 = vpop.eup %2946  ;;  %v8179_v17 = vld [vmem:[#allocation154_spill] sm:$0xff]  ;;  %v8182_v35 = vld [vmem:[#allocation156_spill] sm:$0xff]  ;;  %v8185_v10 = vld [vmem:[#allocation157_spill] sm:$0xff] }
 0x1f1   : > { %8169 = vst [vmem:[#allocation9_spill] sm:$0xff] %v5807_v43  ;;  %v1761_v32 = vadd.f32 %v5812_v36, %v5800_v49  ;;  %vm8177_vm10 = vnez %v8176_v23  ;;  %2958 = vpow2.f32 %v1492_v13  ;;  %vm8180_vm3 = vnez %v8179_v17  ;;  %v5846_v39 = vpop.eup %2948  ;;  %v8193_v22 = vld [vmem:[#allocation209_spill] sm:$0xff] }
 0x1f2   : > { %8172 = vst [vmem:[#allocation10_spill] sm:$0xff] %v5812_v36  ;;  %v5827_v55 = vsel %vm8177_vm10, %v5656_v30, 0.0  ;;  %v5834_v29 = vsel %vm8180_vm3, %v5628_v47, 0.0  ;;  %vm8183_vm8 = vnez %v8182_v35  ;;  %vm8186_vm11 = vnez %v8185_v10  ;;  %v1148_v30 = vpop.xlane.xlu1 %1147  ;;  %v8188_v47 = vld [vmem:[#allocation159_spill] sm:$0xff]  ;;  %v5857_v23 = vpop.eup %2950  ;;  %v8192_v35 = vld [vmem:[#allocation208_spill] sm:$0xff] }
 0x1f3   : > { %8175 = vst [vmem:[#allocation13_spill] sm:$0xff] %v5817_v1  ;;  %v5839_v21 = vsel %vm8183_vm8, %v5660_v59, 0.0  ;;  %v5844_v8 = vsel %vm8186_vm11, %v5663_v20, 0.0  ;;  %v1773_v13 = vadd.f32 %v1772_v50, %v5807_v43  ;;  %v1762_v19 = vadd.f32 %v1761_v32, %v5817_v1  ;;  %v8191_v20 = vld [vmem:[#allocation207_spill] sm:$0xff]  ;;  %v5862_v50 = vpop.eup %2952 }
 0x1f4   : > { %8178 = vst [vmem:[#allocation11_spill] sm:$0xff] %v5827_v55  ;;  %vm8189_vm12 = vnez %v8188_v47  ;;  %v1766_v59 = vadd.f32 %v5839_v21, %v5827_v55  ;;  %2960 = vpow2.f32 %v1494_v15  ;;  %v1266_v17 = vsub.f32 %v8191_v20, %v1138_v7  ;;  %v8194_v47 = vld [vmem:[#allocation213_spill] sm:$0xff]  ;;  %v1143_v55 = vpop.xlane.xlu0 %1142  ;;  %v5868_v1 = vpop.eup %2954 }
 0x1f5   : > { %8181 = vst [vmem:[#allocation12_spill] sm:$0xff] %v5834_v29  ;;  %v5853_v3 = vsel %vm8189_vm12, %v5667_v44, 0.0  ;;  %v1267_v10 = vsub.f32 %v8192_v35, %v1138_v7  ;;  %v1268_v0 = vsub.f32 %v8193_v22, %v1138_v7  ;;  %1774 = vadd.xlane.f32.xlu0 %v1773_v13  ;;  %v1763_v32 = vadd.f32 %v1762_v19, %v5834_v29  ;;  %v8196_v35 = vld [vmem:[#allocation224_spill] sm:$0xff] }
 0x1f6   : > { %8184 = vst [vmem:[#allocation14_spill] sm:$0xff] %v5839_v21  ;;  %v1767_v44 = vadd.f32 %v1766_v59, %v5844_v8  ;;  %v1269_v43 = vsub.f32 %v8194_v47, %v1138_v7  ;;  %v1274_v21 = vsub.f32 %v8195_v16, %v1148_v30  ;;  %v1506_v15 = vmul.f32 1.442695, %v1266_v17  ;;  %v5871_v22 = vpop.eup %2956  ;;  %v8197_v59 = vld [vmem:[#allocation225_spill] sm:$0xff]  ;;  %v8199_v17 = vld [vmem:[#allocation214_spill] sm:$0xff] }
 0x1f7   : > { %8187 = vst [vmem:[#allocation15_spill] sm:$0xff] %v5844_v8  ;;  %v1508_v20 = vmul.f32 1.442695, %v1267_v10  ;;  %v1510_v36 = vmul.f32 1.442695, %v1268_v0  ;;  %v1275_v49 = vsub.f32 %v8196_v35, %v1148_v30  ;;  %2962 = vpow2.f32 %v1496_v48  ;;  %1764 = vadd.xlane.f32.xlu1 %v1763_v32  ;;  %v5875_v7 = vpop.eup %2958  ;;  %v8198_v16 = vld [vmem:[#allocation229_spill] sm:$0xff] }
 0x1f8   : > { %8190 = vst [vmem:[#allocation103_spill] sm:$0xff] %v5853_v3  ;;  %v1768_v13 = vadd.f32 %v1767_v44, %v5853_v3  ;;  %v1512_v19 = vmul.f32 1.442695, %v1269_v43  ;;  %v1276_v8 = vsub.f32 %v8197_v59, %v1148_v30  ;;  %2964 = vpow2.f32 %v1506_v15  ;;  %v8200_v0 = vld [vmem:[#allocation215_spill] sm:$0xff]  ;;  %v8201_v32 = vld [vmem:[#allocation217_spill] sm:$0xff]  ;;  %v8203_v15 = vld [vmem:[#allocation182_spill] sm:$0xff] }
 0x1f9   : > { %v1277_v47 = vsub.f32 %v8198_v16, %v1148_v30  ;;  %v1522_v29 = vmul.f32 1.442695, %v1274_v21  ;;  %v1270_v10 = vsub.f32 %v8199_v17, %v1143_v55  ;;  %2966 = vpow2.f32 %v1508_v20  ;;  %v8202_v44 = vld [vmem:[#allocation219_spill] sm:$0xff] }
 0x1fa   : > { %1769 = vadd.xlane.f32.xlu2 %v1768_v13  ;;  %v1271_v35 = vsub.f32 %v8200_v0, %v1143_v55  ;;  %v5880_v18 = vpop.eup %2960  ;;  %2968 = vpow2.f32 %v1510_v36  ;;  %v1524_v48 = vmul.f32 1.442695, %v1275_v49  ;;  %v1272_v43 = vsub.f32 %v8201_v32, %v1143_v55  ;;  %v8206_v30 = vld [vmem:[#allocation183_spill] sm:$0xff] }
 0x1fb   : > { %v1273_v59 = vsub.f32 %v8202_v44, %v1143_v55  ;;  %2970 = vpow2.f32 %v1512_v19  ;;  %v1526_v3 = vmul.f32 1.442695, %v1276_v8  ;;  %vm8204_vm14 = vnez %v8203_v15  ;;  %v8209_v19 = vld [vmem:[#allocation169_spill] sm:$0xff] }
 0x1fc   : > { %v5887_v21 = vsel %vm8204_vm14, %v5744_v61, 0.0  ;;  %vm8207_vm9 = vnez %v8206_v30  ;;  %2972 = vpow2.f32 %v1522_v29  ;;  %v1528_v13 = vmul.f32 1.442695, %v1277_v47  ;;  %v8214_v47 = vld [vmem:[#allocation185_spill] sm:$0xff] }
 0x1fd   : > { %8205 = vst [vmem:[#allocation104_spill] sm:$0xff] %v5887_v21  ;;  %v5892_v20 = vsel %vm8207_vm9, %v5750_v33, 0.0  ;;  %v1514_v36 = vmul.f32 1.442695, %v1270_v10  ;;  %v1516_v49 = vmul.f32 1.442695, %v1271_v35  ;;  %v5894_v16 = vpop.eup %2962  ;;  %vm8210_vm0 = vnez %v8209_v19 }
 0x1fe   : > { %8208 = vst [vmem:[#allocation109_spill] sm:$0xff] %v5892_v20  ;;  %v1518_v17 = vmul.f32 1.442695, %v1272_v43  ;;  %v1520_v55 = vmul.f32 1.442695, %v1273_v59  ;;  %v1786_v8 = vadd.f32 %v5892_v20, %v5887_v21  ;;  %v5901_v61 = vsel %vm8210_vm0, %v5690_v14, 0.0  ;;  %v5903_v0 = vpop.eup %2964 }
 0x1ff   : > { %2974 = vpow2.f32 %v1524_v48  ;;  %v8211_v33 = vld [vmem:[#allocation184_spill] sm:$0xff]  ;;  %vm8215_vm6 = vnez %v8214_v47  ;;  %v8217_v35 = vld [vmem:[#allocation170_spill] sm:$0xff]  ;;  %v5920_v14 = vpop.eup %2966 }
 0x200   : > { %vm8212_vm2 = vnez %v8211_v33  ;;  %v5913_v10 = vsel %vm8215_vm6, %v5760_v60, 0.0  ;;  %vm8218_vm13 = vnez %v8217_v35  ;;  %2976 = vpow2.f32 %v1526_v3  ;;  %v1153_v60 = vpop.xlane.xlu2 %1152  ;;  %v5930_v59 = vpop.eup %2968  ;;  %v8223_v3 = vld [vmem:[#allocation172_spill] sm:$0xff]  ;;  %v8227_v35 = vld [vmem:[#allocation175_spill] sm:$0xff] }
 0x201   : > { %v5908_v29 = vsel %vm8212_vm2, %v5755_v40, 0.0  ;;  %8216 = vst [vmem:[#allocation121_spill] sm:$0xff] %v5913_v10  ;;  %v5918_v32 = vsel %vm8218_vm13, %v5704_v63, 0.0  ;;  %v8219_v40 = vld [vmem:[#allocation173_spill] sm:$0xff]  ;;  %2978 = vpow2.f32 %v1528_v13  ;;  %v8221_v63 = vld [vmem:[#allocation171_spill] sm:$0xff]  ;;  %vm8224_vm10 = vnez %v8223_v3 }
 0x202   : > { %8213 = vst [vmem:[#allocation110_spill] sm:$0xff] %v5908_v29  ;;  %v1787_v48 = vadd.f32 %v1786_v8, %v5908_v29  ;;  %v1776_v43 = vadd.f32 %v5918_v32, %v5901_v61  ;;  %vm8220_vm7 = vnez %v8219_v40  ;;  %vm8222_vm15 = vnez %v8221_v63  ;;  %v8225_v8 = vld [vmem:[#allocation174_spill] sm:$0xff] }
 0x203   : > { %v5928_v44 = vsel %vm8220_vm7, %v5764_v34, 0.0  ;;  %v5935_v15 = vsel %vm8222_vm15, %v5718_v25, 0.0  ;;  %v5940_v30 = vsel %vm8224_vm10, %v5731_v11, 0.0  ;;  %vm8226_vm3 = vnez %v8225_v8  ;;  %v5947_v34 = vpop.eup %2970  ;;  %v8229_v40 = vld [vmem:[#allocation230_spill] sm:$0xff]  ;;  %v8231_v8 = vld [vmem:[#allocation233_spill] sm:$0xff] }
 0x204   : > { %v5945_v19 = vsel %vm8226_vm3, %v5768_v51, 0.0  ;;  %2980 = vpow2.f32 %v1514_v36  ;;  %v1788_v13 = vadd.f32 %v1787_v48, %v5913_v10  ;;  %v1777_v33 = vadd.f32 %v1776_v43, %v5935_v15  ;;  %v2973_v47 = vpop.eup %2972  ;;  %v8230_v51 = vld [vmem:[#allocation231_spill] sm:$0xff]  ;;  %v8232_v43 = vld [vmem:[#allocation234_spill] sm:$0xff] }
 0x205   : > { %v1781_v25 = vadd.f32 %v5945_v19, %v5928_v44  ;;  %vm8228_vm8 = vnez %v8227_v35  ;;  %v1278_v63 = vsub.f32 %v8229_v40, %v1153_v60  ;;  %v1279_v3 = vsub.f32 %v8230_v51, %v1153_v60  ;;  %v2975_v20 = vpop.eup %2974  ;;  %v8233_v35 = vld [vmem:[#allocation179_spill] sm:$0xff] }
 0x206   : > { %v5956_v11 = vsel %vm8228_vm8, %v5770_v27, 0.0  ;;  %v1280_v29 = vsub.f32 %v8231_v8, %v1153_v60  ;;  %2982 = vpow2.f32 %v1516_v49  ;;  %1789 = vadd.xlane.f32.xlu0 %v1788_v13  ;;  %v1778_v36 = vadd.f32 %v1777_v33, %v5940_v30  ;;  %v2977_v51 = vpop.eup %2976  ;;  %v8235_v33 = vld [vmem:[#allocation198_spill] sm:$0xff] }
 0x207   : > { %v1782_v48 = vadd.f32 %v1781_v25, %v5956_v11  ;;  %v1281_v10 = vsub.f32 %v8232_v43, %v1153_v60  ;;  %2984 = vpow2.f32 %v1518_v17  ;;  %vm8234_vm11 = vnez %v8233_v35  ;;  %v8238_v60 = vld [vmem:[#allocation200_spill] sm:$0xff]  ;;  %v2979_v8 = vpop.eup %2978  ;;  %v8248_v43 = vld [vmem:[#allocation202_spill] sm:$0xff] }
 0x208   : > { %v5967_v27 = vsel %vm8234_vm11, %v5774_v58, 0.0  ;;  %v1530_v40 = vmul.f32 1.442695, %v1278_v63  ;;  %v1532_v21 = vmul.f32 1.442695, %v1279_v3  ;;  %1779 = vadd.xlane.f32.xlu1 %v1778_v36  ;;  %vm8236_vm12 = vnez %v8235_v33 }
 0x209   : > { %v1783_v49 = vadd.f32 %v1782_v48, %v5967_v27  ;;  %v1534_v13 = vmul.f32 1.442695, %v1280_v29  ;;  %v5973_v25 = vsel %vm8236_vm12, %v5846_v39, 0.0  ;;  %vm8239_vm14 = vnez %v8238_v60  ;;  %v8241_v29 = vld [vmem:[#allocation201_spill] sm:$0xff]  ;;  %v8244_v39 = vld [vmem:[#allocation188_spill] sm:$0xff] }
 0x20a   : > { %8237 = vst [vmem:[#allocation122_spill] sm:$0xff] %v5973_v25  ;;  %v5978_v17 = vsel %vm8239_vm14, %v5857_v23, 0.0  ;;  %2986 = vpow2.f32 %v1530_v40  ;;  %v1536_v58 = vmul.f32 1.442695, %v1281_v10  ;;  %v2981_v3 = vpop.eup %2980  ;;  %vm8242_vm9 = vnez %v8241_v29  ;;  %v8246_v23 = vld [vmem:[#allocation189_spill] sm:$0xff] }
 0x20b   : > { %8240 = vst [vmem:[#allocation123_spill] sm:$0xff] %v5978_v17  ;;  %v1801_v63 = vadd.f32 %v5978_v17, %v5973_v25  ;;  %1784 = vadd.xlane.f32.xlu2 %v1783_v49  ;;  %2988 = vpow2.f32 %v1532_v21  ;;  %v5985_v36 = vsel %vm8242_vm9, %v5862_v50, 0.0  ;;  %vm8245_vm0 = vnez %v8244_v39 }
 0x20c   : > { %8243 = vst [vmem:[#allocation124_spill] sm:$0xff] %v5985_v36  ;;  %v5990_v48 = vsel %vm8245_vm0, %v5788_v6, 0.0  ;;  %vm8247_vm2 = vnez %v8246_v23  ;;  %2990 = vpow2.f32 %v1520_v55  ;;  %vm8249_vm6 = vnez %v8248_v43  ;;  %v2983_v40 = vpop.eup %2982  ;;  %v8251_v6 = vld [vmem:[#allocation190_spill] sm:$0xff]  ;;  %v8261_v23 = vld [vmem:[#allocation195_spill] sm:$0xff] }
 0x20d   : > { %v5995_v10 = vsel %vm8247_vm2, %v5802_v12, 0.0  ;;  %v6000_v21 = vsel %vm8249_vm6, %v5868_v1, 0.0  ;;  %v1802_v35 = vadd.f32 %v1801_v63, %v5985_v36  ;;  %2992 = vpow2.f32 %v1534_v13  ;;  %v8253_v12 = vld [vmem:[#allocation193_spill] sm:$0xff]  ;;  %v8256_v1 = vld [vmem:[#allocation194_spill] sm:$0xff]  ;;  %v2985_v60 = vpop.eup %2984  ;;  %v8259_v13 = vld [vmem:[#allocation191_spill] sm:$0xff] }
 0x20e   : > { %8250 = vst [vmem:[#allocation113_spill] sm:$0xff] %v6000_v21  ;;  %v1791_v50 = vadd.f32 %v5995_v10, %v5990_v48  ;;  %vm8252_vm13 = vnez %v8251_v6  ;;  %vm8254_vm7 = vnez %v8253_v12  ;;  %vm8257_vm15 = vnez %v8256_v1  ;;  %v8264_v43 = vld [vmem:[#allocation218_spill] sm:$0xff]  ;;  %v8267_v6 = vld [vmem:[#allocation220_spill] sm:$0xff]  ;;  %v8317_v36 = vld [vmem:[#allocation59_spill] sm:$0xff] }
 0x20f   : > { %v6008_v49 = vsel %vm8252_vm13, %v5819_v24, 0.0  ;;  %v6013_v55 = vsel %vm8254_vm7, %v5871_v22, 0.0  ;;  %v6018_v33 = vsel %vm8257_vm15, %v5875_v7, 0.0  ;;  %v1803_v63 = vadd.f32 %v1802_v35, %v6000_v21  ;;  %v1670_v22 = vpop.xlane.xlu0 %1669 }
 0x210   : > { %8255 = vst [vmem:[#allocation114_spill] sm:$0xff] %v6013_v55  ;;  %vm8260_vm10 = vnez %v8259_v13  ;;  %v1792_v24 = vadd.f32 %v1791_v50, %v6008_v49  ;;  %v1796_v39 = vadd.f32 %v6018_v33, %v6013_v55  ;;  %2994 = vpow2.f32 %v1536_v58  ;;  %v2987_v12 = vpop.eup %2986 }
 0x211   : > { %8258 = vst [vmem:[#allocation115_spill] sm:$0xff] %v6018_v33  ;;  %v6024_v29 = vsel %vm8260_vm10, %v5829_v31, 0.0  ;;  %vm8262_vm3 = vnez %v8261_v23  ;;  %vm8265_vm8 = vnez %v8264_v43  ;;  %vm8268_vm11 = vnez %v8267_v6  ;;  %1804 = vadd.xlane.f32.xlu0 %v1803_v63  ;;  %v8273_v23 = vld [vmem:[#allocation196_spill] sm:$0xff]  ;;  %v8276_v43 = vld [vmem:[#allocation221_spill] sm:$0xff]  ;;  %v8282_v6 = vld [vmem:[#allocation210_spill] sm:$0xff] }
 0x212   : > { %v6032_v7 = vsel %vm8262_vm3, %v5880_v18, 0.0  ;;  %v6036_v35 = vsel %vm8265_vm8, %v2973_v47, 0.0  ;;  %v6040_v31 = vsel %vm8268_vm11, %v2975_v20, 0.0  ;;  %v1793_v50 = vadd.f32 %v1792_v24, %v6024_v29  ;;  %v8270_v18 = vld [vmem:[#allocation203_spill] sm:$0xff]  ;;  %v2989_v47 = vpop.eup %2988  ;;  %v8279_v24 = vld [vmem:[#allocation204_spill] sm:$0xff] }
 0x213   : > { %8263 = vst [vmem:[#allocation117_spill] sm:$0xff] %v6032_v7  ;;  %v1797_v1 = vadd.f32 %v1796_v39, %v6032_v7  ;;  %v1816_v58 = vadd.f32 %v6040_v31, %v6036_v35  ;;  %vm8271_vm12 = vnez %v8270_v18  ;;  %vm8274_vm14 = vnez %v8273_v23 }
 0x214   : > { %8266 = vst [vmem:[#allocation70_spill] sm:$0xff] %v6036_v35  ;;  %v6049_v13 = vsel %vm8271_vm12, %v5903_v0, 0.0  ;;  %v6054_v20 = vsel %vm8274_vm14, %v5894_v16, 0.0  ;;  %vm8277_vm9 = vnez %v8276_v43  ;;  %vm8280_vm0 = vnez %v8279_v24  ;;  %v2991_v0 = vpop.eup %2990  ;;  %1794 = vadd.xlane.f32.xlu1 %v1793_v50  ;;  %v1680_v24 = vpop.xlane.xlu2 %1679  ;;  %v8295_v35 = vld [vmem:[#allocation212_spill] sm:$0xff] }
 0x215   : > { %8269 = vst [vmem:[#allocation71_spill] sm:$0xff] %v6040_v31  ;;  %v6058_v63 = vsel %vm8277_vm9, %v2977_v51, 0.0  ;;  %v6063_v39 = vsel %vm8280_vm0, %v5920_v14, 0.0  ;;  %vm8283_vm2 = vnez %v8282_v6  ;;  %v1798_v31 = vadd.f32 %v1797_v1, %v6054_v20  ;;  %v8285_v51 = vld [vmem:[#allocation211_spill] sm:$0xff]  ;;  %v2993_v14 = vpop.eup %2992 }
 0x216   : > { %8272 = vst [vmem:[#allocation74_spill] sm:$0xff] %v6049_v13  ;;  %v6067_v18 = vsel %vm8283_vm2, %v2981_v3, 0.0  ;;  %v1817_v16 = vadd.f32 %v1816_v58, %v6058_v63  ;;  %v1806_v23 = vadd.f32 %v6063_v39, %v6049_v13  ;;  %vm8286_vm6 = vnez %v8285_v51  ;;  %v8290_v3 = vld [vmem:[#allocation205_spill] sm:$0xff] }
 0x217   : > { %8275 = vst [vmem:[#allocation78_spill] sm:$0xff] %v6054_v20  ;;  %v6075_v43 = vsel %vm8286_vm6, %v2983_v40, 0.0  ;;  %v6079_v6 = vsel %vm4971_vm1, %v2979_v8, 0.0  ;;  %vm8291_vm13 = vnez %v8290_v3  ;;  %1799 = vadd.xlane.f32.xlu2 %v1798_v31  ;;  %vm8296_vm1 = vnez %v8295_v35  ;;  %v2995_v3 = vpop.eup %2994  ;;  %v8303_v35 = vld [vmem:[#allocation216_spill] sm:$0xff] }
 0x218   : > { %8278 = vst [vmem:[#allocation52_spill] sm:$0xff] %v6058_v63  ;;  %v6084_v50 = vsel %vm8291_vm13, %v5930_v59, 0.0  ;;  %v1811_v1 = vadd.f32 %v6075_v43, %v6067_v18  ;;  %v6090_v63 = vsel %vm4988_vm4, %v2987_v12, 0.0  ;;  %v1818_v40 = vadd.f32 %v1817_v16, %v6079_v6 }
 0x219   : > { %8281 = vst [vmem:[#allocation55_spill] sm:$0xff] %v6063_v39  ;;  %v1807_v51 = vadd.f32 %v1806_v23, %v6084_v50  ;;  %v6096_v8 = vsel %vm8296_vm1, %v2985_v60, 0.0  ;;  %v6100_v59 = vsel %vm4993_vm5, %v2989_v47, 0.0  ;;  %v1828_v12 = vmax.f32 %v1680_v24, 1e-20  ;;  %v1675_v24 = vpop.xlane.xlu1 %1674 }
 0x21a   : > { %8284 = vst [vmem:[#allocation63_spill] sm:$0xff] %v6067_v18  ;;  %v1812_v31 = vadd.f32 %v1811_v1, %v6096_v8  ;;  %v1821_v23 = vadd.f32 %v6100_v59, %v6090_v63  ;;  %v1826_v60 = vmax.f32 %v1670_v22, 1e-20  ;;  %vm8304_vm4 = vnez %v8303_v35  ;;  %1819 = vadd.xlane.f32.xlu0 %v1818_v40  ;;  %v8309_v40 = vld [vmem:[#allocation232_spill] sm:$0xff] }
 0x21b   : > { %8287 = vst [vmem:[#allocation64_spill] sm:$0xff] %v6075_v43  ;;  %v8300_v43 = vld [vmem:[#allocation206_spill] sm:$0xff]  ;;  %v6113_v39 = vsel %vm8304_vm4, %v2991_v0, 0.0  ;;  %2996 = vrcp.f32 %v1828_v12  ;;  %vm8310_vm15 = vnez %v8309_v40  ;;  %v1905_v35 = vand.u32 2147483648, %v1828_v12 }
 0x21c   : > { %8289 = vst [vmem:[#allocation16_spill] sm:$0xff] %v6079_v6  ;;  %vm8301_vm7 = vnez %v8300_v43  ;;  %v1813_v47 = vadd.f32 %v1812_v31, %v6113_v39  ;;  %2998 = vrcp.f32 %v1826_v60  ;;  %v8306_v43 = vld [vmem:[#allocation228_spill] sm:$0xff]  ;;  %v6129_v31 = vsel %vm8310_vm15, %v2995_v3, 0.0  ;;  %v1695_v6 = vpop.xlane.xlu2 %1694 }
 0x21d   : > { %8292 = vst [vmem:[#allocation19_spill] sm:$0xff] %v6084_v50  ;;  %v6105_v58 = vsel %vm8301_vm7, %v5947_v34, 0.0  ;;  %v1685_v34 = vpop.xlane.xlu0 %1684  ;;  %vm8307_vm5 = vnez %v8306_v43  ;;  %vm1899_vm10 = vweird.f32 %v1828_v12  ;;  %v1906_v3 = vor.u32 1.1754944e-38, %v1905_v35 }
 0x21e   : > { %8294 = vst [vmem:[#allocation22_spill] sm:$0xff] %v6090_v63  ;;  %v1808_v16 = vadd.f32 %v1807_v51, %v6105_v58  ;;  %v6118_v1 = vsel %vm8307_vm5, %v2993_v14, 0.0  ;;  %v6120_v51 = vmax.f32 %v1685_v34, 1e-20  ;;  %v1903_v14 = vand.u32 2147483647, %v1828_v12 }
 0x21f   : > { %8297 = vst [vmem:[#allocation23_spill] sm:$0xff] %v6096_v8  ;;  %v1822_v22 = vadd.f32 %v1821_v23, %v6118_v1  ;;  %1814 = vadd.xlane.f32.xlu2 %v1813_v47  ;;  %v1867_v63 = vand.u32 2147483647, %v1826_v60  ;;  %vm1863_vm8 = vweird.f32 %v1826_v60 }
 0x220   : > { %8299 = vst [vmem:[#allocation128_spill] sm:$0xff] %v6100_v59  ;;  %1809 = vadd.xlane.f32.xlu1 %v1808_v16  ;;  %v6123_v59 = vmax.f32 %v1675_v24, 1e-20  ;;  %3000 = vrcp.f32 %v6120_v51  ;;  %v1869_v24 = vand.u32 2147483648, %v1826_v60  ;;  %vm6134_vm3 = vcmp.eq.f32.partialorder %v1903_v14, 8.507059e+37 }
 0x221   : > { %8302 = vst [vmem:[#allocation130_spill] sm:$0xff] %v6105_v58  ;;  %v2997_v0 = vpop.eup %2996  ;;  %v1823_v34 = vadd.f32 %v1822_v22, %v6129_v31  ;;  %vm6138_vm12 = vcmp.eq.f32.partialorder %v1867_v63, 8.507059e+37  ;;  %v1923_v50 = vand.u32 2147483648, %v6120_v51  ;;  %vm1917_vm7 = vweird.f32 %v6120_v51 }
 0x222   : > { %8305 = vst [vmem:[#allocation131_spill] sm:$0xff] %v6113_v39  ;;  %3002 = vrcp.f32 %v6123_v59  ;;  %v2999_v43 = vpop.eup %2998  ;;  %v1895_v16 = vmul.f32 %v2997_v0, %v1828_v12  ;;  %vm1900_vm11 = vweird.f32 %v2997_v0  ;;  %v1870_v14 = vor.u32 1.1754944e-38, %v1869_v24 }
 0x223   : > { %8308 = vst [vmem:[#allocation134_spill] sm:$0xff] %v6118_v1  ;;  %v1859_v23 = vmul.f32 %v2999_v43, %v1826_v60  ;;  %vm1864_vm14 = vweird.f32 %v2999_v43  ;;  %vm1881_vm9 = vweird.f32 %v6123_v59  ;;  %vm1901_vm0 = vmor %vm1899_vm10, %vm1900_vm11  ;;  %v1887_v58 = vand.u32 2147483648, %v6123_v59 }
 0x224   : > { %8311 = vst [vmem:[#allocation143_spill] sm:$0xff] %v6129_v31  ;;  %v1896_v1 = vsub.f32 1.0, %v1895_v16  ;;  %vm1865_vm2 = vmor %vm1863_vm8, %vm1864_vm14 }
 0x225   : > { %v1860_v40 = vsub.f32 1.0, %v1859_v23  ;;  %v1700_v22 = vpop.xlane.xlu0 %1699 }
 0x226   : > { %v6132_v47 = vpop.eup %3000  ;;  %v1897_v8 = vmul.f32 %v2997_v0, %v1896_v1 }
 0x227   : > { %v1913_v16 = vmul.f32 %v6132_v47, %v6120_v51  ;;  %v1861_v31 = vmul.f32 %v2999_v43, %v1860_v40  ;;  %vm1918_vm13 = vweird.f32 %v6132_v47 }
 0x228   : > { %v3003_v39 = vpop.eup %3002  ;;  %1824 = vadd.xlane.f32.xlu1 %v1823_v34  ;;  %v1898_v35 = vadd.f32 %v2997_v0, %v1897_v8  ;;  %v1885_v34 = vand.u32 2147483647, %v6123_v59  ;;  %v1690_v8 = vpop.xlane.xlu1 %1689  ;;  %vm6179_vm5 = vmor %vm1917_vm7, %vm1918_vm13 }
 0x229   : > { %v1877_v18 = vmul.f32 %v3003_v39, %v6123_v59  ;;  %v1914_v1 = vsub.f32 1.0, %v1913_v16  ;;  %v1862_v63 = vadd.f32 %v2999_v43, %v1861_v31  ;;  %vm1882_vm6 = vweird.f32 %v3003_v39  ;;  %v8324_v59 = vld [vmem:[#allocation67_spill] sm:$0xff] }
 0x22a   : > { %v1902_v40 = vsel %vm1901_vm0, %v2997_v0, %v1898_v35  ;;  %v6156_v31 = vmax.f32 %v1690_v8, 1e-20  ;;  %v8318_v0 = vld [vmem:[#allocation65_spill] sm:$0xff]  ;;  %v8319_v35 = vld [vmem:[#allocation68_spill] sm:$0xff]  ;;  %vm1883_vm1 = vmor %vm1881_vm9, %vm1882_vm6  ;;  %vm1886_vm4 = vcmp.eq.f32.partialorder %v1885_v34, 8.507059e+37  ;;  %v1924_v34 = vor.u32 1.1754944e-38, %v1923_v50 }
 0x22b   : > { %v1878_v23 = vsub.f32 1.0, %v1877_v18  ;;  %v1915_v24 = vmul.f32 %v6132_v47, %v1914_v1  ;;  %v1907_v16 = vsel %vm6134_vm3, %v1906_v3, %v1902_v40  ;;  %v1866_v12 = vsel %vm1865_vm2, %v2999_v43, %v1862_v63  ;;  %v8316_v18 = vld [vmem:[#allocation58_spill] sm:$0xff]  ;;  %v8329_v50 = vld [vmem:[#allocation24_spill] sm:$0xff] }
 0x22c   : > { %v1908_v21 = vmul.f32 %v1907_v16, %v8316_v18  ;;  %v1909_v17 = vmul.f32 %v1907_v16, %v8317_v36  ;;  %v1910_v60 = vmul.f32 %v1907_v16, %v8318_v0  ;;  %v1911_v25 = vmul.f32 %v1907_v16, %v8319_v35  ;;  %v8320_v36 = vld [vmem:[#allocation60_spill] sm:$0xff] }
 0x22d   : > { %v1879_v13 = vmul.f32 %v3003_v39, %v1878_v23  ;;  %v1871_v1 = vsel %vm6138_vm12, %v1870_v14, %v1866_v12  ;;  %v1916_v7 = vadd.f32 %v6132_v47, %v1915_v24  ;;  %3004 = vrcp.f32 %v6156_v31  ;;  %v8321_v14 = vld [vmem:[#allocation61_spill] sm:$0xff]  ;;  %v8326_v24 = vld [vmem:[#allocation28_spill] sm:$0xff] }
 0x22e   : > { %2442 = vst [vmem:[%s6166_s19 + $0x40] sm:$0xff] %v1908_v21  ;;  %v1872_v43 = vmul.f32 %v1871_v1, %v8320_v36  ;;  %v1888_v3 = vor.u32 1.1754944e-38, %v1887_v58  ;;  %v1873_v63 = vmul.f32 %v1871_v1, %v8321_v14  ;;  %v1874_v58 = vmul.f32 %v1871_v1, %v8324_v59  ;;  %v8327_v12 = vld [vmem:[#allocation17_spill] sm:$0xff]  ;;  %v1715_v21 = vpop.xlane.xlu0 %1714 }
 0x22f   : > { %v1880_v20 = vadd.f32 %v3003_v39, %v1879_v13  ;;  %v1921_v13 = vand.u32 2147483647, %v6120_v51  ;;  %2443 = vst [vmem:[%s6166_s19 + $0x48] sm:$0xff] %v1909_v17  ;;  %v1920_v17 = vsel %vm6179_vm5, %v6132_v47, %v1916_v7  ;;  %v6188_v51 = vmax.f32 %v1695_v6, 1e-20  ;;  %v8328_v7 = vld [vmem:[#allocation18_spill] sm:$0xff] }
 0x230   : > { %2444 = vst [vmem:[%s6166_s19 + $0x50] sm:$0xff] %v1910_v60  ;;  %v6202_v35 = vmax.f32 %v1700_v22, 1e-20  ;;  %v1941_v14 = vand.u32 2147483648, %v6156_v31  ;;  %vm1935_vm3 = vweird.f32 %v6156_v31 }
 0x231   : > { %v1884_v23 = vsel %vm1883_vm1, %v3003_v39, %v1880_v20  ;;  %2445 = vst [vmem:[%s6166_s19 + $0x58] sm:$0xff] %v1911_v25  ;;  %v8325_v20 = vld [vmem:[#allocation69_spill] sm:$0xff]  ;;  %vm1922_vm15 = vcmp.eq.f32.partialorder %v1921_v13, 8.507059e+37  ;;  %3006 = vrcp.f32 %v6188_v51  ;;  %v1939_v13 = vand.u32 2147483647, %v6156_v31 }
 0x232   : > { %v1889_v40 = vsel %vm1886_vm4, %v1888_v3, %v1884_v23  ;;  %v1875_v39 = vmul.f32 %v1871_v1, %v8325_v20  ;;  %2434 = vst [vmem:[%s6166_s19] sm:$0xff] %v1872_v43  ;;  %v1925_v0 = vsel %vm1922_vm15, %v1924_v34, %v1920_v17  ;;  %v8330_v1 = vld [vmem:[#allocation25_spill] sm:$0xff]  ;;  %v8331_v43 = vld [vmem:[#allocation27_spill] sm:$0xff]  ;;  %3008 = vrcp.f32 %v6202_v35  ;;  %v1705_v20 = vpop.xlane.xlu1 %1704 }
 0x233   : > { %v1890_v8 = vmul.f32 %v1889_v40, %v8326_v24  ;;  %v3005_v16 = vpop.eup %3004  ;;  %2435 = vst [vmem:[%s6166_s19 + $0x8] sm:$0xff] %v1873_v63  ;;  %v1891_v18 = vmul.f32 %v1889_v40, %v8327_v12  ;;  %v1892_v25 = vmul.f32 %v1889_v40, %v8328_v7  ;;  %v1893_v60 = vmul.f32 %v1889_v40, %v8329_v50  ;;  %v8332_v63 = vld [vmem:[#allocation30_spill] sm:$0xff] }
 0x234   : > { %2436 = vst [vmem:[%s6166_s19 + $0x10] sm:$0xff] %v1874_v58  ;;  %v1931_v47 = vmul.f32 %v3005_v16, %v6156_v31  ;;  %v1926_v6 = vmul.f32 %v1925_v0, %v8330_v1  ;;  %v1927_v3 = vmul.f32 %v1925_v0, %v8331_v43  ;;  %v1928_v23 = vmul.f32 %v1925_v0, %v8332_v63  ;;  %v8333_v58 = vld [vmem:[#allocation34_spill] sm:$0xff] }
 0x235   : > { %2437 = vst [vmem:[%s6166_s19 + $0x18] sm:$0xff] %v1875_v39  ;;  %vm1936_vm10 = vweird.f32 %v3005_v16  ;;  %v1929_v40 = vmul.f32 %v1925_v0, %v8333_v58  ;;  %v1957_v17 = vand.u32 2147483647, %v6188_v51  ;;  %v6219_v39 = vmax.f32 %v1715_v21, 1e-20  ;;  %v1710_v0 = vpop.xlane.xlu2 %1709  ;;  %v8337_v43 = vld [vmem:[#allocation26_spill] sm:$0xff] }
 0x236   : > { %2438 = vst [vmem:[%s6166_s19 + $0x20] sm:$0xff] %v1890_v8  ;;  %v1932_v36 = vsub.f32 1.0, %v1931_v47  ;;  %v1959_v8 = vand.u32 2147483648, %v6188_v51  ;;  %v6225_v12 = vmax.f32 %v1705_v20, 1e-20  ;;  %vm1937_vm8 = vmor %vm1935_vm3, %vm1936_vm10  ;;  %vm1940_vm11 = vcmp.eq.f32.partialorder %v1939_v13, 8.507059e+37 }
 0x237   : > { %2439 = vst [vmem:[%s6166_s19 + $0x28] sm:$0xff] %v1891_v18  ;;  %v6213_v59 = vpop.eup %3006  ;;  %v1942_v31 = vor.u32 1.1754944e-38, %v1941_v14  ;;  %v1975_v18 = vand.u32 2147483647, %v6202_v35  ;;  %3010 = vrcp.f32 %v6219_v39  ;;  %v1977_v47 = vand.u32 2147483648, %v6202_v35  ;;  %v8338_v13 = vld [vmem:[#allocation29_spill] sm:$0xff] }
 0x238   : > { %2440 = vst [vmem:[%s6166_s19 + $0x30] sm:$0xff] %v1892_v25  ;;  %v1933_v22 = vmul.f32 %v3005_v16, %v1932_v36  ;;  %v1949_v24 = vmul.f32 %v6213_v59, %v6188_v51  ;;  %3012 = vrcp.f32 %v6225_v12  ;;  %v6234_v50 = vpop.eup %3008  ;;  %vm1953_vm12 = vweird.f32 %v6188_v51 }
 0x239   : > { %2441 = vst [vmem:[%s6166_s19 + $0x38] sm:$0xff] %v1893_v60  ;;  %vm6238_vm14 = vcmp.eq.f32.partialorder %v1957_v17, 8.507059e+37  ;;  %v1960_v63 = vor.u32 1.1754944e-38, %v1959_v8  ;;  %vm1954_vm9 = vweird.f32 %v6213_v59  ;;  %v1967_v58 = vmul.f32 %v6234_v50, %v6202_v35 }
 0x23a   : > { %2446 = vst [vmem:[%s6166_s19 + $0x60] sm:$0xff] %v1926_v6  ;;  %v1934_v34 = vadd.f32 %v3005_v16, %v1933_v22  ;;  %v1950_v25 = vsub.f32 1.0, %v1949_v24  ;;  %v6242_v6 = vmax.f32 %v1710_v0, 1e-20  ;;  %vm1971_vm0 = vweird.f32 %v6202_v35  ;;  %vm1955_vm13 = vmor %vm1953_vm12, %vm1954_vm9 }
 0x23b   : > { %2447 = vst [vmem:[%s6166_s19 + $0x68] sm:$0xff] %v1927_v3  ;;  %vm6254_vm2 = vcmp.eq.f32.partialorder %v1975_v18, 8.507059e+37  ;;  %v1978_v17 = vor.u32 1.1754944e-38, %v1977_v47  ;;  %v1968_v24 = vsub.f32 1.0, %v1967_v58  ;;  %vm2025_vm6 = vweird.f32 %v6219_v39  ;;  %v8345_v58 = vld [vmem:[#allocation83_spill] sm:$0xff] }
 0x23c   : > { %2448 = vst [vmem:[%s6166_s19 + $0x70] sm:$0xff] %v1928_v23  ;;  %v1938_v7 = vsel %vm1937_vm8, %v3005_v16, %v1934_v34  ;;  %v8336_v16 = vld [vmem:[#allocation21_spill] sm:$0xff]  ;;  %v8339_v23 = vld [vmem:[#allocation31_spill] sm:$0xff]  ;;  %v1951_v21 = vmul.f32 %v6213_v59, %v1950_v25  ;;  %3014 = vrcp.f32 %v6242_v6  ;;  %v2029_v8 = vand.u32 2147483647, %v6219_v39 }
 0x23d   : > { %2449 = vst [vmem:[%s6166_s19 + $0x78] sm:$0xff] %v1929_v40  ;;  %v1943_v60 = vsel %vm1940_vm11, %v1942_v31, %v1938_v7  ;;  %v6259_v20 = vpop.eup %3010  ;;  %v1993_v18 = vand.u32 2147483647, %v6225_v12  ;;  %v1995_v0 = vand.u32 2147483648, %v6225_v12  ;;  %v2031_v25 = vand.u32 2147483648, %v6219_v39 }
 0x23e   : > { %v1944_v36 = vmul.f32 %v1943_v60, %v8336_v16  ;;  %v1945_v3 = vmul.f32 %v1943_v60, %v8337_v43  ;;  %v1946_v14 = vmul.f32 %v1943_v60, %v8338_v13  ;;  %v1947_v22 = vmul.f32 %v1943_v60, %v8339_v23  ;;  %v6265_v31 = vpop.eup %3012  ;;  %v8342_v13 = vld [vmem:[#allocation35_spill] sm:$0xff] }
 0x23f   : > { %v1952_v34 = vadd.f32 %v6213_v59, %v1951_v21  ;;  %v2021_v7 = vmul.f32 %v6259_v20, %v6219_v39  ;;  %v1969_v60 = vmul.f32 %v6234_v50, %v1968_v24  ;;  %vm1972_vm1 = vweird.f32 %v6234_v50  ;;  %v1730_v24 = vpop.xlane.xlu0 %1729 }
 0x240   : > { %2450 = vst [vmem:[%s6166_s19 + $0x80] sm:$0xff] %v1944_v36  ;;  %v1985_v51 = vmul.f32 %v6265_v31, %v6225_v12  ;;  %vm1989_vm7 = vweird.f32 %v6225_v12  ;;  %v2011_v36 = vand.u32 2147483647, %v6242_v6  ;;  %v2013_v43 = vand.u32 2147483648, %v6242_v6  ;;  %vm1973_vm4 = vmor %vm1971_vm0, %vm1972_vm1 }
 0x241   : > { %2451 = vst [vmem:[%s6166_s19 + $0x88] sm:$0xff] %v1945_v3  ;;  %v1956_v47 = vsel %vm1955_vm13, %v6213_v59, %v1952_v34  ;;  %v2022_v3 = vsub.f32 1.0, %v2021_v7  ;;  %v1970_v1 = vadd.f32 %v6234_v50, %v1969_v60  ;;  %v6296_v55 = vmax.f32 %v1730_v24, 1e-20  ;;  %v8353_v60 = vld [vmem:[#allocation94_spill] sm:$0xff] }
 0x242   : > { %2452 = vst [vmem:[%s6166_s19 + $0x90] sm:$0xff] %v1946_v14  ;;  %v1961_v16 = vsel %vm6238_vm14, %v1960_v63, %v1956_v47  ;;  %v8343_v14 = vld [vmem:[#allocation77_spill] sm:$0xff]  ;;  %v6292_v33 = vpop.eup %3014  ;;  %v1986_v63 = vsub.f32 1.0, %v1985_v51  ;;  %vm2026_vm5 = vweird.f32 %v6259_v20  ;;  %vm6306_vm15 = vcmp.eq.f32.partialorder %v2029_v8, 8.507059e+37 }
 0x243   : > { %2453 = vst [vmem:[%s6166_s19 + $0x98] sm:$0xff] %v1947_v22  ;;  %v1962_v59 = vmul.f32 %v1961_v16, %v8342_v13  ;;  %v1963_v23 = vmul.f32 %v1961_v16, %v8343_v14  ;;  %v8344_v22 = vld [vmem:[#allocation81_spill] sm:$0xff]  ;;  %v1965_v34 = vmul.f32 %v1961_v16, %v8345_v58  ;;  %v2023_v47 = vmul.f32 %v6259_v20, %v2022_v3  ;;  %v8350_v58 = vld [vmem:[#allocation82_spill] sm:$0xff]  ;;  %vm2027_vm3 = vmor %vm2025_vm6, %vm2026_vm5 }
 0x244   : > { %v1964_v21 = vmul.f32 %v1961_v16, %v8344_v22  ;;  %v2003_v7 = vmul.f32 %v6292_v33, %v6242_v6  ;;  %v2032_v51 = vor.u32 1.1754944e-38, %v2031_v25  ;;  %v1720_v16 = vpop.xlane.xlu1 %1719  ;;  %v1974_v3 = vsel %vm1973_vm4, %v6234_v50, %v1970_v1  ;;  %v8348_v25 = vld [vmem:[#allocation75_spill] sm:$0xff]  ;;  %v8351_v1 = vld [vmem:[#allocation20_spill] sm:$0xff] }
 0x245   : > { %2454 = vst [vmem:[%s6166_s19 + $0xa0] sm:$0xff] %v1962_v59  ;;  %v1987_v13 = vmul.f32 %v6265_v31, %v1986_v63  ;;  %v2024_v35 = vadd.f32 %v6259_v20, %v2023_v47  ;;  %v6314_v59 = vmax.f32 %v1720_v16, 1e-20  ;;  %v1979_v14 = vsel %vm6254_vm2, %v1978_v17, %v1974_v3  ;;  %v1725_v3 = vpop.xlane.xlu2 %1724 }
 0x246   : > { %2455 = vst [vmem:[%s6166_s19 + $0xa8] sm:$0xff] %v1963_v23  ;;  %vm1990_vm10 = vweird.f32 %v6265_v31  ;;  %v2004_v8 = vsub.f32 1.0, %v2003_v7  ;;  %3016 = vrcp.f32 %v6296_v55  ;;  %v1980_v50 = vmul.f32 %v1979_v14, %v8348_v25  ;;  %v8349_v23 = vld [vmem:[#allocation76_spill] sm:$0xff] }
 0x247   : > { %2456 = vst [vmem:[%s6166_s19 + $0xb0] sm:$0xff] %v1964_v21  ;;  %v1981_v22 = vmul.f32 %v1979_v14, %v8349_v23  ;;  %v1982_v24 = vmul.f32 %v1979_v14, %v8350_v58  ;;  %v1983_v63 = vmul.f32 %v1979_v14, %v8351_v1  ;;  %v1988_v40 = vadd.f32 %v6265_v31, %v1987_v13  ;;  %vm1991_vm8 = vmor %vm1989_vm7, %vm1990_vm10  ;;  %v8355_v13 = vld [vmem:[#allocation33_spill] sm:$0xff]  ;;  %v8357_v58 = vld [vmem:[#allocation39_spill] sm:$0xff] }
 0x248   : > { %2457 = vst [vmem:[%s6166_s19 + $0xb8] sm:$0xff] %v1965_v34  ;;  %v2005_v17 = vmul.f32 %v6292_v33, %v2004_v8  ;;  %v2028_v21 = vsel %vm2027_vm3, %v6259_v20, %v2024_v35  ;;  %3018 = vrcp.f32 %v6314_v59  ;;  %v1996_v34 = vor.u32 1.1754944e-38, %v1995_v0  ;;  %v8352_v20 = vld [vmem:[#allocation84_spill] sm:$0xff]  ;;  %v8356_v8 = vld [vmem:[#allocation38_spill] sm:$0xff]  ;;  %v8358_v1 = vld [vmem:[#allocation41_spill] sm:$0xff] }
 0x249   : > { %2458 = vst [vmem:[%s6166_s19 + $0xc0] sm:$0xff] %v1980_v50  ;;  %vm2008_vm11 = vweird.f32 %v6292_v33  ;;  %v2033_v39 = vsel %vm6306_vm15, %v2032_v51, %v2028_v21  ;;  %v1992_v47 = vsel %vm1991_vm8, %v6265_v31, %v1988_v40  ;;  %vm1994_vm12 = vcmp.eq.f32.partialorder %v1993_v18, 8.507059e+37  ;;  %v8354_v31 = vld [vmem:[#allocation32_spill] sm:$0xff]  ;;  %v1745_v21 = vpop.xlane.xlu0 %1744 }
 0x24a   : > { %2459 = vst [vmem:[%s6166_s19 + $0xc8] sm:$0xff] %v1981_v22  ;;  %v2006_v7 = vadd.f32 %v6292_v33, %v2005_v17  ;;  %v2034_v16 = vmul.f32 %v2033_v39, %v8352_v20  ;;  %v1997_v12 = vsel %vm1994_vm12, %v1996_v34, %v1992_v47  ;;  %vm2007_vm14 = vweird.f32 %v6242_v6  ;;  %v8360_v34 = vld [vmem:[#allocation45_spill] sm:$0xff] }
 0x24b   : > { %2460 = vst [vmem:[%s6166_s19 + $0xd0] sm:$0xff] %v1982_v24  ;;  %vm2012_vm9 = vcmp.eq.f32.partialorder %v2011_v36, 8.507059e+37  ;;  %v1998_v51 = vmul.f32 %v1997_v12, %v8353_v60  ;;  %v1999_v18 = vmul.f32 %v1997_v12, %v8354_v31  ;;  %v2000_v35 = vmul.f32 %v1997_v12, %v8355_v13  ;;  %vm2009_vm0 = vmor %vm2007_vm14, %vm2008_vm11 }
 0x24c   : > { %v6346_v0 = vpop.eup %3016  ;;  %2461 = vst [vmem:[%s6166_s19 + $0xd8] sm:$0xff] %v1983_v63  ;;  %v2014_v14 = vor.u32 1.1754944e-38, %v2013_v43  ;;  %v2001_v25 = vmul.f32 %v1997_v12, %v8356_v8  ;;  %v2010_v6 = vsel %vm2009_vm0, %v6292_v33, %v2006_v7  ;;  %v6357_v36 = vmax.f32 %v1725_v3, 1e-20  ;;  %v8359_v33 = vld [vmem:[#allocation42_spill] sm:$0xff]  ;;  %v8361_v7 = vld [vmem:[#allocation88_spill] sm:$0xff] }
 0x24d   : > { %2470 = vst [vmem:[%s6166_s19 + $0x120] sm:$0xff] %v2034_v16  ;;  %v2075_v50 = vmul.f32 %v6346_v0, %v6296_v55  ;;  %vm2079_vm2 = vweird.f32 %v6296_v55  ;;  %v2047_v17 = vand.u32 2147483647, %v6314_v59  ;;  %v2035_v20 = vmul.f32 %v2033_v39, %v8361_v7  ;;  %v8362_v12 = vld [vmem:[#allocation89_spill] sm:$0xff] }
 0x24e   : > { %v3019_v23 = vpop.eup %3018  ;;  %2462 = vst [vmem:[%s6166_s19 + $0xe0] sm:$0xff] %v1998_v51  ;;  %v2015_v22 = vsel %vm2012_vm9, %v2014_v14, %v2010_v6  ;;  %3020 = vrcp.f32 %v6357_v36  ;;  %v2049_v16 = vand.u32 2147483648, %v6314_v59  ;;  %v2036_v60 = vmul.f32 %v2033_v39, %v8362_v12 }
 0x24f   : > { %2463 = vst [vmem:[%s6166_s19 + $0xe8] sm:$0xff] %v1999_v18  ;;  %v2016_v24 = vmul.f32 %v2015_v22, %v8357_v58  ;;  %v2017_v43 = vmul.f32 %v2015_v22, %v8358_v1  ;;  %v2018_v63 = vmul.f32 %v2015_v22, %v8359_v33  ;;  %v2039_v40 = vmul.f32 %v3019_v23, %v6314_v59  ;;  %v1735_v18 = vpop.xlane.xlu1 %1734 }
 0x250   : > { %2464 = vst [vmem:[%s6166_s19 + $0xf0] sm:$0xff] %v2000_v35  ;;  %v2019_v47 = vmul.f32 %v2015_v22, %v8360_v34  ;;  %v2076_v3 = vsub.f32 1.0, %v2075_v50  ;;  %v2085_v31 = vand.u32 2147483648, %v6296_v55  ;;  %v6378_v13 = vmax.f32 %v1745_v21, 1e-20 }
 0x251   : > { %2465 = vst [vmem:[%s6166_s19 + $0xf8] sm:$0xff] %v2001_v25  ;;  %v2040_v51 = vsub.f32 1.0, %v2039_v40  ;;  %vm2080_vm6 = vweird.f32 %v6346_v0  ;;  %v2083_v14 = vand.u32 2147483647, %v6296_v55  ;;  %v6384_v8 = vmax.f32 %v1735_v18, 1e-20 }
 0x252   : > { %2466 = vst [vmem:[%s6166_s19 + $0x100] sm:$0xff] %v2016_v24  ;;  %v2077_v35 = vmul.f32 %v6346_v0, %v2076_v3  ;;  %v8363_v25 = vld [vmem:[#allocation93_spill] sm:$0xff]  ;;  %vm2044_vm13 = vweird.f32 %v3019_v23  ;;  %3022 = vrcp.f32 %v6378_v13  ;;  %vm2043_vm1 = vweird.f32 %v6314_v59  ;;  %v1740_v24 = vpop.xlane.xlu2 %1739  ;;  %vm2081_vm4 = vmor %vm2079_vm2, %vm2080_vm6 }
 0x253   : > { %2467 = vst [vmem:[%s6166_s19 + $0x108] sm:$0xff] %v2017_v43  ;;  %v2037_v6 = vmul.f32 %v2033_v39, %v8363_v25  ;;  %v2041_v50 = vmul.f32 %v3019_v23, %v2040_v51  ;;  %vm6391_vm7 = vcmp.eq.f32.partialorder %v2047_v17, 8.507059e+37  ;;  %3024 = vrcp.f32 %v6384_v8  ;;  %vm2045_vm5 = vmor %vm2043_vm1, %vm2044_vm13  ;;  %v8366_v51 = vld [vmem:[#allocation47_spill] sm:$0xff] }
 0x254   : > { %2468 = vst [vmem:[%s6166_s19 + $0x110] sm:$0xff] %v2018_v63  ;;  %v2078_v58 = vadd.f32 %v6346_v0, %v2077_v35  ;;  %v3021_v1 = vpop.eup %3020  ;;  %v2050_v43 = vor.u32 1.1754944e-38, %v2049_v16  ;;  %v2086_v59 = vor.u32 1.1754944e-38, %v2085_v31  ;;  %v6402_v33 = vmax.f32 %v1740_v24, 1e-20  ;;  %v8371_v24 = vld [vmem:[#allocation44_spill] sm:$0xff] }
 0x255   : > { %2469 = vst [vmem:[%s6166_s19 + $0x118] sm:$0xff] %v2019_v47  ;;  %v2042_v39 = vadd.f32 %v3019_v23, %v2041_v50  ;;  %v2057_v63 = vmul.f32 %v3021_v1, %v6357_v36  ;;  %v2065_v40 = vand.u32 2147483647, %v6357_v36  ;;  %vm2084_vm15 = vcmp.eq.f32.partialorder %v2083_v14, 8.507059e+37 }
 0x256   : > { %2471 = vst [vmem:[%s6166_s19 + $0x128] sm:$0xff] %v2035_v20  ;;  %v2082_v17 = vsel %vm2081_vm4, %v6346_v0, %v2078_v58  ;;  %v2067_v34 = vand.u32 2147483648, %v6357_v36  ;;  %3026 = vrcp.f32 %v6402_v33  ;;  %vm2061_vm10 = vweird.f32 %v6357_v36 }
 0x257   : > { %2472 = vst [vmem:[%s6166_s19 + $0x130] sm:$0xff] %v2036_v60  ;;  %v2046_v21 = vsel %vm2045_vm5, %v3019_v23, %v2042_v39  ;;  %v2087_v47 = vsel %vm2084_vm15, %v2086_v59, %v2082_v17  ;;  %v2058_v7 = vsub.f32 1.0, %v2057_v63  ;;  %v2101_v12 = vand.u32 2147483647, %v6384_v8  ;;  %v1760_v36 = vpop.xlane.xlu0 %1759 }
 0x258   : > { %2473 = vst [vmem:[%s6166_s19 + $0x138] sm:$0xff] %v2037_v6  ;;  %v2051_v55 = vsel %vm6391_vm7, %v2050_v43, %v2046_v21  ;;  %v2088_v20 = vmul.f32 %v2087_v47, %v5457_v57  ;;  %v6416_v16 = vpop.eup %3022  ;;  %vm2062_vm3 = vweird.f32 %v3021_v1  ;;  %vm6423_vm8 = vcmp.eq.f32.partialorder %v2065_v40, 8.507059e+37  ;;  %v8370_v6 = vld [vmem:[#allocation43_spill] sm:$0xff] }
 0x259   : > { %v2052_v0 = vmul.f32 %v2051_v55, %v5479_v45  ;;  %v2053_v23 = vmul.f32 %v2051_v55, %v5486_v56  ;;  %v2054_v3 = vmul.f32 %v2051_v55, %v5491_v5  ;;  %v3025_v60 = vpop.eup %3024  ;;  %v2055_v31 = vmul.f32 %v2051_v55, %v8366_v51  ;;  %v8369_v45 = vld [vmem:[#allocation48_spill] sm:$0xff]  ;;  %vm2063_vm14 = vmor %vm2061_vm10, %vm2062_vm3 }
 0x25a   : > { %v2059_v18 = vmul.f32 %v3021_v1, %v2058_v7  ;;  %2482 = vst [vmem:[%s6166_s19 + $0x180] sm:$0xff] %v2088_v20  ;;  %v2068_v57 = vor.u32 1.1754944e-38, %v2067_v34  ;;  %v2089_v14 = vmul.f32 %v2087_v47, %v8369_v45  ;;  %v2093_v56 = vmul.f32 %v3025_v60, %v6384_v8  ;;  %v1750_v7 = vpop.xlane.xlu1 %1749 }
 0x25b   : > { %2474 = vst [vmem:[%s6166_s19 + $0x140] sm:$0xff] %v2052_v0  ;;  %v2137_v5 = vand.u32 2147483647, %v6378_v13  ;;  %v2090_v50 = vmul.f32 %v2087_v47, %v8370_v6  ;;  %vm2097_vm11 = vweird.f32 %v6384_v8  ;;  %v2129_v22 = vmul.f32 %v6416_v16, %v6378_v13  ;;  %v8374_v0 = vld [vmem:[#allocation49_spill] sm:$0xff] }
 0x25c   : > { %2475 = vst [vmem:[%s6166_s19 + $0x148] sm:$0xff] %v2053_v23  ;;  %v2060_v25 = vadd.f32 %v3021_v1, %v2059_v18  ;;  %vm2133_vm12 = vweird.f32 %v6378_v13  ;;  %v6438_v58 = vpop.eup %3026  ;;  %v2091_v39 = vmul.f32 %v2087_v47, %v8371_v24  ;;  %v2094_v43 = vsub.f32 1.0, %v2093_v56  ;;  %v8375_v23 = vld [vmem:[#allocation90_spill] sm:$0xff] }
 0x25d   : > { %2476 = vst [vmem:[%s6166_s19 + $0x150] sm:$0xff] %v2054_v3  ;;  %vm6445_vm9 = vcmp.eq.f32.partialorder %v2101_v12, 8.507059e+37  ;;  %v2103_v63 = vand.u32 2147483648, %v6384_v8  ;;  %vm2098_vm0 = vweird.f32 %v3025_v60  ;;  %v2111_v17 = vmul.f32 %v6438_v58, %v6402_v33  ;;  %v8376_v12 = vld [vmem:[#allocation92_spill] sm:$0xff] }
 0x25e   : > { %2477 = vst [vmem:[%s6166_s19 + $0x158] sm:$0xff] %v2055_v31  ;;  %v2064_v40 = vsel %vm2063_vm14, %v3021_v1, %v2060_v25  ;;  %v2130_v21 = vsub.f32 1.0, %v2129_v22  ;;  %v2095_v47 = vmul.f32 %v3025_v60, %v2094_v43  ;;  %v2139_v55 = vand.u32 2147483648, %v6378_v13  ;;  %v8377_v31 = vld [vmem:[#allocation95_spill] sm:$0xff]  ;;  %vm2099_vm2 = vmor %vm2097_vm11, %vm2098_vm0 }
 0x25f   : > { %v2069_v34 = vsel %vm6423_vm8, %v2068_v57, %v2064_v40  ;;  %2483 = vst [vmem:[%s6166_s19 + $0x188] sm:$0xff] %v2089_v14  ;;  %v6457_v20 = vmax.f32 %v1760_v36, 1e-20  ;;  %v2112_v57 = vsub.f32 1.0, %v2111_v17  ;;  %v6466_v14 = vmax.f32 %v1750_v7, 1e-20 }
 0x260   : > { %v2070_v1 = vmul.f32 %v2069_v34, %v8374_v0  ;;  %v2071_v3 = vmul.f32 %v2069_v34, %v8375_v23  ;;  %v2072_v51 = vmul.f32 %v2069_v34, %v8376_v12  ;;  %v2073_v18 = vmul.f32 %v2069_v34, %v8377_v31  ;;  %2484 = vst [vmem:[%s6166_s19 + $0x190] sm:$0xff] %v2090_v50  ;;  %v8378_v36 = vld [vmem:[#allocation105_spill] sm:$0xff]  ;;  %v8381_v23 = vld [vmem:[#allocation96_spill] sm:$0xff] }
 0x261   : > { %2485 = vst [vmem:[%s6166_s19 + $0x198] sm:$0xff] %v2091_v39  ;;  %v2096_v35 = vadd.f32 %v3025_v60, %v2095_v47  ;;  %v2131_v45 = vmul.f32 %v6416_v16, %v2130_v21  ;;  %v2104_v56 = vor.u32 1.1754944e-38, %v2103_v63  ;;  %v2121_v25 = vand.u32 2147483648, %v6402_v33  ;;  %v1755_v39 = vpop.xlane.xlu2 %1754  ;;  %v8379_v47 = vld [vmem:[#allocation106_spill] sm:$0xff]  ;;  %v8380_v7 = vld [vmem:[#allocation53_spill] sm:$0xff] }
 0x262   : > { %2478 = vst [vmem:[%s6166_s19 + $0x160] sm:$0xff] %v2070_v1  ;;  %vm2134_vm6 = vweird.f32 %v6416_v16  ;;  %3028 = vrcp.f32 %v6457_v20  ;;  %v2113_v50 = vmul.f32 %v6438_v58, %v2112_v57  ;;  %vm2116_vm13 = vweird.f32 %v6438_v58 }
 0x263   : > { %2479 = vst [vmem:[%s6166_s19 + $0x168] sm:$0xff] %v2071_v3  ;;  %v2100_v6 = vsel %vm2099_vm2, %v3025_v60, %v2096_v35  ;;  %v2132_v22 = vadd.f32 %v6416_v16, %v2131_v45  ;;  %3030 = vrcp.f32 %v6466_v14  ;;  %v2119_v24 = vand.u32 2147483647, %v6402_v33  ;;  %vm2135_vm7 = vmor %vm2133_vm12, %vm2134_vm6 }
 0x264   : > { %2480 = vst [vmem:[%s6166_s19 + $0x170] sm:$0xff] %v2072_v51  ;;  %v2105_v8 = vsel %vm6445_vm9, %v2104_v56, %v2100_v6  ;;  %vm2138_vm1 = vcmp.eq.f32.partialorder %v2137_v5, 8.507059e+37  ;;  %v2140_v59 = vor.u32 1.1754944e-38, %v2139_v55  ;;  %v2114_v5 = vadd.f32 %v6438_v58, %v2113_v50  ;;  %v8383_v56 = vld [vmem:[#allocation102_spill] sm:$0xff] }
 0x265   : > { %2481 = vst [vmem:[%s6166_s19 + $0x178] sm:$0xff] %v2073_v18  ;;  %v2106_v60 = vmul.f32 %v2105_v8, %v5589_v53  ;;  %v2107_v43 = vmul.f32 %v2105_v8, %v5594_v4  ;;  %v2108_v63 = vmul.f32 %v2105_v8, %v5599_v52  ;;  %v2109_v40 = vmul.f32 %v2105_v8, %v5607_v42  ;;  %v8382_v18 = vld [vmem:[#allocation101_spill] sm:$0xff] }
 0x266   : > { %vm2115_vm4 = vweird.f32 %v6402_v33  ;;  %v2136_v53 = vsel %vm2135_vm7, %v6416_v16, %v2132_v22  ;;  %v2122_v4 = vor.u32 1.1754944e-38, %v2121_v25  ;;  %v6499_v13 = vmax.f32 %v1755_v39, 1e-20 }
 0x267   : > { %2486 = vst [vmem:[%s6166_s19 + $0x1a0] sm:$0xff] %v2106_v60  ;;  %vm2117_vm5 = vmor %vm2115_vm4, %vm2116_vm13  ;;  %v2141_v52 = vsel %vm2138_vm1, %v2140_v59, %v2136_v53  ;;  %vm2120_vm15 = vcmp.eq.f32.partialorder %v2119_v24, 8.507059e+37  ;;  %vm2187_vm10 = vweird.f32 %v6457_v20  ;;  %v2191_v51 = vand.u32 2147483647, %v6457_v20 }
 0x268   : > { %v6501_v17 = vpop.eup %3028  ;;  %2487 = vst [vmem:[%s6166_s19 + $0x1a8] sm:$0xff] %v2107_v43  ;;  %v2118_v42 = vsel %vm2117_vm5, %v6438_v58, %v2114_v5  ;;  %v2142_v33 = vmul.f32 %v2141_v52, %v5565_v9  ;;  %3032 = vrcp.f32 %v6499_v13  ;;  %v2155_v9 = vand.u32 2147483647, %v6466_v14  ;;  %v1775_v31 = vpop.xlane.xlu0 %1774 }
 0x269   : > { %v3031_v21 = vpop.eup %3030  ;;  %2488 = vst [vmem:[%s6166_s19 + $0x1b0] sm:$0xff] %v2108_v63  ;;  %v2123_v16 = vsel %vm2120_vm15, %v2122_v4, %v2118_v42  ;;  %v2143_v3 = vmul.f32 %v2141_v52, %v8381_v23  ;;  %v2183_v12 = vmul.f32 %v6501_v17, %v6457_v20  ;;  %v2157_v57 = vand.u32 2147483648, %v6466_v14 }
 0x26a   : > { %2489 = vst [vmem:[%s6166_s19 + $0x1b8] sm:$0xff] %v2109_v40  ;;  %v2124_v34 = vmul.f32 %v2123_v16, %v8378_v36  ;;  %v2125_v55 = vmul.f32 %v2123_v16, %v8379_v47  ;;  %v2126_v0 = vmul.f32 %v2123_v16, %v8380_v7  ;;  %v2127_v1 = vmul.f32 %v2123_v16, %v5635_v28  ;;  %v1765_v22 = vpop.xlane.xlu1 %1764 }
 0x26b   : > { %2494 = vst [vmem:[%s6166_s19 + $0x1e0] sm:$0xff] %v2142_v33  ;;  %v2147_v58 = vmul.f32 %v3031_v21, %v6466_v14  ;;  %v2144_v28 = vmul.f32 %v2141_v52, %v8382_v18  ;;  %v6525_v45 = vmax.f32 %v1775_v31, 1e-20  ;;  %v2145_v25 = vmul.f32 %v2141_v52, %v8383_v56 }
 0x26c   : > { %2490 = vst [vmem:[%s6166_s19 + $0x1c0] sm:$0xff] %v2124_v34  ;;  %vm2151_vm3 = vweird.f32 %v6466_v14  ;;  %v2184_v6 = vsub.f32 1.0, %v2183_v12  ;;  %v2193_v50 = vand.u32 2147483648, %v6457_v20  ;;  %vm2152_vm8 = vweird.f32 %v3031_v21 }
 0x26d   : > { %2491 = vst [vmem:[%s6166_s19 + $0x1c8] sm:$0xff] %v2125_v55  ;;  %v2148_v35 = vsub.f32 1.0, %v2147_v58  ;;  %vm6532_vm11 = vcmp.eq.f32.partialorder %v2155_v9, 8.507059e+37  ;;  %v6536_v60 = vmax.f32 %v1765_v22, 1e-20  ;;  %vm2188_vm12 = vweird.f32 %v6501_v17  ;;  %v1770_v59 = vpop.xlane.xlu2 %1769  ;;  %vm2153_vm9 = vmor %vm2151_vm3, %vm2152_vm8 }
 0x26e   : > { %2492 = vst [vmem:[%s6166_s19 + $0x1d0] sm:$0xff] %v2126_v0  ;;  %v3033_v8 = vpop.eup %3032  ;;  %v2185_v63 = vmul.f32 %v6501_v17, %v2184_v6  ;;  %3034 = vrcp.f32 %v6525_v45  ;;  %v2158_v5 = vor.u32 1.1754944e-38, %v2157_v57  ;;  %vm6544_vm14 = vcmp.eq.f32.partialorder %v2191_v51, 8.507059e+37  ;;  %vm2189_vm2 = vmor %vm2187_vm10, %vm2188_vm12  ;;  %v8390_v57 = vld [vmem:[#allocation50_spill] sm:$0xff] }
 0x26f   : > { %2493 = vst [vmem:[%s6166_s19 + $0x1d8] sm:$0xff] %v2127_v1  ;;  %v2149_v24 = vmul.f32 %v3031_v21, %v2148_v35  ;;  %v2165_v43 = vmul.f32 %v3033_v8, %v6499_v13  ;;  %3036 = vrcp.f32 %v6536_v60  ;;  %v2194_v42 = vor.u32 1.1754944e-38, %v2193_v50 }
 0x270   : > { %2495 = vst [vmem:[%s6166_s19 + $0x1e8] sm:$0xff] %v2143_v3  ;;  %v2186_v52 = vadd.f32 %v6501_v17, %v2185_v63  ;;  %v6554_v33 = vmax.f32 %v1770_v59, 1e-20  ;;  %vm2169_vm0 = vweird.f32 %v6499_v13  ;;  %v2173_v36 = vand.u32 2147483647, %v6499_v13 }
 0x271   : > { %2496 = vst [vmem:[%s6166_s19 + $0x1f0] sm:$0xff] %v2144_v28  ;;  %v2150_v40 = vadd.f32 %v3031_v21, %v2149_v24  ;;  %v2166_v4 = vsub.f32 1.0, %v2165_v43  ;;  %v2175_v34 = vand.u32 2147483648, %v6499_v13  ;;  %vm2170_vm6 = vweird.f32 %v3033_v8 }
 0x272   : > { %2497 = vst [vmem:[%s6166_s19 + $0x1f8] sm:$0xff] %v2145_v25  ;;  %v2190_v55 = vsel %vm2189_vm2, %v6501_v17, %v2186_v52  ;;  %v2209_v1 = vand.u32 2147483647, %v6536_v60  ;;  %3038 = vrcp.f32 %v6554_v33  ;;  %vm2171_vm13 = vmor %vm2169_vm0, %vm2170_vm6  ;;  %vm2174_vm1 = vcmp.eq.f32.partialorder %v2173_v36, 8.507059e+37 }
 0x273   : > { %v2154_v16 = vsel %vm2153_vm9, %v3031_v21, %v2150_v40  ;;  %v2167_v47 = vmul.f32 %v3033_v8, %v2166_v4  ;;  %v2195_v23 = vsel %vm6544_vm14, %v2194_v42, %v2190_v55  ;;  %vm2241_vm7 = vweird.f32 %v6525_v45  ;;  %v8393_v40 = vld [vmem:[#allocation66_spill] sm:$0xff] }
 0x274   : > { %v2159_v14 = vsel %vm6532_vm11, %v2158_v5, %v2154_v16  ;;  %v6570_v58 = vpop.eup %3034  ;;  %v2245_v3 = vand.u32 2147483647, %v6525_v45  ;;  %vm2205_vm4 = vweird.f32 %v6536_v60  ;;  %v2211_v13 = vand.u32 2147483648, %v6536_v60 }
 0x275   : > { %v2160_v21 = vmul.f32 %v2159_v14, %v5697_v46  ;;  %v2161_v7 = vmul.f32 %v2159_v14, %v5702_v26  ;;  %v2162_v0 = vmul.f32 %v2159_v14, %v5709_v38  ;;  %v2163_v20 = vmul.f32 %v2159_v14, %v5714_v41  ;;  %v6576_v17 = vpop.eup %3036 }
 0x276   : > { %v2168_v9 = vadd.f32 %v3033_v8, %v2167_v47  ;;  %v2176_v46 = vor.u32 1.1754944e-38, %v2175_v34  ;;  %v2196_v26 = vmul.f32 %v2195_v23, %v5673_v2  ;;  %v2201_v41 = vmul.f32 %v6576_v17, %v6536_v60 }
 0x277   : > { %2498 = vst [vmem:[%s6166_s19 + $0x200] sm:$0xff] %v2160_v21  ;;  %v2237_v2 = vmul.f32 %v6570_v58, %v6525_v45  ;;  %vm6596_vm5 = vcmp.eq.f32.partialorder %v2209_v1, 8.507059e+37  ;;  %v2247_v50 = vand.u32 2147483648, %v6525_v45  ;;  %vm2206_vm15 = vweird.f32 %v6576_v17 }
 0x278   : > { %2499 = vst [vmem:[%s6166_s19 + $0x208] sm:$0xff] %v2161_v7  ;;  %v2172_v38 = vsel %vm2171_vm13, %v3033_v8, %v2168_v9  ;;  %v2202_v25 = vsub.f32 1.0, %v2201_v41  ;;  %v3039_v22 = vpop.eup %3038  ;;  %v8392_v8 = vld [vmem:[#allocation57_spill] sm:$0xff]  ;;  %vm2242_vm10 = vweird.f32 %v6570_v58  ;;  %v2199_v5 = vmul.f32 %v2195_v23, %v8393_v40  ;;  %vm6629_vm8 = vmor %vm2205_vm4, %vm2206_vm15  ;;  %v8398_v9 = vld [vmem:[#allocation8_spill] sm:$0xff] }
 0x279   : > { %2500 = vst [vmem:[%s6166_s19 + $0x210] sm:$0xff] %v2162_v0  ;;  %v2177_v12 = vsel %vm2174_vm1, %v2176_v46, %v2172_v38  ;;  %v1790_v35 = vpop.xlane.xlu0 %1789  ;;  %v2238_v6 = vsub.f32 1.0, %v2237_v2  ;;  %v2219_v63 = vmul.f32 %v3039_v22, %v6554_v33  ;;  %vm6616_vm3 = vcmp.eq.f32.partialorder %v2245_v3, 8.507059e+37  ;;  %vm2243_vm11 = vmor %vm2241_vm7, %vm2242_vm10  ;;  %v8401_v41 = vld [vmem:[#allocation12_spill] sm:$0xff] }
 0x27a   : > { %2501 = vst [vmem:[%s6166_s19 + $0x218] sm:$0xff] %v2163_v20  ;;  %v2178_v51 = vmul.f32 %v2177_v12, %v5724_v62  ;;  %v2179_v31 = vmul.f32 %v2177_v12, %v5729_v54  ;;  %v2180_v18 = vmul.f32 %v2177_v12, %v5737_v37  ;;  %v2181_v56 = vmul.f32 %v2177_v12, %v8390_v57  ;;  %v8391_v62 = vld [vmem:[#allocation54_spill] sm:$0xff]  ;;  %v8407_v40 = vld [vmem:[#allocation56_spill] sm:$0xff] }
 0x27b   : > { %2506 = vst [vmem:[%s6166_s19 + $0x240] sm:$0xff] %v2196_v26  ;;  %v2197_v54 = vmul.f32 %v2195_v23, %v8391_v62  ;;  %v2198_v37 = vmul.f32 %v2195_v23, %v8392_v8  ;;  %v1780_v24 = vpop.xlane.xlu1 %1779  ;;  %v6607_v39 = vmax.f32 %v1790_v35, 1e-20  ;;  %v2203_v43 = vmul.f32 %v6576_v17, %v2202_v25  ;;  %v8400_v26 = vld [vmem:[#allocation13_spill] sm:$0xff]  ;;  %v8404_v62 = vld [vmem:[#allocation14_spill] sm:$0xff]  ;;  %v8405_v8 = vld [vmem:[#allocation15_spill] sm:$0xff] }
 0x27c   : > { %2502 = vst [vmem:[%s6166_s19 + $0x220] sm:$0xff] %v2178_v51  ;;  %v2239_v59 = vmul.f32 %v6570_v58, %v2238_v6  ;;  %v6620_v4 = vmax.f32 %v1780_v24, 1e-20  ;;  %v2220_v36 = vsub.f32 1.0, %v2219_v63  ;;  %v2212_v47 = vor.u32 1.1754944e-38, %v2211_v13  ;;  %v8402_v51 = vld [vmem:[#allocation51_spill] sm:$0xff] }
 0x27d   : > { %2503 = vst [vmem:[%s6166_s19 + $0x228] sm:$0xff] %v2179_v31  ;;  %3040 = vrcp.f32 %v6607_v39  ;;  %v2204_v42 = vadd.f32 %v6576_v17, %v2203_v43  ;;  %v2229_v55 = vand.u32 2147483648, %v6554_v33  ;;  %v2248_v60 = vor.u32 1.1754944e-38, %v2247_v50  ;;  %v8403_v50 = vld [vmem:[#allocation11_spill] sm:$0xff] }
 0x27e   : > { %2504 = vst [vmem:[%s6166_s19 + $0x230] sm:$0xff] %v2180_v18  ;;  %v1785_v52 = vpop.xlane.xlu2 %1784  ;;  %v2240_v34 = vadd.f32 %v6570_v58, %v2239_v59  ;;  %3042 = vrcp.f32 %v6620_v4  ;;  %v2221_v7 = vmul.f32 %v3039_v22, %v2220_v36  ;;  %vm2224_vm12 = vweird.f32 %v3039_v22  ;;  %v8406_v63 = vld [vmem:[#allocation103_spill] sm:$0xff]  ;;  %v8409_v36 = vld [vmem:[#allocation9_spill] sm:$0xff] }
 0x27f   : > { %2505 = vst [vmem:[%s6166_s19 + $0x238] sm:$0xff] %v2181_v56  ;;  %v6634_v14 = vmax.f32 %v1785_v52, 1e-20  ;;  %v2208_v21 = vsel %vm6629_vm8, %v6576_v17, %v2204_v42  ;;  %v2227_v45 = vand.u32 2147483647, %v6554_v33  ;;  %v8399_v17 = vld [vmem:[#allocation10_spill] sm:$0xff]  ;;  %vm2223_vm14 = vweird.f32 %v6554_v33 }
 0x280   : > { %2507 = vst [vmem:[%s6166_s19 + $0x248] sm:$0xff] %v2197_v54  ;;  %v2244_v0 = vsel %vm2243_vm11, %v6570_v58, %v2240_v34  ;;  %v2213_v1 = vsel %vm6596_vm5, %v2212_v47, %v2208_v21  ;;  %v2222_v12 = vadd.f32 %v3039_v22, %v2221_v7  ;;  %v2265_v13 = vand.u32 2147483648, %v6620_v4  ;;  %vm2225_vm9 = vmor %vm2223_vm14, %vm2224_vm12  ;;  %v8408_v42 = vld [vmem:[#allocation62_spill] sm:$0xff] }
 0x281   : > { %2508 = vst [vmem:[%s6166_s19 + $0x250] sm:$0xff] %v2198_v37  ;;  %3044 = vrcp.f32 %v6634_v14  ;;  %v2249_v20 = vsel %vm6616_vm3, %v2248_v60, %v2244_v0  ;;  %v2214_v23 = vmul.f32 %v2213_v1, %v8398_v9  ;;  %v2215_v46 = vmul.f32 %v2213_v1, %v8399_v17 }
 0x282   : > { %2509 = vst [vmem:[%s6166_s19 + $0x258] sm:$0xff] %v2199_v5  ;;  %v2216_v38 = vmul.f32 %v2213_v1, %v8400_v26  ;;  %v2217_v3 = vmul.f32 %v2213_v1, %v8401_v41  ;;  %v2230_v2 = vor.u32 1.1754944e-38, %v2229_v55  ;;  %v2250_v31 = vmul.f32 %v2249_v20, %v8402_v51 }
 0x283   : > { %v6658_v58 = vpop.eup %3040  ;;  %2510 = vst [vmem:[%s6166_s19 + $0x260] sm:$0xff] %v2214_v23  ;;  %v2226_v28 = vsel %vm2225_vm9, %v3039_v22, %v2222_v12  ;;  %vm2228_vm0 = vcmp.eq.f32.partialorder %v2227_v45, 8.507059e+37  ;;  %vm2259_vm2 = vweird.f32 %v6620_v4  ;;  %v2263_v25 = vand.u32 2147483647, %v6620_v4 }
 0x284   : > { %v3043_v18 = vpop.eup %3042  ;;  %2511 = vst [vmem:[%s6166_s19 + $0x268] sm:$0xff] %v2215_v46  ;;  %v2291_v35 = vmul.f32 %v6658_v58, %v6607_v39  ;;  %v2231_v33 = vsel %vm2228_vm0, %v2230_v2, %v2226_v28  ;;  %vm2295_vm6 = vweird.f32 %v6607_v39  ;;  %v2266_v24 = vor.u32 1.1754944e-38, %v2265_v13  ;;  %v1805_v0 = vpop.xlane.xlu0 %1804 }
 0x285   : > { %2512 = vst [vmem:[%s6166_s19 + $0x270] sm:$0xff] %v2216_v38  ;;  %v2255_v56 = vmul.f32 %v3043_v18, %v6620_v4  ;;  %v2232_v22 = vmul.f32 %v2231_v33, %v8403_v50  ;;  %v2233_v54 = vmul.f32 %v2231_v33, %v8404_v62  ;;  %v2234_v37 = vmul.f32 %v2231_v33, %v8405_v8 }
 0x286   : > { %2513 = vst [vmem:[%s6166_s19 + $0x278] sm:$0xff] %v2217_v3  ;;  %v2235_v59 = vmul.f32 %v2231_v33, %v8406_v63  ;;  %v2251_v5 = vmul.f32 %v2249_v20, %v8407_v40  ;;  %v2252_v16 = vmul.f32 %v2249_v20, %v8408_v42  ;;  %v2253_v34 = vmul.f32 %v2249_v20, %v8409_v36  ;;  %v8413_v63 = vld [vmem:[#allocation109_spill] sm:$0xff] }
 0x287   : > { %v6668_v57 = vpop.eup %3044  ;;  %v1795_v6 = vpop.xlane.xlu1 %1794  ;;  %2518 = vst [vmem:[%s6166_s19 + $0x2a0] sm:$0xff] %v2250_v31  ;;  %v2256_v53 = vsub.f32 1.0, %v2255_v56  ;;  %v2292_v47 = vsub.f32 1.0, %v2291_v35  ;;  %vm2260_vm13 = vweird.f32 %v3043_v18  ;;  %v2281_v1 = vand.u32 2147483647, %v6634_v14 }
 0x288   : > { %v2273_v52 = vmul.f32 %v6668_v57, %v6634_v14  ;;  %2514 = vst [vmem:[%s6166_s19 + $0x280] sm:$0xff] %v2232_v22  ;;  %v6687_v55 = vmax.f32 %v1795_v6, 1e-20  ;;  %v2283_v45 = vand.u32 2147483648, %v6634_v14  ;;  %vm2278_vm1 = vweird.f32 %v6668_v57  ;;  %vm2261_vm4 = vmor %vm2259_vm2, %vm2260_vm13 }
 0x289   : > { %2515 = vst [vmem:[%s6166_s19 + $0x288] sm:$0xff] %v2233_v54  ;;  %v2257_v60 = vmul.f32 %v3043_v18, %v2256_v53  ;;  %v2293_v9 = vmul.f32 %v6658_v58, %v2292_v47  ;;  %vm2296_vm7 = vweird.f32 %v6658_v58  ;;  %v2301_v46 = vand.u32 2147483648, %v6607_v39 }
 0x28a   : > { %v1800_v43 = vpop.xlane.xlu2 %1799  ;;  %v2274_v21 = vsub.f32 1.0, %v2273_v52  ;;  %2516 = vst [vmem:[%s6166_s19 + $0x290] sm:$0xff] %v2234_v37  ;;  %3046 = vrcp.f32 %v6687_v55  ;;  %v6708_v26 = vmax.f32 %v1805_v0, 1e-20  ;;  %vm2264_vm5 = vcmp.eq.f32.partialorder %v2263_v25, 8.507059e+37  ;;  %vm6719_vm3 = vmor %vm2295_vm6, %vm2296_vm7 }
 0x28b   : > { %v6690_v7 = vmax.f32 %v1800_v43, 1e-20  ;;  %2517 = vst [vmem:[%s6166_s19 + $0x298] sm:$0xff] %v2235_v59  ;;  %v2258_v20 = vadd.f32 %v3043_v18, %v2257_v60  ;;  %v2294_v17 = vadd.f32 %v6658_v58, %v2293_v9  ;;  %v2299_v3 = vand.u32 2147483647, %v6607_v39  ;;  %v8414_v59 = vld [vmem:[#allocation110_spill] sm:$0xff] }
 0x28c   : > { %v2275_v23 = vmul.f32 %v6668_v57, %v2274_v21  ;;  %2519 = vst [vmem:[%s6166_s19 + $0x2a8] sm:$0xff] %v2251_v5  ;;  %vm2277_vm15 = vweird.f32 %v6634_v14  ;;  %vm2282_vm10 = vcmp.eq.f32.partialorder %v2281_v1, 8.507059e+37  ;;  %v2284_v4 = vor.u32 1.1754944e-38, %v2283_v45 }
 0x28d   : > { %3048 = vrcp.f32 %v6690_v7  ;;  %2520 = vst [vmem:[%s6166_s19 + $0x2b0] sm:$0xff] %v2252_v16  ;;  %v2262_v38 = vsel %vm2261_vm4, %v3043_v18, %v2258_v20  ;;  %vm2279_vm8 = vmor %vm2277_vm15, %vm2278_vm1  ;;  %v2298_v14 = vsel %vm6719_vm3, %v6658_v58, %v2294_v17  ;;  %v2302_v35 = vor.u32 1.1754944e-38, %v2301_v46  ;;  %v8415_v16 = vld [vmem:[#allocation121_spill] sm:$0xff]  ;;  %v1820_v1 = vpop.xlane.xlu0 %1819 }
 0x28e   : > { %v2276_v41 = vadd.f32 %v6668_v57, %v2275_v23  ;;  %2521 = vst [vmem:[%s6166_s19 + $0x2b8] sm:$0xff] %v2253_v34  ;;  %v2267_v12 = vsel %vm2264_vm5, %v2266_v24, %v2262_v38  ;;  %3050 = vrcp.f32 %v6708_v26  ;;  %vm2300_vm11 = vcmp.eq.f32.partialorder %v2299_v3, 8.507059e+37 }
 0x28f   : > { %v2268_v2 = vmul.f32 %v2267_v12, %v5901_v61  ;;  %v2269_v51 = vmul.f32 %v2267_v12, %v5918_v32  ;;  %v2270_v31 = vmul.f32 %v2267_v12, %v5935_v15  ;;  %v2271_v18 = vmul.f32 %v2267_v12, %v5940_v30 }
 0x290   : > { %v6731_v39 = vpop.eup %3046  ;;  %v2280_v28 = vsel %vm2279_vm8, %v6668_v57, %v2276_v41  ;;  %v2303_v33 = vsel %vm2300_vm11, %v2302_v35, %v2298_v14  ;;  %vm2313_vm12 = vweird.f32 %v6687_v55  ;;  %v2317_v25 = vand.u32 2147483647, %v6687_v55  ;;  %v8422_v14 = vld [vmem:[#allocation114_spill] sm:$0xff] }
 0x291   : > { %2522 = vst [vmem:[%s6166_s19 + $0x2c0] sm:$0xff] %v2268_v2  ;;  %v2285_v61 = vsel %vm2282_vm10, %v2284_v4, %v2280_v28  ;;  %v2309_v56 = vmul.f32 %v6731_v39, %v6687_v55  ;;  %v2335_v22 = vand.u32 2147483647, %v6690_v7  ;;  %v2337_v62 = vand.u32 2147483648, %v6690_v7 }
 0x292   : > { %2523 = vst [vmem:[%s6166_s19 + $0x2c8] sm:$0xff] %v2269_v51  ;;  %v2286_v15 = vmul.f32 %v2285_v61, %v5928_v44  ;;  %v2287_v58 = vmul.f32 %v2285_v61, %v5945_v19  ;;  %v2288_v57 = vmul.f32 %v2285_v61, %v5956_v11  ;;  %v1815_v50 = vpop.xlane.xlu2 %1814  ;;  %v2289_v44 = vmul.f32 %v2285_v61, %v5967_v27  ;;  %v8412_v11 = vld [vmem:[#allocation104_spill] sm:$0xff]  ;;  %v8424_v61 = vld [vmem:[#allocation117_spill] sm:$0xff] }
 0x293   : > { %v3049_v32 = vpop.eup %3048  ;;  %v1810_v30 = vpop.xlane.xlu1 %1809  ;;  %2524 = vst [vmem:[%s6166_s19 + $0x2d0] sm:$0xff] %v2270_v31  ;;  %v2319_v19 = vand.u32 2147483648, %v6687_v55  ;;  %v2304_v54 = vmul.f32 %v2303_v33, %v8412_v11  ;;  %v2310_v8 = vsub.f32 1.0, %v2309_v56  ;;  %v2305_v27 = vmul.f32 %v2303_v33, %v8413_v63 }
 0x294   : > { %v2327_v6 = vmul.f32 %v3049_v32, %v6690_v7  ;;  %2525 = vst [vmem:[%s6166_s19 + $0x2d8] sm:$0xff] %v2271_v18  ;;  %v6754_v24 = vmax.f32 %v1810_v30, 1e-20  ;;  %v6756_v43 = vpop.eup %3050  ;;  %v2306_v40 = vmul.f32 %v2303_v33, %v8414_v59  ;;  %vm2314_vm14 = vweird.f32 %v6731_v39  ;;  %v8425_v30 = vld [vmem:[#allocation78_spill] sm:$0xff] }
 0x295   : > { %2526 = vst [vmem:[%s6166_s19 + $0x2e0] sm:$0xff] %v2286_v15  ;;  %v6762_v5 = vmax.f32 %v1815_v50, 1e-20  ;;  %v2311_v53 = vmul.f32 %v6731_v39, %v2310_v8  ;;  %vm2332_vm9 = vweird.f32 %v3049_v32  ;;  %v2345_v42 = vmul.f32 %v6756_v43, %v6708_v26  ;;  %vm6780_vm6 = vmor %vm2313_vm12, %vm2314_vm14  ;;  %v8426_v50 = vld [vmem:[#allocation122_spill] sm:$0xff] }
 0x296   : > { %v2328_v37 = vsub.f32 1.0, %v2327_v6  ;;  %2527 = vst [vmem:[%s6166_s19 + $0x2e8] sm:$0xff] %v2287_v58  ;;  %v2307_v36 = vmul.f32 %v2303_v33, %v8415_v16  ;;  %vm6770_vm0 = vcmp.eq.f32.partialorder %v2317_v25, 8.507059e+37  ;;  %vm2331_vm2 = vweird.f32 %v6690_v7 }
 0x297   : > { %2528 = vst [vmem:[%s6166_s19 + $0x2f0] sm:$0xff] %v2288_v57  ;;  %3052 = vrcp.f32 %v6754_v24  ;;  %v2312_v47 = vadd.f32 %v6731_v39, %v2311_v53  ;;  %v2346_v0 = vsub.f32 1.0, %v2345_v42  ;;  %v2320_v45 = vor.u32 1.1754944e-38, %v2319_v19  ;;  %vm2333_vm13 = vmor %vm2331_vm2, %vm2332_vm9 }
 0x298   : > { %v2329_v52 = vmul.f32 %v3049_v32, %v2328_v37  ;;  %2529 = vst [vmem:[%s6166_s19 + $0x2f8] sm:$0xff] %v2289_v44  ;;  %3054 = vrcp.f32 %v6762_v5  ;;  %vm2336_vm1 = vcmp.eq.f32.partialorder %v2335_v22, 8.507059e+37  ;;  %v2338_v7 = vor.u32 1.1754944e-38, %v2337_v62  ;;  %v8427_v62 = vld [vmem:[#allocation123_spill] sm:$0xff]  ;;  %v8428_v37 = vld [vmem:[#allocation124_spill] sm:$0xff] }
 0x299   : > { %2530 = vst [vmem:[%s6166_s19 + $0x300] sm:$0xff] %v2304_v54  ;;  %v2353_v9 = vand.u32 2147483647, %v6708_v26  ;;  %v2316_v55 = vsel %vm6780_vm6, %v6731_v39, %v2312_v47  ;;  %v2347_v23 = vmul.f32 %v6756_v43, %v2346_v0  ;;  %v2355_v17 = vand.u32 2147483648, %v6708_v26  ;;  %v8431_v0 = vld [vmem:[#allocation55_spill] sm:$0xff] }
 0x29a   : > { %v2330_v21 = vadd.f32 %v3049_v32, %v2329_v52  ;;  %2531 = vst [vmem:[%s6166_s19 + $0x308] sm:$0xff] %v2305_v27  ;;  %v2321_v46 = vsel %vm6770_vm0, %v2320_v45, %v2316_v55  ;;  %v6797_v41 = vmax.f32 %v1820_v1, 1e-20  ;;  %vm2350_vm7 = vweird.f32 %v6756_v43  ;;  %v8429_v27 = vld [vmem:[#allocation113_spill] sm:$0xff]  ;;  %v8432_v45 = vld [vmem:[#allocation19_spill] sm:$0xff]  ;;  %v8433_v55 = vld [vmem:[#allocation130_spill] sm:$0xff] }
 0x29b   : > { %2532 = vst [vmem:[%s6166_s19 + $0x310] sm:$0xff] %v2306_v40  ;;  %v2322_v3 = vmul.f32 %v2321_v46, %v5990_v48  ;;  %v2323_v12 = vmul.f32 %v2321_v46, %v5995_v10  ;;  %v2324_v4 = vmul.f32 %v2321_v46, %v6008_v49  ;;  %v2325_v2 = vmul.f32 %v2321_v46, %v6024_v29  ;;  %v1825_v18 = vpop.xlane.xlu1 %1824  ;;  %v8423_v29 = vld [vmem:[#allocation115_spill] sm:$0xff] }
 0x29c   : > { %v2334_v20 = vsel %vm2333_vm13, %v3049_v32, %v2330_v21  ;;  %2533 = vst [vmem:[%s6166_s19 + $0x318] sm:$0xff] %v2307_v36  ;;  %vm2349_vm4 = vweird.f32 %v6708_v26  ;;  %vm6805_vm5 = vcmp.eq.f32.partialorder %v2353_v9, 8.507059e+37  ;;  %v2348_v10 = vadd.f32 %v6756_v43, %v2347_v23  ;;  %v8434_v46 = vld [vmem:[#allocation63_spill] sm:$0xff] }
 0x29d   : > { %v2339_v38 = vsel %vm2336_vm1, %v2338_v7, %v2334_v20  ;;  %v3053_v13 = vpop.eup %3052  ;;  %2534 = vst [vmem:[%s6166_s19 + $0x320] sm:$0xff] %v2322_v3  ;;  %v2356_v49 = vor.u32 1.1754944e-38, %v2355_v17  ;;  %vm2351_vm15 = vmor %vm2349_vm4, %vm2350_vm7  ;;  %v2371_v26 = vand.u32 2147483647, %v6754_v24  ;;  %3056 = vrcp.f32 %v6797_v41 }
 0x29e   : > { %v3055_v31 = vpop.eup %3054  ;;  %v2340_v48 = vmul.f32 %v2339_v38, %v8422_v14  ;;  %v2363_v39 = vmul.f32 %v3053_v13, %v6754_v24  ;;  %2535 = vst [vmem:[%s6166_s19 + $0x328] sm:$0xff] %v2323_v12  ;;  %v2341_v28 = vmul.f32 %v2339_v38, %v8423_v29  ;;  %v2342_v32 = vmul.f32 %v2339_v38, %v8424_v61  ;;  %v8439_v61 = vld [vmem:[#allocation71_spill] sm:$0xff] }
 0x29f   : > { %v2381_v35 = vmul.f32 %v3055_v31, %v6762_v5  ;;  %2536 = vst [vmem:[%s6166_s19 + $0x330] sm:$0xff] %v2324_v4  ;;  %v2352_v15 = vsel %vm2351_vm15, %v6756_v43, %v2348_v10  ;;  %v2373_v33 = vand.u32 2147483648, %v6754_v24  ;;  %v2343_v57 = vmul.f32 %v2339_v38, %v8425_v30  ;;  %v8435_v4 = vld [vmem:[#allocation64_spill] sm:$0xff] }
 0x2a0   : > { %v2364_v58 = vsub.f32 1.0, %v2363_v39  ;;  %2537 = vst [vmem:[%s6166_s19 + $0x338] sm:$0xff] %v2325_v2  ;;  %v2357_v56 = vsel %vm6805_vm5, %v2356_v49, %v2352_v15  ;;  %v6826_v6 = vmax.f32 %v1825_v18, 1e-20  ;;  %vm2368_vm10 = vweird.f32 %v3053_v13  ;;  %v8436_v2 = vld [vmem:[#allocation23_spill] sm:$0xff]  ;;  %v8440_v15 = vld [vmem:[#allocation52_spill] sm:$0xff] }
 0x2a1   : > { %v2382_v25 = vsub.f32 1.0, %v2381_v35  ;;  %2538 = vst [vmem:[%s6166_s19 + $0x340] sm:$0xff] %v2340_v48  ;;  %v2358_v44 = vmul.f32 %v2357_v56, %v8426_v50  ;;  %v2389_v19 = vand.u32 2147483647, %v6762_v5  ;;  %v2391_v22 = vand.u32 2147483648, %v6762_v5  ;;  %v8437_v48 = vld [vmem:[#allocation131_spill] sm:$0xff] }
 0x2a2   : > { %2539 = vst [vmem:[%s6166_s19 + $0x348] sm:$0xff] %v2341_v28  ;;  %v2359_v11 = vmul.f32 %v2357_v56, %v8427_v62  ;;  %v2365_v54 = vmul.f32 %v3053_v13, %v2364_v58  ;;  %vm2386_vm3 = vweird.f32 %v3055_v31  ;;  %v2360_v43 = vmul.f32 %v2357_v56, %v8428_v37  ;;  %v8444_v62 = vld [vmem:[#allocation134_spill] sm:$0xff] }
 0x2a3   : > { %v2383_v8 = vmul.f32 %v3055_v31, %v2382_v25  ;;  %2540 = vst [vmem:[%s6166_s19 + $0x350] sm:$0xff] %v2342_v32  ;;  %vm2367_vm8 = vweird.f32 %v6754_v24  ;;  %3058 = vrcp.f32 %v6826_v6  ;;  %v3057_v63 = vpop.eup %3056  ;;  %v2361_v59 = vmul.f32 %v2357_v56, %v8429_v27 }
 0x2a4   : > { %2541 = vst [vmem:[%s6166_s19 + $0x358] sm:$0xff] %v2343_v57  ;;  %v2366_v40 = vadd.f32 %v3053_v13, %v2365_v54  ;;  %vm2369_vm11 = vmor %vm2367_vm8, %vm2368_vm10  ;;  %vm2385_vm12 = vweird.f32 %v6762_v5  ;;  %v2374_v52 = vor.u32 1.1754944e-38, %v2373_v33  ;;  %v2392_v42 = vor.u32 1.1754944e-38, %v2391_v22  ;;  %v8430_v5 = vld [vmem:[#allocation74_spill] sm:$0xff]  ;;  %v8441_v33 = vld [vmem:[#allocation16_spill] sm:$0xff] }
 0x2a5   : > { %v2384_v53 = vadd.f32 %v3055_v31, %v2383_v8  ;;  %2542 = vst [vmem:[%s6166_s19 + $0x360] sm:$0xff] %v2358_v44  ;;  %vm2387_vm14 = vmor %vm2385_vm12, %vm2386_vm3  ;;  %v2399_v24 = vmul.f32 %v3057_v63, %v6797_v41  ;;  %vm2372_vm9 = vcmp.eq.f32.partialorder %v2371_v26, 8.507059e+37  ;;  %vm2390_vm0 = vcmp.eq.f32.partialorder %v2389_v19, 8.507059e+37  ;;  %v8438_v26 = vld [vmem:[#allocation70_spill] sm:$0xff]  ;;  %v8443_v19 = vld [vmem:[#allocation128_spill] sm:$0xff] }
 0x2a6   : > { %2543 = vst [vmem:[%s6166_s19 + $0x368] sm:$0xff] %v2359_v11  ;;  %v2370_v16 = vsel %vm2369_vm11, %v3053_v13, %v2366_v40  ;;  %v2407_v23 = vand.u32 2147483647, %v6797_v41  ;;  %v2409_v17 = vand.u32 2147483648, %v6797_v41  ;;  %vm2404_vm2 = vweird.f32 %v3057_v63  ;;  %v8445_v54 = vld [vmem:[#allocation143_spill] sm:$0xff] }
 0x2a7   : > { %v2388_v36 = vsel %vm2387_vm14, %v3055_v31, %v2384_v53  ;;  %2544 = vst [vmem:[%s6166_s19 + $0x370] sm:$0xff] %v2360_v43  ;;  %v2375_v34 = vsel %vm2372_vm9, %v2374_v52, %v2370_v16  ;;  %v2400_v60 = vsub.f32 1.0, %v2399_v24  ;;  %vm2403_vm6 = vweird.f32 %v6797_v41 }
 0x2a8   : > { %v2393_v47 = vsel %vm2390_vm0, %v2392_v42, %v2388_v36  ;;  %2545 = vst [vmem:[%s6166_s19 + $0x378] sm:$0xff] %v2361_v59  ;;  %v2376_v21 = vmul.f32 %v2375_v34, %v8430_v5  ;;  %v2377_v1 = vmul.f32 %v2375_v34, %v8431_v0  ;;  %v2378_v7 = vmul.f32 %v2375_v34, %v8432_v45  ;;  %vm2405_vm13 = vmor %vm2403_vm6, %vm2404_vm2 }
 0x2a9   : > { %v3059_v9 = vpop.eup %3058  ;;  %v2379_v20 = vmul.f32 %v2375_v34, %v8433_v55  ;;  %v2394_v38 = vmul.f32 %v2393_v47, %v8434_v46  ;;  %v2401_v3 = vmul.f32 %v3057_v63, %v2400_v60  ;;  %v2395_v13 = vmul.f32 %v2393_v47, %v8435_v4 }
 0x2aa   : > { %2546 = vst [vmem:[%s6166_s19 + $0x380] sm:$0xff] %v2376_v21  ;;  %v2417_v12 = vmul.f32 %v3059_v9, %v6826_v6  ;;  %v2396_v51 = vmul.f32 %v2393_v47, %v8436_v2  ;;  %v2397_v10 = vmul.f32 %v2393_v47, %v8437_v48  ;;  %v2410_v49 = vor.u32 1.1754944e-38, %v2409_v17 }
 0x2ab   : > { %2547 = vst [vmem:[%s6166_s19 + $0x388] sm:$0xff] %v2377_v1  ;;  %v2402_v31 = vadd.f32 %v3057_v63, %v2401_v3  ;;  %vm2408_vm1 = vcmp.eq.f32.partialorder %v2407_v23, 8.507059e+37  ;;  %v2427_v29 = vand.u32 2147483648, %v6826_v6  ;;  %vm2422_vm7 = vweird.f32 %v3059_v9 }
 0x2ac   : > { %2548 = vst [vmem:[%s6166_s19 + $0x390] sm:$0xff] %v2378_v7  ;;  %v2418_v14 = vsub.f32 1.0, %v2417_v12  ;;  %v2425_v41 = vand.u32 2147483647, %v6826_v6  ;;  %vm2421_vm4 = vweird.f32 %v6826_v6  ;;  %v8442_v6 = vld [vmem:[#allocation22_spill] sm:$0xff] }
 0x2ad   : > { %2549 = vst [vmem:[%s6166_s19 + $0x398] sm:$0xff] %v2379_v20  ;;  %v2406_v39 = vsel %vm2405_vm13, %v3057_v63, %v2402_v31  ;;  %vm2423_vm5 = vmor %vm2421_vm4, %vm2422_vm7  ;;  %v2428_v56 = vor.u32 1.1754944e-38, %v2427_v29 }
 0x2ae   : > { %2550 = vst [vmem:[%s6166_s19 + $0x3a0] sm:$0xff] %v2394_v38  ;;  %v2419_v18 = vmul.f32 %v3059_v9, %v2418_v14  ;;  %v2411_v28 = vsel %vm2408_vm1, %v2410_v49, %v2406_v39  ;;  %vm2426_vm15 = vcmp.eq.f32.partialorder %v2425_v41, 8.507059e+37 }
 0x2af   : > { %2551 = vst [vmem:[%s6166_s19 + $0x3a8] sm:$0xff] %v2395_v13  ;;  %v2412_v35 = vmul.f32 %v2411_v28, %v8438_v26  ;;  %v2413_v32 = vmul.f32 %v2411_v28, %v8439_v61  ;;  %v2414_v58 = vmul.f32 %v2411_v28, %v8440_v15  ;;  %v2415_v30 = vmul.f32 %v2411_v28, %v8441_v33 }
 0x2b0   : > { %2552 = vst [vmem:[%s6166_s19 + $0x3b0] sm:$0xff] %v2396_v51  ;;  %v2420_v57 = vadd.f32 %v3059_v9, %v2419_v18 }
 0x2b1   : > { %2553 = vst [vmem:[%s6166_s19 + $0x3b8] sm:$0xff] %v2397_v10 }
 0x2b2   : > { %2554 = vst [vmem:[%s6166_s19 + $0x3c0] sm:$0xff] %v2412_v35  ;;  %v2424_v25 = vsel %vm2423_vm5, %v3059_v9, %v2420_v57 }
 0x2b3   : > { %2555 = vst [vmem:[%s6166_s19 + $0x3c8] sm:$0xff] %v2413_v32  ;;  %v2429_v50 = vsel %vm2426_vm15, %v2428_v56, %v2424_v25 }
 0x2b4   : > { %2556 = vst [vmem:[%s6166_s19 + $0x3d0] sm:$0xff] %v2414_v58  ;;  %v2430_v44 = vmul.f32 %v2429_v50, %v8442_v6  ;;  %v2431_v22 = vmul.f32 %v2429_v50, %v8443_v19  ;;  %v2432_v11 = vmul.f32 %v2429_v50, %v8444_v62  ;;  %v2433_v8 = vmul.f32 %v2429_v50, %v8445_v54 }
 0x2b5   : > { %2557 = vst [vmem:[%s6166_s19 + $0x3d8] sm:$0xff] %v2415_v30 }
 0x2b6   : > { %2558 = vst [vmem:[%s6166_s19 + $0x3e0] sm:$0xff] %v2430_v44 }
 0x2b7   : > { %2559 = vst [vmem:[%s6166_s19 + $0x3e8] sm:$0xff] %v2431_v22 }
 0x2b8   : > { %2560 = vst [vmem:[%s6166_s19 + $0x3f0] sm:$0xff] %v2432_v11 }
 0x2b9   : > { %2561 = vst [vmem:[%s6166_s19 + $0x3f8] sm:$0xff] %v2433_v8 }
 0x2ba   : > { %3117 = shalt.err (!%p3114_p7)
}
 0x2bb   : > { %s3161_s29 = smov 512   ;;  %s3162_s23 = smov 32  }
 0x2bc   : > { %2688 = dma.vmem_to_hbm [thread:$0]  (%p3233_p11), %s2577_s26, 16384, %s2579_s28, %s2563_s30, %s3161_s29, %s3161_s29, %s3162_s23  }
 0x2bd PF: > { %s2593_s11 = sand.u32 1, %s3144_s12   ;;  %p8446_p5 = scmp.ge.s32.totalorder %s3156_s15, 2 }
 0x2be   : > { %s2594_s17 = scalar_lea.sflag [#allocation4], %s2593_s11 }
 0x2bf   : > { %p2695_p8 = pnand %p8446_p5, %p3237_p12 }
 0x2c1   : > { %p2696_p10 = pneg %p2695_p8 }
 0x2c3   : > { %3139 = dma.done.wait (%p2696_p10), %s2594_s17, 16384  }
 0x2c4   : > { %3141 = vsyncadd (%p2696_p10), %s2594_s17, 4294950912  ;;  %p16_p2 = scmp.ge.s32.totalorder %s3208_s18, 4   ;;  %s8447_s12 = smov %s3148_s13 }
 0x2c5   : > { %s8448_s13 = smov %s3152_s14  ;;  %s8449_s14 = smov %s3220_s21 }
 0x2c6   : > { %s8450_s15 = smov %s3208_s18  ;;  %18 = sbr.rel (!%p16_p2) target bundleno = 5 (0x5), region = 80 }
 0x2cb   :  { %2600 = vsyncpa [#allocation3], 1 }
 0x2cc   :  { %2602 = vsyncpa [#allocation3 + $0x1], 1 }
 0x2cd   :  { %2603 = vsyncpa [#allocation4], 1 }
 0x2ce   :  { %2605 = vsyncpa [#allocation4 + $0x1], 1 }

</bundles_post_ra>
